<compile_context>
chip_gen: v6e
topology: v6e:2x2x1
jax: 0.10.0
libtpu: 0.0.40
codegen_flags: <defaults>
</compile_context>

<pallas_src>
import jax
import jax.numpy as jnp
from jax.experimental import pallas as pl
from jax.experimental.pallas import tpu as pltpu

_EPS = 1e-5
_BF16 = jnp.bfloat16


# ---------------------------------------------------------------------------
# BlockSpec helper: every operand is a single full-array VMEM block.
# ---------------------------------------------------------------------------
def _vspec(shape):
    nd = len(shape)
    return pl.BlockSpec(shape, lambda i, _nd=nd: (0,) * _nd)


def _vmem_limit_bytes():
    # v7x has 64 MiB physical VMEM per core; v5e/v6e have 128 MiB.
    try:
        kind = jax.devices()[0].device_kind.lower()
    except Exception:
        kind = ""
    if "v7" in kind:
        return 48 * 1024 * 1024
    return 96 * 1024 * 1024


# ---------------------------------------------------------------------------
# Fully fused forward kernel.
#   refs layout (in order):
#     cm     (N, Fa+Fe) bf16   - scatter_mean([x[row], edge_attr*imp], col)
#     mask   (N, 1)     f32    - 1.0 where the node has >=1 incoming edge
#     A      (N, N)     bf16   - mean adjacency (row-normalized)
#     w_ae (Fc, H0) bf16, b_ae (1, H0) f32
#     pre_w (L,128,128) bf16, pre_b/pre_gamma/pre_beta (L,1,128) f32
#     per SAGE layer: w_fused (2*in_c, H) bf16, bl (1,H) f32
#     per post layer: w bf16, b/gamma/beta (1,H) f32
#     out_w (H,1) bf16, out_b (1,1) f32
#     alphas (L_pre + L_post,) f32 in SMEM
#     o_ref (N, 1) f32
# ---------------------------------------------------------------------------
def _make_fused_kernel(num_pre_mlp, num_sage, num_post):
    def bn_prelu(y, gamma, beta, alpha):
        # Single-pass batch statistics in f32 (training-mode BatchNorm1d).
        mu = jnp.mean(y, axis=0, keepdims=True)
        var = jnp.maximum(jnp.mean(y * y, axis=0, keepdims=True) - mu * mu, 0.0)
        scale = gamma * jax.lax.rsqrt(var + _EPS)
        y = (y - mu) * scale + beta
        return jnp.where(y >= 0.0, y, alpha * y)

    def kernel(*refs):
        it = iter(refs)
        cm_ref = next(it)
        mask_ref = next(it)
        a_ref = next(it)
        wae_ref = next(it)
        bae_ref = next(it)
        prew_ref = next(it)
        preb_ref = next(it)
        preg_ref = next(it)
        prebt_ref = next(it)
        sage_refs = [(next(it), next(it)) for _ in range(num_sage)]
        post_refs = [(next(it), next(it), next(it), next(it))
                     for _ in range(num_post)]
        outw_ref = next(it)
        outb_ref = next(it)
        alphas_ref = next(it)
        o_ref = next(it)

        # ---- AtomEdgeInteraction (re-associated):
        #      scatter_mean(Linear(combined)) == Linear(scatter_mean(combined))
        #      with the bias masked to 0 on isolated nodes.
        h = (jnp.dot(cm_ref[...], wae_ref[...],
                     preferred_element_type=jnp.float32)
             + bae_ref[...] * mask_ref[...])
        h = h.astype(_BF16)

        # ---- Preprocess MLP stack (Linear + BN + PReLU), weights stacked.
        for l in range(num_pre_mlp):
            y = jnp.dot(h, prew_ref[l],
                        preferred_element_type=jnp.float32) + preb_ref[l]
            h = bn_prelu(y, preg_ref[l], prebt_ref[l],
                         alphas_ref[l]).astype(_BF16)

        # ---- SAGEConv + ReLU, lin_l / lin_r fused into one K-stacked matmul:
        #      relu([A@h | h] @ [[wl];[wr]] + bl)
        for w_ref, b_ref in sage_refs:
            nbr = jnp.dot(a_ref[...], h,
                          preferred_element_type=jnp.float32).astype(_BF16)
            y = jnp.dot(jnp.concatenate([nbr, h], axis=-1), w_ref[...],
                        preferred_element_type=jnp.float32) + b_ref[...]
            h = jnp.maximum(y, 0.0).astype(_BF16)

        # ---- Postprocess MLP stack.
        for i, (w_ref, b_ref, g_ref, bt_ref) in enumerate(post_refs):
            y = jnp.dot(h, w_ref[...],
                        preferred_element_type=jnp.float32) + b_ref[...]
            h = bn_prelu(y, g_ref[...], bt_ref[...],
                         alphas_ref[num_pre_mlp + i]).astype(_BF16)

        # ---- Output layer (Fout = 1), fused into the same kernel.
        o_ref[...] = (jnp.dot(h, outw_ref[...],
                              preferred_element_type=jnp.float32)
                      + outb_ref[...])

    return kernel


# ---------------------------------------------------------------------------
# Parameter initialization (deterministic, PyTorch-style uniform fan-in).
# ---------------------------------------------------------------------------
def _linear_init(key, fan_in, fan_out):
    k = 1.0 / jnp.sqrt(jnp.float32(fan_in))
    kw, kb = jax.random.split(key)
    w = jax.random.uniform(kw, (fan_in, fan_out), jnp.float32, -k, k)
    b = jax.random.uniform(kb, (fan_out,), jnp.float32, -k, k)
    return w, b


def init_params(key, atom_in, edge_dim, pre_hidden, sage_hidden,
                post_hidden, out_features):
    params = {}
    keys = jax.random.split(key, 64)
    ki = iter(range(64))

    # AtomEdgeInteraction: Linear(atom_in + edge_dim, pre_hidden[0])
    w, b = _linear_init(keys[next(ki)], atom_in + edge_dim, pre_hidden[0])
    params["atom_edge"] = {"w": w, "b": b}

    # Preprocess MLP layers 1..len-1 : Linear + BN + PReLU + Dropout(0)
    # NOTE: weight stacking assumes all preprocess hidden sizes are identical.
    pre = []
    for i in range(1, len(pre_hidden)):
        w, b = _linear_init(keys[next(ki)], pre_hidden[i - 1], pre_hidden[i])
        pre.append({"w": w, "b": b,
                    "gamma": jnp.ones((pre_hidden[i],), jnp.float32),
                    "beta": jnp.zeros((pre_hidden[i],), jnp.float32),
                    "alpha": jnp.float32(0.25)})
    params["preprocess"] = pre

    # SAGE convolutions (lin_l has bias, lin_r has none — PyG semantics).
    sage = []
    in_c = pre_hidden[-1]
    for h in sage_hidden:
        wl, bl = _linear_init(keys[next(ki)], in_c, h)
        wr, _ = _linear_init(keys[next(ki)], in_c, h)
        sage.append({"wl": wl, "bl": bl, "wr": wr})
        in_c = h
    params["sage"] = sage

    # Postprocess MLP
    post = []
    in_c = sage_hidden[-1]
    for h in post_hidden:
        w, b = _linear_init(keys[next(ki)], in_c, h)
        post.append({"w": w, "b": b,
                     "gamma": jnp.ones((h,), jnp.float32),
                     "beta": jnp.zeros((h,), jnp.float32),
                     "alpha": jnp.float32(0.25)})
        in_c = h
    params["postprocess"] = post

    # Output layer
    w, b = _linear_init(keys[next(ki)], post_hidden[-1], out_features)
    params["output"] = {"w": w, "b": b}
    return params


# ---------------------------------------------------------------------------
# Forward pass (mirrors Model.forward): scatter-based setup in plain JAX
# (segment mean of combined features, mean adjacency) + ONE fused Pallas
# kernel that runs the whole network with the activation resident in VMEM.
# ---------------------------------------------------------------------------
def forward(params, x, edge_index, edge_attr, edge_importance=1.0):
    num_nodes = x.shape[0]
    row, col = edge_index[0], edge_index[1]

    # --- scatter-based graph setup (no dense one-hot matmuls) --------------
    counts = jnp.zeros((num_nodes,), jnp.float32).at[col].add(1.0)
    inv = 1.0 / jnp.maximum(counts, 1.0)

    combined = jnp.concatenate([x[row], edge_attr * edge_importance], axis=-1)
    cm = jnp.zeros((num_nodes, combined.shape[1]), jnp.float32)
    cm = cm.at[col].add(combined) * inv[:, None]            # scatter_mean
    cm = cm.astype(_BF16)

    mask = (counts > 0.0).astype(jnp.float32)[:, None]       # (N, 1)

    adj = jnp.zeros((num_nodes, num_nodes), jnp.float32)
    adj = adj.at[col, row].add(1.0)
    A = (adj * inv[:, None]).astype(_BF16)                   # mean adjacency

    ae = params["atom_edge"]
    pre = params["preprocess"]
    sage = params["sage"]
    post = params["postprocess"]
    out = params["output"]

    num_pre_mlp = len(pre)
    num_sage = len(sage)
    num_post = len(post)

    h0 = ae["w"].shape[1]

    pre_w = jnp.stack([lp["w"] for lp in pre]).astype(_BF16)   # (L,128,128)
    pre_b = jnp.stack([lp["b"] for lp in pre])[:, None, :]     # (L,1,128)
    pre_g = jnp.stack([lp["gamma"] for lp in pre])[:, None, :]
    pre_bt = jnp.stack([lp["beta"] for lp in pre])[:, None, :]

    alphas = jnp.stack([lp["alpha"] for lp in pre] +
                       [lp["alpha"] for lp in post]).astype(jnp.float32)

    inputs = [cm, mask, A,
              ae["w"].astype(_BF16), ae["b"].reshape(1, h0),
              pre_w, pre_b, pre_g, pre_bt]
    for sp in sage:
        # Fuse lin_l / lin_r along K: [nbr | h] @ [[wl];[wr]]
        w_fused = jnp.concatenate([sp["wl"], sp["wr"]], axis=0).astype(_BF16)
        inputs += [w_fused, sp["bl"].reshape(1, -1)]
    for lp in post:
        inputs += [lp["w"].astype(_BF16), lp["b"].reshape(1, -1),
                   lp["gamma"].reshape(1, -1), lp["beta"].reshape(1, -1)]
    inputs += [out["w"].astype(_BF16), out["b"].reshape(1, 1), alphas]

    in_specs = [_vspec(a.shape) for a in inputs[:-1]]
    in_specs.append(pl.BlockSpec(memory_space=pltpu.MemorySpace.SMEM))

    out_features = out["w"].shape[1]
    kernel = _make_fused_kernel(num_pre_mlp, num_sage, num_post)

    y = pl.pallas_call(
        kernel,
        grid=(1,),
        in_specs=in_specs,
        out_specs=_vspec((num_nodes, out_features)),
        out_shape=jax.ShapeDtypeStruct((num_nodes, out_features), jnp.float32),
        compiler_params=pltpu.CompilerParams(
            dimension_semantics=("arbitrary",),
            vmem_limit_bytes=_vmem_limit_bytes()),
    )(*inputs)
    return y[:, 0]  # .squeeze(-1)


if __name__ == "__main__":
    # Small synthetic graph consistent with the module's forward signature.
    # TODO(synk): the original script loads QM_137k.pt; shapes here are
    # synthetic, scaled-down stand-ins (same architecture structure).
    N_NODES, N_EDGES = 64, 128
    ATOM_IN, EDGE_DIM = 16, 8
    PRE_HIDDEN = [128] * 9
    SAGE_HIDDEN = [256, 256]
    POST_HIDDEN = [256, 128]
    OUT_FEATURES = 1

    root = jax.random.PRNGKey(0)
    kx, ke, ki, kp = jax.random.split(root, 4)

    x = jax.random.normal(kx, (N_NODES, ATOM_IN), jnp.float32)
    edge_attr = jax.random.normal(ke, (N_EDGES, EDGE_DIM), jnp.float32)
    edge_index = jax.random.randint(ki, (2, N_EDGES), 0, N_NODES, jnp.int32)

    params = init_params(kp, ATOM_IN, EDGE_DIM, PRE_HIDDEN, SAGE_HIDDEN,
                         POST_HIDDEN, OUT_FEATURES)

    out = jax.jit(forward)(params, x, edge_index, edge_attr)
    jax.block_until_ready(out)

    assert out.shape == (N_NODES,), out.shape
    assert jnp.all(jnp.isfinite(out))
    print("KERNEL_OK")
</pallas_src>

<mosaic_0001>
module attributes {stable_mosaic.version = 11 : i64} {
  func.func private @main(%arg0: i32) attributes {dimension_semantics = [#tpu.dimension_semantics<core_parallel>], iteration_bounds = array<i64: 2>, tpu.core_type = #tpu.core_type<sc_scalar_subcore>, window_params = []} {
    return
  }
}

module attributes {stable_mosaic.version = 11 : i64} {
  func.func private @main(%arg0: i32) attributes {dimension_semantics = [#tpu.dimension_semantics<core_parallel>], iteration_bounds = array<i64: 2>, tpu.core_type = #tpu.core_type<sc_scalar_subcore>, window_params = []} {
    return
  }
}

module attributes {stable_mosaic.version = 11 : i64} {
  func.func @kernel(%arg0: i32, %arg1: memref<64x24xbf16, #tpu.memory_space<vmem>>, %arg2: memref<64x1xf32, #tpu.memory_space<vmem>>, %arg3: memref<64x64xbf16, #tpu.memory_space<vmem>>, %arg4: memref<24x128xbf16, #tpu.memory_space<vmem>>, %arg5: memref<1x128xf32, #tpu.memory_space<vmem>>, %arg6: memref<8x128x128xbf16, #tpu.memory_space<vmem>>, %arg7: memref<8x1x128xf32, #tpu.memory_space<vmem>>, %arg8: memref<8x1x128xf32, #tpu.memory_space<vmem>>, %arg9: memref<8x1x128xf32, #tpu.memory_space<vmem>>, %arg10: memref<256x256xbf16, #tpu.memory_space<vmem>>, %arg11: memref<1x256xf32, #tpu.memory_space<vmem>>, %arg12: memref<512x256xbf16, #tpu.memory_space<vmem>>, %arg13: memref<1x256xf32, #tpu.memory_space<vmem>>, %arg14: memref<256x256xbf16, #tpu.memory_space<vmem>>, %arg15: memref<1x256xf32, #tpu.memory_space<vmem>>, %arg16: memref<1x256xf32, #tpu.memory_space<vmem>>, %arg17: memref<1x256xf32, #tpu.memory_space<vmem>>, %arg18: memref<256x128xbf16, #tpu.memory_space<vmem>>, %arg19: memref<1x128xf32, #tpu.memory_space<vmem>>, %arg20: memref<1x128xf32, #tpu.memory_space<vmem>>, %arg21: memref<1x128xf32, #tpu.memory_space<vmem>>, %arg22: memref<128x1xbf16, #tpu.memory_space<vmem>>, %arg23: memref<1x1xf32, #tpu.memory_space<vmem>>, %arg24: memref<10xf32, #tpu.memory_space<smem>>, %arg25: memref<64x1xf32, #tpu.memory_space<vmem>>) attributes {dimension_semantics = [#tpu.dimension_semantics<arbitrary>], iteration_bounds = array<i64: 1>, scalar_prefetch = 0 : i64, scratch_operands = 0 : i64, tpu.core_type = #tpu.core_type<tc>, window_params = [{pipeline_mode = #tpu.pipeline_mode<synchronous>, transform_indices = @transform_0, window_bounds = array<i64: 64, 24>}, {pipeline_mode = #tpu.pipeline_mode<synchronous>, transform_indices = @transform_1, window_bounds = array<i64: 64, 1>}, {pipeline_mode = #tpu.pipeline_mode<synchronous>, transform_indices = @transform_2, window_bounds = array<i64: 64, 64>}, {pipeline_mode = #tpu.pipeline_mode<synchronous>, transform_indices = @transform_3, window_bounds = array<i64: 24, 128>}, {pipeline_mode = #tpu.pipeline_mode<synchronous>, transform_indices = @transform_4, window_bounds = array<i64: 1, 128>}, {pipeline_mode = #tpu.pipeline_mode<synchronous>, transform_indices = @transform_5, window_bounds = array<i64: 8, 128, 128>}, {pipeline_mode = #tpu.pipeline_mode<synchronous>, transform_indices = @transform_6, window_bounds = array<i64: 8, 1, 128>}, {pipeline_mode = #tpu.pipeline_mode<synchronous>, transform_indices = @transform_7, window_bounds = array<i64: 8, 1, 128>}, {pipeline_mode = #tpu.pipeline_mode<synchronous>, transform_indices = @transform_8, window_bounds = array<i64: 8, 1, 128>}, {pipeline_mode = #tpu.pipeline_mode<synchronous>, transform_indices = @transform_9, window_bounds = array<i64: 256, 256>}, {pipeline_mode = #tpu.pipeline_mode<synchronous>, transform_indices = @transform_10, window_bounds = array<i64: 1, 256>}, {pipeline_mode = #tpu.pipeline_mode<synchronous>, transform_indices = @transform_11, window_bounds = array<i64: 512, 256>}, {pipeline_mode = #tpu.pipeline_mode<synchronous>, transform_indices = @transform_12, window_bounds = array<i64: 1, 256>}, {pipeline_mode = #tpu.pipeline_mode<synchronous>, transform_indices = @transform_13, window_bounds = array<i64: 256, 256>}, {pipeline_mode = #tpu.pipeline_mode<synchronous>, transform_indices = @transform_14, window_bounds = array<i64: 1, 256>}, {pipeline_mode = #tpu.pipeline_mode<synchronous>, transform_indices = @transform_15, window_bounds = array<i64: 1, 256>}, {pipeline_mode = #tpu.pipeline_mode<synchronous>, transform_indices = @transform_16, window_bounds = array<i64: 1, 256>}, {pipeline_mode = #tpu.pipeline_mode<synchronous>, transform_indices = @transform_17, window_bounds = array<i64: 256, 128>}, {pipeline_mode = #tpu.pipeline_mode<synchronous>, transform_indices = @transform_18, window_bounds = array<i64: 1, 128>}, {pipeline_mode = #tpu.pipeline_mode<synchronous>, transform_indices = @transform_19, window_bounds = array<i64: 1, 128>}, {pipeline_mode = #tpu.pipeline_mode<synchronous>, transform_indices = @transform_20, window_bounds = array<i64: 1, 128>}, {pipeline_mode = #tpu.pipeline_mode<synchronous>, transform_indices = @transform_21, window_bounds = array<i64: 128, 1>}, {pipeline_mode = #tpu.pipeline_mode<synchronous>, transform_indices = @transform_22, window_bounds = array<i64: 1, 1>}, {transform_indices = @transform_23, window_bounds = array<i64: 10>}, {pipeline_mode = #tpu.pipeline_mode<synchronous>, transform_indices = @transform_24, window_bounds = array<i64: 64, 1>}]} {
    %c0 = arith.constant 0 : index
    %c0_0 = arith.constant 0 : index
    %0 = vector.load %arg1[%c0, %c0_0] : memref<64x24xbf16, #tpu.memory_space<vmem>>, vector<64x24xbf16>
    %c0_1 = arith.constant 0 : index
    %c0_2 = arith.constant 0 : index
    %1 = vector.load %arg4[%c0_1, %c0_2] : memref<24x128xbf16, #tpu.memory_space<vmem>>, vector<24x128xbf16>
    %cst = arith.constant dense<0.000000e+00> : vector<64x128xf32>
    %2 = tpu.matmul %0, %1, %cst {dimension_numbers = #tpu.dot_dimension_numbers<[1], [0], [0], [1], [0, 0, 1, 1], [], []>} : vector<64x24xbf16>, vector<24x128xbf16>, vector<64x128xf32> -> vector<64x128xf32>
    %c0_3 = arith.constant 0 : index
    %c0_4 = arith.constant 0 : index
    %3 = vector.load %arg5[%c0_3, %c0_4] : memref<1x128xf32, #tpu.memory_space<vmem>>, vector<1x128xf32>
    %c0_5 = arith.constant 0 : index
    %c0_6 = arith.constant 0 : index
    %4 = vector.load %arg2[%c0_5, %c0_6] : memref<64x1xf32, #tpu.memory_space<vmem>>, vector<64x1xf32>
    %5 = vector.broadcast %3 : vector<1x128xf32> to vector<64x128xf32>
    %6 = vector.broadcast %4 : vector<64x1xf32> to vector<64x128xf32>
    %7 = arith.mulf %5, %6 : vector<64x128xf32>
    %8 = arith.addf %2, %7 : vector<64x128xf32>
    %9 = arith.truncf %8 : vector<64x128xf32> to vector<64x128xbf16>
    %c0_7 = arith.constant 0 : index
    %c0_8 = arith.constant 0 : index
    %c0_9 = arith.constant 0 : index
    %10 = vector.load %arg6[%c0_7, %c0_8, %c0_9] : memref<8x128x128xbf16, #tpu.memory_space<vmem>>, vector<1x128x128xbf16>
    %11 = vector.shape_cast %10 : vector<1x128x128xbf16> to vector<128x128xbf16>
    %cst_10 = arith.constant dense<0.000000e+00> : vector<64x128xf32>
    %12 = tpu.matmul %9, %11, %cst_10 {dimension_numbers = #tpu.dot_dimension_numbers<[1], [0], [0], [1], [0, 0, 1, 1], [], []>} : vector<64x128xbf16>, vector<128x128xbf16>, vector<64x128xf32> -> vector<64x128xf32>
    %c0_11 = arith.constant 0 : index
    %c0_12 = arith.constant 0 : index
    %c0_13 = arith.constant 0 : index
    %13 = vector.load %arg7[%c0_11, %c0_12, %c0_13] : memref<8x1x128xf32, #tpu.memory_space<vmem>>, vector<1x1x128xf32>
    %14 = vector.shape_cast %13 : vector<1x1x128xf32> to vector<1x128xf32>
    %15 = vector.broadcast %14 : vector<1x128xf32> to vector<64x128xf32>
    %16 = arith.addf %12, %15 : vector<64x128xf32>
    %c0_14 = arith.constant 0 : index
    %c0_15 = arith.constant 0 : index
    %c0_16 = arith.constant 0 : index
    %17 = vector.load %arg8[%c0_14, %c0_15, %c0_16] : memref<8x1x128xf32, #tpu.memory_space<vmem>>, vector<1x1x128xf32>
    %18 = vector.shape_cast %17 : vector<1x1x128xf32> to vector<1x128xf32>
    %c0_17 = arith.constant 0 : index
    %c0_18 = arith.constant 0 : index
    %c0_19 = arith.constant 0 : index
    %19 = vector.load %arg9[%c0_17, %c0_18, %c0_19] : memref<8x1x128xf32, #tpu.memory_space<vmem>>, vector<1x1x128xf32>
    %20 = vector.shape_cast %19 : vector<1x1x128xf32> to vector<1x128xf32>
    %c0_20 = arith.constant 0 : index
    %21 = memref.load %arg24[%c0_20] : memref<10xf32, #tpu.memory_space<smem>>
    %cst_21 = arith.constant dense<0.000000e+00> : vector<128xf32>
    %22 = vector.multi_reduction <add>, %16, %cst_21 [0] : vector<64x128xf32> to vector<128xf32>
    %23 = vector.shape_cast %22 : vector<128xf32> to vector<1x128xf32>
    %cst_22 = arith.constant 6.400000e+01 : f32
    %24 = vector.broadcast %cst_22 : f32 to vector<1x128xf32>
    %25 = arith.divf %23, %24 : vector<1x128xf32>
    %26 = arith.mulf %16, %16 : vector<64x128xf32>
    %cst_23 = arith.constant dense<0.000000e+00> : vector<128xf32>
    %27 = vector.multi_reduction <add>, %26, %cst_23 [0] : vector<64x128xf32> to vector<128xf32>
    %28 = vector.shape_cast %27 : vector<128xf32> to vector<1x128xf32>
    %cst_24 = arith.constant 6.400000e+01 : f32
    %29 = vector.broadcast %cst_24 : f32 to vector<1x128xf32>
    %30 = arith.divf %28, %29 : vector<1x128xf32>
    %31 = arith.mulf %25, %25 : vector<1x128xf32>
    %32 = arith.subf %30, %31 : vector<1x128xf32>
    %cst_25 = arith.constant 0.000000e+00 : f32
    %33 = vector.broadcast %cst_25 : f32 to vector<1x128xf32>
    %34 = arith.maximumf %32, %33 : vector<1x128xf32>
    %cst_26 = arith.constant 9.99999974E-6 : f32
    %35 = vector.broadcast %cst_26 : f32 to vector<1x128xf32>
    %36 = arith.addf %34, %35 : vector<1x128xf32>
    %37 = math.rsqrt %36 : vector<1x128xf32>
    %38 = arith.mulf %18, %37 : vector<1x128xf32>
    %39 = vector.broadcast %25 : vector<1x128xf32> to vector<64x128xf32>
    %40 = arith.subf %16, %39 : vector<64x128xf32>
    %41 = vector.broadcast %38 : vector<1x128xf32> to vector<64x128xf32>
    %42 = arith.mulf %40, %41 : vector<64x128xf32>
    %43 = vector.broadcast %20 : vector<1x128xf32> to vector<64x128xf32>
    %44 = arith.addf %42, %43 : vector<64x128xf32>
    %cst_27 = arith.constant 0.000000e+00 : f32
    %45 = vector.broadcast %cst_27 : f32 to vector<64x128xf32>
    %46 = arith.cmpf oge, %44, %45 : vector<64x128xf32>
    %47 = vector.broadcast %21 : f32 to vector<64x128xf32>
    %48 = arith.mulf %47, %44 : vector<64x128xf32>
    %49 = arith.select %46, %44, %48 : vector<64x128xi1>, vector<64x128xf32>
    %50 = arith.truncf %49 : vector<64x128xf32> to vector<64x128xbf16>
    %c1 = arith.constant 1 : index
    %c0_28 = arith.constant 0 : index
    %c0_29 = arith.constant 0 : index
    %51 = vector.load %arg6[%c1, %c0_28, %c0_29] : memref<8x128x128xbf16, #tpu.memory_space<vmem>>, vector<1x128x128xbf16>
    %52 = vector.shape_cast %51 : vector<1x128x128xbf16> to vector<128x128xbf16>
    %cst_30 = arith.constant dense<0.000000e+00> : vector<64x128xf32>
    %53 = tpu.matmul %50, %52, %cst_30 {dimension_numbers = #tpu.dot_dimension_numbers<[1], [0], [0], [1], [0, 0, 1, 1], [], []>} : vector<64x128xbf16>, vector<128x128xbf16>, vector<64x128xf32> -> vector<64x128xf32>
    %c1_31 = arith.constant 1 : index
    %c0_32 = arith.constant 0 : index
    %c0_33 = arith.constant 0 : index
    %54 = vector.load %arg7[%c1_31, %c0_32, %c0_33] : memref<8x1x128xf32, #tpu.memory_space<vmem>>, vector<1x1x128xf32>
    %55 = vector.shape_cast %54 : vector<1x1x128xf32> to vector<1x128xf32>
    %56 = vector.broadcast %55 : vector<1x128xf32> to vector<64x128xf32>
    %57 = arith.addf %53, %56 : vector<64x128xf32>
    %c1_34 = arith.constant 1 : index
    %c0_35 = arith.constant 0 : index
    %c0_36 = arith.constant 0 : index
    %58 = vector.load %arg8[%c1_34, %c0_35, %c0_36] : memref<8x1x128xf32, #tpu.memory_space<vmem>>, vector<1x1x128xf32>
    %59 = vector.shape_cast %58 : vector<1x1x128xf32> to vector<1x128xf32>
    %c1_37 = arith.constant 1 : index
    %c0_38 = arith.constant 0 : index
    %c0_39 = arith.constant 0 : index
    %60 = vector.load %arg9[%c1_37, %c0_38, %c0_39] : memref<8x1x128xf32, #tpu.memory_space<vmem>>, vector<1x1x128xf32>
    %61 = vector.shape_cast %60 : vector<1x1x128xf32> to vector<1x128xf32>
    %c1_40 = arith.constant 1 : index
    %62 = memref.load %arg24[%c1_40] : memref<10xf32, #tpu.memory_space<smem>>
    %cst_41 = arith.constant dense<0.000000e+00> : vector<128xf32>
    %63 = vector.multi_reduction <add>, %57, %cst_41 [0] : vector<64x128xf32> to vector<128xf32>
    %64 = vector.shape_cast %63 : vector<128xf32> to vector<1x128xf32>
    %cst_42 = arith.constant 6.400000e+01 : f32
    %65 = vector.broadcast %cst_42 : f32 to vector<1x128xf32>
    %66 = arith.divf %64, %65 : vector<1x128xf32>
    %67 = arith.mulf %57, %57 : vector<64x128xf32>
    %cst_43 = arith.constant dense<0.000000e+00> : vector<128xf32>
    %68 = vector.multi_reduction <add>, %67, %cst_43 [0] : vector<64x128xf32> to vector<128xf32>
    %69 = vector.shape_cast %68 : vector<128xf32> to vector<1x128xf32>
    %cst_44 = arith.constant 6.400000e+01 : f32
    %70 = vector.broadcast %cst_44 : f32 to vector<1x128xf32>
    %71 = arith.divf %69, %70 : vector<1x128xf32>
    %72 = arith.mulf %66, %66 : vector<1x128xf32>
    %73 = arith.subf %71, %72 : vector<1x128xf32>
    %cst_45 = arith.constant 0.000000e+00 : f32
    %74 = vector.broadcast %cst_45 : f32 to vector<1x128xf32>
    %75 = arith.maximumf %73, %74 : vector<1x128xf32>
    %cst_46 = arith.constant 9.99999974E-6 : f32
    %76 = vector.broadcast %cst_46 : f32 to vector<1x128xf32>
    %77 = arith.addf %75, %76 : vector<1x128xf32>
    %78 = math.rsqrt %77 : vector<1x128xf32>
    %79 = arith.mulf %59, %78 : vector<1x128xf32>
    %80 = vector.broadcast %66 : vector<1x128xf32> to vector<64x128xf32>
    %81 = arith.subf %57, %80 : vector<64x128xf32>
    %82 = vector.broadcast %79 : vector<1x128xf32> to vector<64x128xf32>
    %83 = arith.mulf %81, %82 : vector<64x128xf32>
    %84 = vector.broadcast %61 : vector<1x128xf32> to vector<64x128xf32>
    %85 = arith.addf %83, %84 : vector<64x128xf32>
    %cst_47 = arith.constant 0.000000e+00 : f32
    %86 = vector.broadcast %cst_47 : f32 to vector<64x128xf32>
    %87 = arith.cmpf oge, %85, %86 : vector<64x128xf32>
    %88 = vector.broadcast %62 : f32 to vector<64x128xf32>
    %89 = arith.mulf %88, %85 : vector<64x128xf32>
    %90 = arith.select %87, %85, %89 : vector<64x128xi1>, vector<64x128xf32>
    %91 = arith.truncf %90 : vector<64x128xf32> to vector<64x128xbf16>
    %c2 = arith.constant 2 : index
    %c0_48 = arith.constant 0 : index
    %c0_49 = arith.constant 0 : index
    %92 = vector.load %arg6[%c2, %c0_48, %c0_49] : memref<8x128x128xbf16, #tpu.memory_space<vmem>>, vector<1x128x128xbf16>
    %93 = vector.shape_cast %92 : vector<1x128x128xbf16> to vector<128x128xbf16>
    %cst_50 = arith.constant dense<0.000000e+00> : vector<64x128xf32>
    %94 = tpu.matmul %91, %93, %cst_50 {dimension_numbers = #tpu.dot_dimension_numbers<[1], [0], [0], [1], [0, 0, 1, 1], [], []>} : vector<64x128xbf16>, vector<128x128xbf16>, vector<64x128xf32> -> vector<64x128xf32>
    %c2_51 = arith.constant 2 : index
    %c0_52 = arith.constant 0 : index
    %c0_53 = arith.constant 0 : index
    %95 = vector.load %arg7[%c2_51, %c0_52, %c0_53] : memref<8x1x128xf32, #tpu.memory_space<vmem>>, vector<1x1x128xf32>
    %96 = vector.shape_cast %95 : vector<1x1x128xf32> to vector<1x128xf32>
    %97 = vector.broadcast %96 : vector<1x128xf32> to vector<64x128xf32>
    %98 = arith.addf %94, %97 : vector<64x128xf32>
    %c2_54 = arith.constant 2 : index
    %c0_55 = arith.constant 0 : index
    %c0_56 = arith.constant 0 : index
    %99 = vector.load %arg8[%c2_54, %c0_55, %c0_56] : memref<8x1x128xf32, #tpu.memory_space<vmem>>, vector<1x1x128xf32>
    %100 = vector.shape_cast %99 : vector<1x1x128xf32> to vector<1x128xf32>
    %c2_57 = arith.constant 2 : index
    %c0_58 = arith.constant 0 : index
    %c0_59 = arith.constant 0 : index
    %101 = vector.load %arg9[%c2_57, %c0_58, %c0_59] : memref<8x1x128xf32, #tpu.memory_space<vmem>>, vector<1x1x128xf32>
    %102 = vector.shape_cast %101 : vector<1x1x128xf32> to vector<1x128xf32>
    %c2_60 = arith.constant 2 : index
    %103 = memref.load %arg24[%c2_60] : memref<10xf32, #tpu.memory_space<smem>>
    %cst_61 = arith.constant dense<0.000000e+00> : vector<128xf32>
    %104 = vector.multi_reduction <add>, %98, %cst_61 [0] : vector<64x128xf32> to vector<128xf32>
    %105 = vector.shape_cast %104 : vector<128xf32> to vector<1x128xf32>
    %cst_62 = arith.constant 6.400000e+01 : f32
    %106 = vector.broadcast %cst_62 : f32 to vector<1x128xf32>
    %107 = arith.divf %105, %106 : vector<1x128xf32>
    %108 = arith.mulf %98, %98 : vector<64x128xf32>
    %cst_63 = arith.constant dense<0.000000e+00> : vector<128xf32>
    %109 = vector.multi_reduction <add>, %108, %cst_63 [0] : vector<64x128xf32> to vector<128xf32>
    %110 = vector.shape_cast %109 : vector<128xf32> to vector<1x128xf32>
    %cst_64 = arith.constant 6.400000e+01 : f32
    %111 = vector.broadcast %cst_64 : f32 to vector<1x128xf32>
    %112 = arith.divf %110, %111 : vector<1x128xf32>
    %113 = arith.mulf %107, %107 : vector<1x128xf32>
    %114 = arith.subf %112, %113 : vector<1x128xf32>
    %cst_65 = arith.constant 0.000000e+00 : f32
    %115 = vector.broadcast %cst_65 : f32 to vector<1x128xf32>
    %116 = arith.maximumf %114, %115 : vector<1x128xf32>
    %cst_66 = arith.constant 9.99999974E-6 : f32
    %117 = vector.broadcast %cst_66 : f32 to vector<1x128xf32>
    %118 = arith.addf %116, %117 : vector<1x128xf32>
    %119 = math.rsqrt %118 : vector<1x128xf32>
    %120 = arith.mulf %100, %119 : vector<1x128xf32>
    %121 = vector.broadcast %107 : vector<1x128xf32> to vector<64x128xf32>
    %122 = arith.subf %98, %121 : vector<64x128xf32>
    %123 = vector.broadcast %120 : vector<1x128xf32> to vector<64x128xf32>
    %124 = arith.mulf %122, %123 : vector<64x128xf32>
    %125 = vector.broadcast %102 : vector<1x128xf32> to vector<64x128xf32>
    %126 = arith.addf %124, %125 : vector<64x128xf32>
    %cst_67 = arith.constant 0.000000e+00 : f32
    %127 = vector.broadcast %cst_67 : f32 to vector<64x128xf32>
    %128 = arith.cmpf oge, %126, %127 : vector<64x128xf32>
    %129 = vector.broadcast %103 : f32 to vector<64x128xf32>
    %130 = arith.mulf %129, %126 : vector<64x128xf32>
    %131 = arith.select %128, %126, %130 : vector<64x128xi1>, vector<64x128xf32>
    %132 = arith.truncf %131 : vector<64x128xf32> to vector<64x128xbf16>
    %c3 = arith.constant 3 : index
    %c0_68 = arith.constant 0 : index
    %c0_69 = arith.constant 0 : index
    %133 = vector.load %arg6[%c3, %c0_68, %c0_69] : memref<8x128x128xbf16, #tpu.memory_space<vmem>>, vector<1x128x128xbf16>
    %134 = vector.shape_cast %133 : vector<1x128x128xbf16> to vector<128x128xbf16>
    %cst_70 = arith.constant dense<0.000000e+00> : vector<64x128xf32>
    %135 = tpu.matmul %132, %134, %cst_70 {dimension_numbers = #tpu.dot_dimension_numbers<[1], [0], [0], [1], [0, 0, 1, 1], [], []>} : vector<64x128xbf16>, vector<128x128xbf16>, vector<64x128xf32> -> vector<64x128xf32>
    %c3_71 = arith.constant 3 : index
    %c0_72 = arith.constant 0 : index
    %c0_73 = arith.constant 0 : index
    %136 = vector.load %arg7[%c3_71, %c0_72, %c0_73] : memref<8x1x128xf32, #tpu.memory_space<vmem>>, vector<1x1x128xf32>
    %137 = vector.shape_cast %136 : vector<1x1x128xf32> to vector<1x128xf32>
    %138 = vector.broadcast %137 : vector<1x128xf32> to vector<64x128xf32>
    %139 = arith.addf %135, %138 : vector<64x128xf32>
    %c3_74 = arith.constant 3 : index
    %c0_75 = arith.constant 0 : index
    %c0_76 = arith.constant 0 : index
    %140 = vector.load %arg8[%c3_74, %c0_75, %c0_76] : memref<8x1x128xf32, #tpu.memory_space<vmem>>, vector<1x1x128xf32>
    %141 = vector.shape_cast %140 : vector<1x1x128xf32> to vector<1x128xf32>
    %c3_77 = arith.constant 3 : index
    %c0_78 = arith.constant 0 : index
    %c0_79 = arith.constant 0 : index
    %142 = vector.load %arg9[%c3_77, %c0_78, %c0_79] : memref<8x1x128xf32, #tpu.memory_space<vmem>>, vector<1x1x128xf32>
    %143 = vector.shape_cast %142 : vector<1x1x128xf32> to vector<1x128xf32>
    %c3_80 = arith.constant 3 : index
    %144 = memref.load %arg24[%c3_80] : memref<10xf32, #tpu.memory_space<smem>>
    %cst_81 = arith.constant dense<0.000000e+00> : vector<128xf32>
    %145 = vector.multi_reduction <add>, %139, %cst_81 [0] : vector<64x128xf32> to vector<128xf32>
    %146 = vector.shape_cast %145 : vector<128xf32> to vector<1x128xf32>
    %cst_82 = arith.constant 6.400000e+01 : f32
    %147 = vector.broadcast %cst_82 : f32 to vector<1x128xf32>
    %148 = arith.divf %146, %147 : vector<1x128xf32>
    %149 = arith.mulf %139, %139 : vector<64x128xf32>
    %cst_83 = arith.constant dense<0.000000e+00> : vector<128xf32>
    %150 = vector.multi_reduction <add>, %149, %cst_83 [0] : vector<64x128xf32> to vector<128xf32>
    %151 = vector.shape_cast %150 : vector<128xf32> to vector<1x128xf32>
    %cst_84 = arith.constant 6.400000e+01 : f32
    %152 = vector.broadcast %cst_84 : f32 to vector<1x128xf32>
    %153 = arith.divf %151, %152 : vector<1x128xf32>
    %154 = arith.mulf %148, %148 : vector<1x128xf32>
    %155 = arith.subf %153, %154 : vector<1x128xf32>
    %cst_85 = arith.constant 0.000000e+00 : f32
    %156 = vector.broadcast %cst_85 : f32 to vector<1x128xf32>
    %157 = arith.maximumf %155, %156 : vector<1x128xf32>
    %cst_86 = arith.constant 9.99999974E-6 : f32
    %158 = vector.broadcast %cst_86 : f32 to vector<1x128xf32>
    %159 = arith.addf %157, %158 : vector<1x128xf32>
    %160 = math.rsqrt %159 : vector<1x128xf32>
    %161 = arith.mulf %141, %160 : vector<1x128xf32>
    %162 = vector.broadcast %148 : vector<1x128xf32> to vector<64x128xf32>
    %163 = arith.subf %139, %162 : vector<64x128xf32>
    %164 = vector.broadcast %161 : vector<1x128xf32> to vector<64x128xf32>
    %165 = arith.mulf %163, %164 : vector<64x128xf32>
    %166 = vector.broadcast %143 : vector<1x128xf32> to vector<64x128xf32>
    %167 = arith.addf %165, %166 : vector<64x128xf32>
    %cst_87 = arith.constant 0.000000e+00 : f32
    %168 = vector.broadcast %cst_87 : f32 to vector<64x128xf32>
    %169 = arith.cmpf oge, %167, %168 : vector<64x128xf32>
    %170 = vector.broadcast %144 : f32 to vector<64x128xf32>
    %171 = arith.mulf %170, %167 : vector<64x128xf32>
    %172 = arith.select %169, %167, %171 : vector<64x128xi1>, vector<64x128xf32>
    %173 = arith.truncf %172 : vector<64x128xf32> to vector<64x128xbf16>
    %c4 = arith.constant 4 : index
    %c0_88 = arith.constant 0 : index
    %c0_89 = arith.constant 0 : index
    %174 = vector.load %arg6[%c4, %c0_88, %c0_89] : memref<8x128x128xbf16, #tpu.memory_space<vmem>>, vector<1x128x128xbf16>
    %175 = vector.shape_cast %174 : vector<1x128x128xbf16> to vector<128x128xbf16>
    %cst_90 = arith.constant dense<0.000000e+00> : vector<64x128xf32>
    %176 = tpu.matmul %173, %175, %cst_90 {dimension_numbers = #tpu.dot_dimension_numbers<[1], [0], [0], [1], [0, 0, 1, 1], [], []>} : vector<64x128xbf16>, vector<128x128xbf16>, vector<64x128xf32> -> vector<64x128xf32>
    %c4_91 = arith.constant 4 : index
    %c0_92 = arith.constant 0 : index
    %c0_93 = arith.constant 0 : index
    %177 = vector.load %arg7[%c4_91, %c0_92, %c0_93] : memref<8x1x128xf32, #tpu.memory_space<vmem>>, vector<1x1x128xf32>
    %178 = vector.shape_cast %177 : vector<1x1x128xf32> to vector<1x128xf32>
    %179 = vector.broadcast %178 : vector<1x128xf32> to vector<64x128xf32>
    %180 = arith.addf %176, %179 : vector<64x128xf32>
    %c4_94 = arith.constant 4 : index
    %c0_95 = arith.constant 0 : index
    %c0_96 = arith.constant 0 : index
    %181 = vector.load %arg8[%c4_94, %c0_95, %c0_96] : memref<8x1x128xf32, #tpu.memory_space<vmem>>, vector<1x1x128xf32>
    %182 = vector.shape_cast %181 : vector<1x1x128xf32> to vector<1x128xf32>
    %c4_97 = arith.constant 4 : index
    %c0_98 = arith.constant 0 : index
    %c0_99 = arith.constant 0 : index
    %183 = vector.load %arg9[%c4_97, %c0_98, %c0_99] : memref<8x1x128xf32, #tpu.memory_space<vmem>>, vector<1x1x128xf32>
    %184 = vector.shape_cast %183 : vector<1x1x128xf32> to vector<1x128xf32>
    %c4_100 = arith.constant 4 : index
    %185 = memref.load %arg24[%c4_100] : memref<10xf32, #tpu.memory_space<smem>>
    %cst_101 = arith.constant dense<0.000000e+00> : vector<128xf32>
    %186 = vector.multi_reduction <add>, %180, %cst_101 [0] : vector<64x128xf32> to vector<128xf32>
    %187 = vector.shape_cast %186 : vector<128xf32> to vector<1x128xf32>
    %cst_102 = arith.constant 6.400000e+01 : f32
    %188 = vector.broadcast %cst_102 : f32 to vector<1x128xf32>
    %189 = arith.divf %187, %188 : vector<1x128xf32>
    %190 = arith.mulf %180, %180 : vector<64x128xf32>
    %cst_103 = arith.constant dense<0.000000e+00> : vector<128xf32>
    %191 = vector.multi_reduction <add>, %190, %cst_103 [0] : vector<64x128xf32> to vector<128xf32>
    %192 = vector.shape_cast %191 : vector<128xf32> to vector<1x128xf32>
    %cst_104 = arith.constant 6.400000e+01 : f32
    %193 = vector.broadcast %cst_104 : f32 to vector<1x128xf32>
    %194 = arith.divf %192, %193 : vector<1x128xf32>
    %195 = arith.mulf %189, %189 : vector<1x128xf32>
    %196 = arith.subf %194, %195 : vector<1x128xf32>
    %cst_105 = arith.constant 0.000000e+00 : f32
    %197 = vector.broadcast %cst_105 : f32 to vector<1x128xf32>
    %198 = arith.maximumf %196, %197 : vector<1x128xf32>
    %cst_106 = arith.constant 9.99999974E-6 : f32
    %199 = vector.broadcast %cst_106 : f32 to vector<1x128xf32>
    %200 = arith.addf %198, %199 : vector<1x128xf32>
    %201 = math.rsqrt %200 : vector<1x128xf32>
    %202 = arith.mulf %182, %201 : vector<1x128xf32>
    %203 = vector.broadcast %189 : vector<1x128xf32> to vector<64x128xf32>
    %204 = arith.subf %180, %203 : vector<64x128xf32>
    %205 = vector.broadcast %202 : vector<1x128xf32> to vector<64x128xf32>
    %206 = arith.mulf %204, %205 : vector<64x128xf32>
    %207 = vector.broadcast %184 : vector<1x128xf32> to vector<64x128xf32>
    %208 = arith.addf %206, %207 : vector<64x128xf32>
    %cst_107 = arith.constant 0.000000e+00 : f32
    %209 = vector.broadcast %cst_107 : f32 to vector<64x128xf32>
    %210 = arith.cmpf oge, %208, %209 : vector<64x128xf32>
    %211 = vector.broadcast %185 : f32 to vector<64x128xf32>
    %212 = arith.mulf %211, %208 : vector<64x128xf32>
    %213 = arith.select %210, %208, %212 : vector<64x128xi1>, vector<64x128xf32>
    %214 = arith.truncf %213 : vector<64x128xf32> to vector<64x128xbf16>
    %c5 = arith.constant 5 : index
    %c0_108 = arith.constant 0 : index
    %c0_109 = arith.constant 0 : index
    %215 = vector.load %arg6[%c5, %c0_108, %c0_109] : memref<8x128x128xbf16, #tpu.memory_space<vmem>>, vector<1x128x128xbf16>
    %216 = vector.shape_cast %215 : vector<1x128x128xbf16> to vector<128x128xbf16>
    %cst_110 = arith.constant dense<0.000000e+00> : vector<64x128xf32>
    %217 = tpu.matmul %214, %216, %cst_110 {dimension_numbers = #tpu.dot_dimension_numbers<[1], [0], [0], [1], [0, 0, 1, 1], [], []>} : vector<64x128xbf16>, vector<128x128xbf16>, vector<64x128xf32> -> vector<64x128xf32>
    %c5_111 = arith.constant 5 : index
    %c0_112 = arith.constant 0 : index
    %c0_113 = arith.constant 0 : index
    %218 = vector.load %arg7[%c5_111, %c0_112, %c0_113] : memref<8x1x128xf32, #tpu.memory_space<vmem>>, vector<1x1x128xf32>
    %219 = vector.shape_cast %218 : vector<1x1x128xf32> to vector<1x128xf32>
    %220 = vector.broadcast %219 : vector<1x128xf32> to vector<64x128xf32>
    %221 = arith.addf %217, %220 : vector<64x128xf32>
    %c5_114 = arith.constant 5 : index
    %c0_115 = arith.constant 0 : index
    %c0_116 = arith.constant 0 : index
    %222 = vector.load %arg8[%c5_114, %c0_115, %c0_116] : memref<8x1x128xf32, #tpu.memory_space<vmem>>, vector<1x1x128xf32>
    %223 = vector.shape_cast %222 : vector<1x1x128xf32> to vector<1x128xf32>
    %c5_117 = arith.constant 5 : index
    %c0_118 = arith.constant 0 : index
    %c0_119 = arith.constant 0 : index
    %224 = vector.load %arg9[%c5_117, %c0_118, %c0_119] : memref<8x1x128xf32, #tpu.memory_space<vmem>>, vector<1x1x128xf32>
    %225 = vector.shape_cast %224 : vector<1x1x128xf32> to vector<1x128xf32>
    %c5_120 = arith.constant 5 : index
    %226 = memref.load %arg24[%c5_120] : memref<10xf32, #tpu.memory_space<smem>>
    %cst_121 = arith.constant dense<0.000000e+00> : vector<128xf32>
    %227 = vector.multi_reduction <add>, %221, %cst_121 [0] : vector<64x128xf32> to vector<128xf32>
    %228 = vector.shape_cast %227 : vector<128xf32> to vector<1x128xf32>
    %cst_122 = arith.constant 6.400000e+01 : f32
    %229 = vector.broadcast %cst_122 : f32 to vector<1x128xf32>
    %230 = arith.divf %228, %229 : vector<1x128xf32>
    %231 = arith.mulf %221, %221 : vector<64x128xf32>
    %cst_123 = arith.constant dense<0.000000e+00> : vector<128xf32>
    %232 = vector.multi_reduction <add>, %231, %cst_123 [0] : vector<64x128xf32> to vector<128xf32>
    %233 = vector.shape_cast %232 : vector<128xf32> to vector<1x128xf32>
    %cst_124 = arith.constant 6.400000e+01 : f32
    %234 = vector.broadcast %cst_124 : f32 to vector<1x128xf32>
    %235 = arith.divf %233, %234 : vector<1x128xf32>
    %236 = arith.mulf %230, %230 : vector<1x128xf32>
    %237 = arith.subf %235, %236 : vector<1x128xf32>
    %cst_125 = arith.constant 0.000000e+00 : f32
    %238 = vector.broadcast %cst_125 : f32 to vector<1x128xf32>
    %239 = arith.maximumf %237, %238 : vector<1x128xf32>
    %cst_126 = arith.constant 9.99999974E-6 : f32
    %240 = vector.broadcast %cst_126 : f32 to vector<1x128xf32>
    %241 = arith.addf %239, %240 : vector<1x128xf32>
    %242 = math.rsqrt %241 : vector<1x128xf32>
    %243 = arith.mulf %223, %242 : vector<1x128xf32>
    %244 = vector.broadcast %230 : vector<1x128xf32> to vector<64x128xf32>
    %245 = arith.subf %221, %244 : vector<64x128xf32>
    %246 = vector.broadcast %243 : vector<1x128xf32> to vector<64x128xf32>
    %247 = arith.mulf %245, %246 : vector<64x128xf32>
    %248 = vector.broadcast %225 : vector<1x128xf32> to vector<64x128xf32>
    %249 = arith.addf %247, %248 : vector<64x128xf32>
    %cst_127 = arith.constant 0.000000e+00 : f32
    %250 = vector.broadcast %cst_127 : f32 to vector<64x128xf32>
    %251 = arith.cmpf oge, %249, %250 : vector<64x128xf32>
    %252 = vector.broadcast %226 : f32 to vector<64x128xf32>
    %253 = arith.mulf %252, %249 : vector<64x128xf32>
    %254 = arith.select %251, %249, %253 : vector<64x128xi1>, vector<64x128xf32>
    %255 = arith.truncf %254 : vector<64x128xf32> to vector<64x128xbf16>
    %c6 = arith.constant 6 : index
    %c0_128 = arith.constant 0 : index
    %c0_129 = arith.constant 0 : index
    %256 = vector.load %arg6[%c6, %c0_128, %c0_129] : memref<8x128x128xbf16, #tpu.memory_space<vmem>>, vector<1x128x128xbf16>
    %257 = vector.shape_cast %256 : vector<1x128x128xbf16> to vector<128x128xbf16>
    %cst_130 = arith.constant dense<0.000000e+00> : vector<64x128xf32>
    %258 = tpu.matmul %255, %257, %cst_130 {dimension_numbers = #tpu.dot_dimension_numbers<[1], [0], [0], [1], [0, 0, 1, 1], [], []>} : vector<64x128xbf16>, vector<128x128xbf16>, vector<64x128xf32> -> vector<64x128xf32>
    %c6_131 = arith.constant 6 : index
    %c0_132 = arith.constant 0 : index
    %c0_133 = arith.constant 0 : index
    %259 = vector.load %arg7[%c6_131, %c0_132, %c0_133] : memref<8x1x128xf32, #tpu.memory_space<vmem>>, vector<1x1x128xf32>
    %260 = vector.shape_cast %259 : vector<1x1x128xf32> to vector<1x128xf32>
    %261 = vector.broadcast %260 : vector<1x128xf32> to vector<64x128xf32>
    %262 = arith.addf %258, %261 : vector<64x128xf32>
    %c6_134 = arith.constant 6 : index
    %c0_135 = arith.constant 0 : index
    %c0_136 = arith.constant 0 : index
    %263 = vector.load %arg8[%c6_134, %c0_135, %c0_136] : memref<8x1x128xf32, #tpu.memory_space<vmem>>, vector<1x1x128xf32>
    %264 = vector.shape_cast %263 : vector<1x1x128xf32> to vector<1x128xf32>
    %c6_137 = arith.constant 6 : index
    %c0_138 = arith.constant 0 : index
    %c0_139 = arith.constant 0 : index
    %265 = vector.load %arg9[%c6_137, %c0_138, %c0_139] : memref<8x1x128xf32, #tpu.memory_space<vmem>>, vector<1x1x128xf32>
    %266 = vector.shape_cast %265 : vector<1x1x128xf32> to vector<1x128xf32>
    %c6_140 = arith.constant 6 : index
    %267 = memref.load %arg24[%c6_140] : memref<10xf32, #tpu.memory_space<smem>>
    %cst_141 = arith.constant dense<0.000000e+00> : vector<128xf32>
    %268 = vector.multi_reduction <add>, %262, %cst_141 [0] : vector<64x128xf32> to vector<128xf32>
    %269 = vector.shape_cast %268 : vector<128xf32> to vector<1x128xf32>
    %cst_142 = arith.constant 6.400000e+01 : f32
    %270 = vector.broadcast %cst_142 : f32 to vector<1x128xf32>
    %271 = arith.divf %269, %270 : vector<1x128xf32>
    %272 = arith.mulf %262, %262 : vector<64x128xf32>
    %cst_143 = arith.constant dense<0.000000e+00> : vector<128xf32>
    %273 = vector.multi_reduction <add>, %272, %cst_143 [0] : vector<64x128xf32> to vector<128xf32>
    %274 = vector.shape_cast %273 : vector<128xf32> to vector<1x128xf32>
    %cst_144 = arith.constant 6.400000e+01 : f32
    %275 = vector.broadcast %cst_144 : f32 to vector<1x128xf32>
    %276 = arith.divf %274, %275 : vector<1x128xf32>
    %277 = arith.mulf %271, %271 : vector<1x128xf32>
    %278 = arith.subf %276, %277 : vector<1x128xf32>
    %cst_145 = arith.constant 0.000000e+00 : f32
    %279 = vector.broadcast %cst_145 : f32 to vector<1x128xf32>
    %280 = arith.maximumf %278, %279 : vector<1x128xf32>
    %cst_146 = arith.constant 9.99999974E-6 : f32
    %281 = vector.broadcast %cst_146 : f32 to vector<1x128xf32>
    %282 = arith.addf %280, %281 : vector<1x128xf32>
    %283 = math.rsqrt %282 : vector<1x128xf32>
    %284 = arith.mulf %264, %283 : vector<1x128xf32>
    %285 = vector.broadcast %271 : vector<1x128xf32> to vector<64x128xf32>
    %286 = arith.subf %262, %285 : vector<64x128xf32>
    %287 = vector.broadcast %284 : vector<1x128xf32> to vector<64x128xf32>
    %288 = arith.mulf %286, %287 : vector<64x128xf32>
    %289 = vector.broadcast %266 : vector<1x128xf32> to vector<64x128xf32>
    %290 = arith.addf %288, %289 : vector<64x128xf32>
    %cst_147 = arith.constant 0.000000e+00 : f32
    %291 = vector.broadcast %cst_147 : f32 to vector<64x128xf32>
    %292 = arith.cmpf oge, %290, %291 : vector<64x128xf32>
    %293 = vector.broadcast %267 : f32 to vector<64x128xf32>
    %294 = arith.mulf %293, %290 : vector<64x128xf32>
    %295 = arith.select %292, %290, %294 : vector<64x128xi1>, vector<64x128xf32>
    %296 = arith.truncf %295 : vector<64x128xf32> to vector<64x128xbf16>
    %c7 = arith.constant 7 : index
    %c0_148 = arith.constant 0 : index
    %c0_149 = arith.constant 0 : index
    %297 = vector.load %arg6[%c7, %c0_148, %c0_149] : memref<8x128x128xbf16, #tpu.memory_space<vmem>>, vector<1x128x128xbf16>
    %298 = vector.shape_cast %297 : vector<1x128x128xbf16> to vector<128x128xbf16>
    %cst_150 = arith.constant dense<0.000000e+00> : vector<64x128xf32>
    %299 = tpu.matmul %296, %298, %cst_150 {dimension_numbers = #tpu.dot_dimension_numbers<[1], [0], [0], [1], [0, 0, 1, 1], [], []>} : vector<64x128xbf16>, vector<128x128xbf16>, vector<64x128xf32> -> vector<64x128xf32>
    %c7_151 = arith.constant 7 : index
    %c0_152 = arith.constant 0 : index
    %c0_153 = arith.constant 0 : index
    %300 = vector.load %arg7[%c7_151, %c0_152, %c0_153] : memref<8x1x128xf32, #tpu.memory_space<vmem>>, vector<1x1x128xf32>
    %301 = vector.shape_cast %300 : vector<1x1x128xf32> to vector<1x128xf32>
    %302 = vector.broadcast %301 : vector<1x128xf32> to vector<64x128xf32>
    %303 = arith.addf %299, %302 : vector<64x128xf32>
    %c7_154 = arith.constant 7 : index
    %c0_155 = arith.constant 0 : index
    %c0_156 = arith.constant 0 : index
    %304 = vector.load %arg8[%c7_154, %c0_155, %c0_156] : memref<8x1x128xf32, #tpu.memory_space<vmem>>, vector<1x1x128xf32>
    %305 = vector.shape_cast %304 : vector<1x1x128xf32> to vector<1x128xf32>
    %c7_157 = arith.constant 7 : index
    %c0_158 = arith.constant 0 : index
    %c0_159 = arith.constant 0 : index
    %306 = vector.load %arg9[%c7_157, %c0_158, %c0_159] : memref<8x1x128xf32, #tpu.memory_space<vmem>>, vector<1x1x128xf32>
    %307 = vector.shape_cast %306 : vector<1x1x128xf32> to vector<1x128xf32>
    %c7_160 = arith.constant 7 : index
    %308 = memref.load %arg24[%c7_160] : memref<10xf32, #tpu.memory_space<smem>>
    %cst_161 = arith.constant dense<0.000000e+00> : vector<128xf32>
    %309 = vector.multi_reduction <add>, %303, %cst_161 [0] : vector<64x128xf32> to vector<128xf32>
    %310 = vector.shape_cast %309 : vector<128xf32> to vector<1x128xf32>
    %cst_162 = arith.constant 6.400000e+01 : f32
    %311 = vector.broadcast %cst_162 : f32 to vector<1x128xf32>
    %312 = arith.divf %310, %311 : vector<1x128xf32>
    %313 = arith.mulf %303, %303 : vector<64x128xf32>
    %cst_163 = arith.constant dense<0.000000e+00> : vector<128xf32>
    %314 = vector.multi_reduction <add>, %313, %cst_163 [0] : vector<64x128xf32> to vector<128xf32>
    %315 = vector.shape_cast %314 : vector<128xf32> to vector<1x128xf32>
    %cst_164 = arith.constant 6.400000e+01 : f32
    %316 = vector.broadcast %cst_164 : f32 to vector<1x128xf32>
    %317 = arith.divf %315, %316 : vector<1x128xf32>
    %318 = arith.mulf %312, %312 : vector<1x128xf32>
    %319 = arith.subf %317, %318 : vector<1x128xf32>
    %cst_165 = arith.constant 0.000000e+00 : f32
    %320 = vector.broadcast %cst_165 : f32 to vector<1x128xf32>
    %321 = arith.maximumf %319, %320 : vector<1x128xf32>
    %cst_166 = arith.constant 9.99999974E-6 : f32
    %322 = vector.broadcast %cst_166 : f32 to vector<1x128xf32>
    %323 = arith.addf %321, %322 : vector<1x128xf32>
    %324 = math.rsqrt %323 : vector<1x128xf32>
    %325 = arith.mulf %305, %324 : vector<1x128xf32>
    %326 = vector.broadcast %312 : vector<1x128xf32> to vector<64x128xf32>
    %327 = arith.subf %303, %326 : vector<64x128xf32>
    %328 = vector.broadcast %325 : vector<1x128xf32> to vector<64x128xf32>
    %329 = arith.mulf %327, %328 : vector<64x128xf32>
    %330 = vector.broadcast %307 : vector<1x128xf32> to vector<64x128xf32>
    %331 = arith.addf %329, %330 : vector<64x128xf32>
    %cst_167 = arith.constant 0.000000e+00 : f32
    %332 = vector.broadcast %cst_167 : f32 to vector<64x128xf32>
    %333 = arith.cmpf oge, %331, %332 : vector<64x128xf32>
    %334 = vector.broadcast %308 : f32 to vector<64x128xf32>
    %335 = arith.mulf %334, %331 : vector<64x128xf32>
    %336 = arith.select %333, %331, %335 : vector<64x128xi1>, vector<64x128xf32>
    %337 = arith.truncf %336 : vector<64x128xf32> to vector<64x128xbf16>
    %c0_168 = arith.constant 0 : index
    %c0_169 = arith.constant 0 : index
    %338 = vector.load %arg3[%c0_168, %c0_169] : memref<64x64xbf16, #tpu.memory_space<vmem>>, vector<64x64xbf16>
    %cst_170 = arith.constant dense<0.000000e+00> : vector<64x128xf32>
    %339 = tpu.matmul %338, %337, %cst_170 {dimension_numbers = #tpu.dot_dimension_numbers<[1], [0], [0], [1], [0, 0, 1, 1], [], []>} : vector<64x64xbf16>, vector<64x128xbf16>, vector<64x128xf32> -> vector<64x128xf32>
    %340 = arith.truncf %339 : vector<64x128xf32> to vector<64x128xbf16>
    %341 = tpu.concatenate %340, %337 in 1 : vector<64x128xbf16>, vector<64x128xbf16> -> vector<64x256xbf16>
    %c0_171 = arith.constant 0 : index
    %c0_172 = arith.constant 0 : index
    %342 = vector.load %arg10[%c0_171, %c0_172] : memref<256x256xbf16, #tpu.memory_space<vmem>>, vector<256x256xbf16>
    %cst_173 = arith.constant dense<0.000000e+00> : vector<64x256xf32>
    %343 = tpu.matmul %341, %342, %cst_173 {dimension_numbers = #tpu.dot_dimension_numbers<[1], [0], [0], [1], [0, 0, 1, 1], [], []>} : vector<64x256xbf16>, vector<256x256xbf16>, vector<64x256xf32> -> vector<64x256xf32>
    %c0_174 = arith.constant 0 : index
    %c0_175 = arith.constant 0 : index
    %344 = vector.load %arg11[%c0_174, %c0_175] : memref<1x256xf32, #tpu.memory_space<vmem>>, vector<1x256xf32>
    %345 = vector.broadcast %344 : vector<1x256xf32> to vector<64x256xf32>
    %346 = arith.addf %343, %345 : vector<64x256xf32>
    %cst_176 = arith.constant 0.000000e+00 : f32
    %347 = vector.broadcast %cst_176 : f32 to vector<64x256xf32>
    %348 = arith.maximumf %346, %347 : vector<64x256xf32>
    %349 = arith.truncf %348 : vector<64x256xf32> to vector<64x256xbf16>
    %c0_177 = arith.constant 0 : index
    %c0_178 = arith.constant 0 : index
    %350 = vector.load %arg3[%c0_177, %c0_178] : memref<64x64xbf16, #tpu.memory_space<vmem>>, vector<64x64xbf16>
    %cst_179 = arith.constant dense<0.000000e+00> : vector<64x256xf32>
    %351 = tpu.matmul %350, %349, %cst_179 {dimension_numbers = #tpu.dot_dimension_numbers<[1], [0], [0], [1], [0, 0, 1, 1], [], []>} : vector<64x64xbf16>, vector<64x256xbf16>, vector<64x256xf32> -> vector<64x256xf32>
    %352 = arith.truncf %351 : vector<64x256xf32> to vector<64x256xbf16>
    %353 = tpu.concatenate %352, %349 in 1 : vector<64x256xbf16>, vector<64x256xbf16> -> vector<64x512xbf16>
    %c0_180 = arith.constant 0 : index
    %c0_181 = arith.constant 0 : index
    %354 = vector.load %arg12[%c0_180, %c0_181] : memref<512x256xbf16, #tpu.memory_space<vmem>>, vector<512x256xbf16>
    %cst_182 = arith.constant dense<0.000000e+00> : vector<64x256xf32>
    %355 = tpu.matmul %353, %354, %cst_182 {dimension_numbers = #tpu.dot_dimension_numbers<[1], [0], [0], [1], [0, 0, 1, 1], [], []>} : vector<64x512xbf16>, vector<512x256xbf16>, vector<64x256xf32> -> vector<64x256xf32>
    %c0_183 = arith.constant 0 : index
    %c0_184 = arith.constant 0 : index
    %356 = vector.load %arg13[%c0_183, %c0_184] : memref<1x256xf32, #tpu.memory_space<vmem>>, vector<1x256xf32>
    %357 = vector.broadcast %356 : vector<1x256xf32> to vector<64x256xf32>
    %358 = arith.addf %355, %357 : vector<64x256xf32>
    %cst_185 = arith.constant 0.000000e+00 : f32
    %359 = vector.broadcast %cst_185 : f32 to vector<64x256xf32>
    %360 = arith.maximumf %358, %359 : vector<64x256xf32>
    %361 = arith.truncf %360 : vector<64x256xf32> to vector<64x256xbf16>
    %c0_186 = arith.constant 0 : index
    %c0_187 = arith.constant 0 : index
    %362 = vector.load %arg14[%c0_186, %c0_187] : memref<256x256xbf16, #tpu.memory_space<vmem>>, vector<256x256xbf16>
    %cst_188 = arith.constant dense<0.000000e+00> : vector<64x256xf32>
    %363 = tpu.matmul %361, %362, %cst_188 {dimension_numbers = #tpu.dot_dimension_numbers<[1], [0], [0], [1], [0, 0, 1, 1], [], []>} : vector<64x256xbf16>, vector<256x256xbf16>, vector<64x256xf32> -> vector<64x256xf32>
    %c0_189 = arith.constant 0 : index
    %c0_190 = arith.constant 0 : index
    %364 = vector.load %arg15[%c0_189, %c0_190] : memref<1x256xf32, #tpu.memory_space<vmem>>, vector<1x256xf32>
    %365 = vector.broadcast %364 : vector<1x256xf32> to vector<64x256xf32>
    %366 = arith.addf %363, %365 : vector<64x256xf32>
    %c0_191 = arith.constant 0 : index
    %c0_192 = arith.constant 0 : index
    %367 = vector.load %arg16[%c0_191, %c0_192] : memref<1x256xf32, #tpu.memory_space<vmem>>, vector<1x256xf32>
    %c0_193 = arith.constant 0 : index
    %c0_194 = arith.constant 0 : index
    %368 = vector.load %arg17[%c0_193, %c0_194] : memref<1x256xf32, #tpu.memory_space<vmem>>, vector<1x256xf32>
    %c8 = arith.constant 8 : index
    %369 = memref.load %arg24[%c8] : memref<10xf32, #tpu.memory_space<smem>>
    %cst_195 = arith.constant dense<0.000000e+00> : vector<256xf32>
    %370 = vector.multi_reduction <add>, %366, %cst_195 [0] : vector<64x256xf32> to vector<256xf32>
    %371 = vector.shape_cast %370 : vector<256xf32> to vector<1x256xf32>
    %cst_196 = arith.constant 6.400000e+01 : f32
    %372 = vector.broadcast %cst_196 : f32 to vector<1x256xf32>
    %373 = arith.divf %371, %372 : vector<1x256xf32>
    %374 = arith.mulf %366, %366 : vector<64x256xf32>
    %cst_197 = arith.constant dense<0.000000e+00> : vector<256xf32>
    %375 = vector.multi_reduction <add>, %374, %cst_197 [0] : vector<64x256xf32> to vector<256xf32>
    %376 = vector.shape_cast %375 : vector<256xf32> to vector<1x256xf32>
    %cst_198 = arith.constant 6.400000e+01 : f32
    %377 = vector.broadcast %cst_198 : f32 to vector<1x256xf32>
    %378 = arith.divf %376, %377 : vector<1x256xf32>
    %379 = arith.mulf %373, %373 : vector<1x256xf32>
    %380 = arith.subf %378, %379 : vector<1x256xf32>
    %cst_199 = arith.constant 0.000000e+00 : f32
    %381 = vector.broadcast %cst_199 : f32 to vector<1x256xf32>
    %382 = arith.maximumf %380, %381 : vector<1x256xf32>
    %cst_200 = arith.constant 9.99999974E-6 : f32
    %383 = vector.broadcast %cst_200 : f32 to vector<1x256xf32>
    %384 = arith.addf %382, %383 : vector<1x256xf32>
    %385 = math.rsqrt %384 : vector<1x256xf32>
    %386 = arith.mulf %367, %385 : vector<1x256xf32>
    %387 = vector.broadcast %373 : vector<1x256xf32> to vector<64x256xf32>
    %388 = arith.subf %366, %387 : vector<64x256xf32>
    %389 = vector.broadcast %386 : vector<1x256xf32> to vector<64x256xf32>
    %390 = arith.mulf %388, %389 : vector<64x256xf32>
    %391 = vector.broadcast %368 : vector<1x256xf32> to vector<64x256xf32>
    %392 = arith.addf %390, %391 : vector<64x256xf32>
    %cst_201 = arith.constant 0.000000e+00 : f32
    %393 = vector.broadcast %cst_201 : f32 to vector<64x256xf32>
    %394 = arith.cmpf oge, %392, %393 : vector<64x256xf32>
    %395 = vector.broadcast %369 : f32 to vector<64x256xf32>
    %396 = arith.mulf %395, %392 : vector<64x256xf32>
    %397 = arith.select %394, %392, %396 : vector<64x256xi1>, vector<64x256xf32>
    %398 = arith.truncf %397 : vector<64x256xf32> to vector<64x256xbf16>
    %c0_202 = arith.constant 0 : index
    %c0_203 = arith.constant 0 : index
    %399 = vector.load %arg18[%c0_202, %c0_203] : memref<256x128xbf16, #tpu.memory_space<vmem>>, vector<256x128xbf16>
    %cst_204 = arith.constant dense<0.000000e+00> : vector<64x128xf32>
    %400 = tpu.matmul %398, %399, %cst_204 {dimension_numbers = #tpu.dot_dimension_numbers<[1], [0], [0], [1], [0, 0, 1, 1], [], []>} : vector<64x256xbf16>, vector<256x128xbf16>, vector<64x128xf32> -> vector<64x128xf32>
    %c0_205 = arith.constant 0 : index
    %c0_206 = arith.constant 0 : index
    %401 = vector.load %arg19[%c0_205, %c0_206] : memref<1x128xf32, #tpu.memory_space<vmem>>, vector<1x128xf32>
    %402 = vector.broadcast %401 : vector<1x128xf32> to vector<64x128xf32>
    %403 = arith.addf %400, %402 : vector<64x128xf32>
    %c0_207 = arith.constant 0 : index
    %c0_208 = arith.constant 0 : index
    %404 = vector.load %arg20[%c0_207, %c0_208] : memref<1x128xf32, #tpu.memory_space<vmem>>, vector<1x128xf32>
    %c0_209 = arith.constant 0 : index
    %c0_210 = arith.constant 0 : index
    %405 = vector.load %arg21[%c0_209, %c0_210] : memref<1x128xf32, #tpu.memory_space<vmem>>, vector<1x128xf32>
    %c9 = arith.constant 9 : index
    %406 = memref.load %arg24[%c9] : memref<10xf32, #tpu.memory_space<smem>>
    %cst_211 = arith.constant dense<0.000000e+00> : vector<128xf32>
    %407 = vector.multi_reduction <add>, %403, %cst_211 [0] : vector<64x128xf32> to vector<128xf32>
    %408 = vector.shape_cast %407 : vector<128xf32> to vector<1x128xf32>
    %cst_212 = arith.constant 6.400000e+01 : f32
    %409 = vector.broadcast %cst_212 : f32 to vector<1x128xf32>
    %410 = arith.divf %408, %409 : vector<1x128xf32>
    %411 = arith.mulf %403, %403 : vector<64x128xf32>
    %cst_213 = arith.constant dense<0.000000e+00> : vector<128xf32>
    %412 = vector.multi_reduction <add>, %411, %cst_213 [0] : vector<64x128xf32> to vector<128xf32>
    %413 = vector.shape_cast %412 : vector<128xf32> to vector<1x128xf32>
    %cst_214 = arith.constant 6.400000e+01 : f32
    %414 = vector.broadcast %cst_214 : f32 to vector<1x128xf32>
    %415 = arith.divf %413, %414 : vector<1x128xf32>
    %416 = arith.mulf %410, %410 : vector<1x128xf32>
    %417 = arith.subf %415, %416 : vector<1x128xf32>
    %cst_215 = arith.constant 0.000000e+00 : f32
    %418 = vector.broadcast %cst_215 : f32 to vector<1x128xf32>
    %419 = arith.maximumf %417, %418 : vector<1x128xf32>
    %cst_216 = arith.constant 9.99999974E-6 : f32
    %420 = vector.broadcast %cst_216 : f32 to vector<1x128xf32>
    %421 = arith.addf %419, %420 : vector<1x128xf32>
    %422 = math.rsqrt %421 : vector<1x128xf32>
    %423 = arith.mulf %404, %422 : vector<1x128xf32>
    %424 = vector.broadcast %410 : vector<1x128xf32> to vector<64x128xf32>
    %425 = arith.subf %403, %424 : vector<64x128xf32>
    %426 = vector.broadcast %423 : vector<1x128xf32> to vector<64x128xf32>
    %427 = arith.mulf %425, %426 : vector<64x128xf32>
    %428 = vector.broadcast %405 : vector<1x128xf32> to vector<64x128xf32>
    %429 = arith.addf %427, %428 : vector<64x128xf32>
    %cst_217 = arith.constant 0.000000e+00 : f32
    %430 = vector.broadcast %cst_217 : f32 to vector<64x128xf32>
    %431 = arith.cmpf oge, %429, %430 : vector<64x128xf32>
    %432 = vector.broadcast %406 : f32 to vector<64x128xf32>
    %433 = arith.mulf %432, %429 : vector<64x128xf32>
    %434 = arith.select %431, %429, %433 : vector<64x128xi1>, vector<64x128xf32>
    %435 = arith.truncf %434 : vector<64x128xf32> to vector<64x128xbf16>
    %c0_218 = arith.constant 0 : index
    %c0_219 = arith.constant 0 : index
    %436 = vector.load %arg22[%c0_218, %c0_219] : memref<128x1xbf16, #tpu.memory_space<vmem>>, vector<128x1xbf16>
    %cst_220 = arith.constant dense<0.000000e+00> : vector<64x1xf32>
    %437 = tpu.matmul %435, %436, %cst_220 {dimension_numbers = #tpu.dot_dimension_numbers<[1], [0], [0], [1], [0, 0, 1, 1], [], []>} : vector<64x128xbf16>, vector<128x1xbf16>, vector<64x1xf32> -> vector<64x1xf32>
    %c0_221 = arith.constant 0 : index
    %c0_222 = arith.constant 0 : index
    %438 = vector.load %arg23[%c0_221, %c0_222] : memref<1x1xf32, #tpu.memory_space<vmem>>, vector<1x1xf32>
    %439 = vector.broadcast %438 : vector<1x1xf32> to vector<64x1xf32>
    %440 = arith.addf %437, %439 : vector<64x1xf32>
    %c0_223 = arith.constant 0 : index
    %c0_224 = arith.constant 0 : index
    %441 = vector.load %arg25[%c0_223, %c0_224] : memref<64x1xf32, #tpu.memory_space<vmem>>, vector<64x1xf32>
    tpu.vector_store %arg25[%c0_223, %c0_224], %440 {strides = array<i32>} : memref<64x1xf32, #tpu.memory_space<vmem>>, vector<64x1xf32>,
    return
  }
  func.func @transform_0(%arg0: i32) -> (i32, i32) {
    %c0_i32 = arith.constant 0 : i32
    %c0_i32_0 = arith.constant 0 : i32
    %c0_i32_1 = arith.constant 0 : i32
    return %c0_i32, %c0_i32_0 : i32, i32
  }
  func.func @transform_1(%arg0: i32) -> (i32, i32) {
    %c0_i32 = arith.constant 0 : i32
    %c0_i32_0 = arith.constant 0 : i32
    %c0_i32_1 = arith.constant 0 : i32
    return %c0_i32, %c0_i32_0 : i32, i32
  }
  func.func @transform_2(%arg0: i32) -> (i32, i32) {
    %c0_i32 = arith.constant 0 : i32
    %c0_i32_0 = arith.constant 0 : i32
    %c0_i32_1 = arith.constant 0 : i32
    return %c0_i32, %c0_i32_0 : i32, i32
  }
  func.func @transform_3(%arg0: i32) -> (i32, i32) {
    %c0_i32 = arith.constant 0 : i32
    %c0_i32_0 = arith.constant 0 : i32
    %c0_i32_1 = arith.constant 0 : i32
    return %c0_i32, %c0_i32_0 : i32, i32
  }
  func.func @transform_4(%arg0: i32) -> (i32, i32) {
    %c0_i32 = arith.constant 0 : i32
    %c0_i32_0 = arith.constant 0 : i32
    %c0_i32_1 = arith.constant 0 : i32
    return %c0_i32, %c0_i32_0 : i32, i32
  }
  func.func @transform_5(%arg0: i32) -> (i32, i32, i32) {
    %c0_i32 = arith.constant 0 : i32
    %c0_i32_0 = arith.constant 0 : i32
    %c0_i32_1 = arith.constant 0 : i32
    %c0_i32_2 = arith.constant 0 : i32
    return %c0_i32, %c0_i32_0, %c0_i32_1 : i32, i32, i32
  }
  func.func @transform_6(%arg0: i32) -> (i32, i32, i32) {
    %c0_i32 = arith.constant 0 : i32
    %c0_i32_0 = arith.constant 0 : i32
    %c0_i32_1 = arith.constant 0 : i32
    %c0_i32_2 = arith.constant 0 : i32
    return %c0_i32, %c0_i32_0, %c0_i32_1 : i32, i32, i32
  }
  func.func @transform_7(%arg0: i32) -> (i32, i32, i32) {
    %c0_i32 = arith.constant 0 : i32
    %c0_i32_0 = arith.constant 0 : i32
    %c0_i32_1 = arith.constant 0 : i32
    %c0_i32_2 = arith.constant 0 : i32
    return %c0_i32, %c0_i32_0, %c0_i32_1 : i32, i32, i32
  }
  func.func @transform_8(%arg0: i32) -> (i32, i32, i32) {
    %c0_i32 = arith.constant 0 : i32
    %c0_i32_0 = arith.constant 0 : i32
    %c0_i32_1 = arith.constant 0 : i32
    %c0_i32_2 = arith.constant 0 : i32
    return %c0_i32, %c0_i32_0, %c0_i32_1 : i32, i32, i32
  }
  func.func @transform_9(%arg0: i32) -> (i32, i32) {
    %c0_i32 = arith.constant 0 : i32
    %c0_i32_0 = arith.constant 0 : i32
    %c0_i32_1 = arith.constant 0 : i32
    return %c0_i32, %c0_i32_0 : i32, i32
  }
  func.func @transform_10(%arg0: i32) -> (i32, i32) {
    %c0_i32 = arith.constant 0 : i32
    %c0_i32_0 = arith.constant 0 : i32
    %c0_i32_1 = arith.constant 0 : i32
    return %c0_i32, %c0_i32_0 : i32, i32
  }
  func.func @transform_11(%arg0: i32) -> (i32, i32) {
    %c0_i32 = arith.constant 0 : i32
    %c0_i32_0 = arith.constant 0 : i32
    %c0_i32_1 = arith.constant 0 : i32
    return %c0_i32, %c0_i32_0 : i32, i32
  }
  func.func @transform_12(%arg0: i32) -> (i32, i32) {
    %c0_i32 = arith.constant 0 : i32
    %c0_i32_0 = arith.constant 0 : i32
    %c0_i32_1 = arith.constant 0 : i32
    return %c0_i32, %c0_i32_0 : i32, i32
  }
  func.func @transform_13(%arg0: i32) -> (i32, i32) {
    %c0_i32 = arith.constant 0 : i32
    %c0_i32_0 = arith.constant 0 : i32
    %c0_i32_1 = arith.constant 0 : i32
    return %c0_i32, %c0_i32_0 : i32, i32
  }
  func.func @transform_14(%arg0: i32) -> (i32, i32) {
    %c0_i32 = arith.constant 0 : i32
    %c0_i32_0 = arith.constant 0 : i32
    %c0_i32_1 = arith.constant 0 : i32
    return %c0_i32, %c0_i32_0 : i32, i32
  }
  func.func @transform_15(%arg0: i32) -> (i32, i32) {
    %c0_i32 = arith.constant 0 : i32
    %c0_i32_0 = arith.constant 0 : i32
    %c0_i32_1 = arith.constant 0 : i32
    return %c0_i32, %c0_i32_0 : i32, i32
  }
  func.func @transform_16(%arg0: i32) -> (i32, i32) {
    %c0_i32 = arith.constant 0 : i32
    %c0_i32_0 = arith.constant 0 : i32
    %c0_i32_1 = arith.constant 0 : i32
    return %c0_i32, %c0_i32_0 : i32, i32
  }
  func.func @transform_17(%arg0: i32) -> (i32, i32) {
    %c0_i32 = arith.constant 0 : i32
    %c0_i32_0 = arith.constant 0 : i32
    %c0_i32_1 = arith.constant 0 : i32
    return %c0_i32, %c0_i32_0 : i32, i32
  }
  func.func @transform_18(%arg0: i32) -> (i32, i32) {
    %c0_i32 = arith.constant 0 : i32
    %c0_i32_0 = arith.constant 0 : i32
    %c0_i32_1 = arith.constant 0 : i32
    return %c0_i32, %c0_i32_0 : i32, i32
  }
  func.func @transform_19(%arg0: i32) -> (i32, i32) {
    %c0_i32 = arith.constant 0 : i32
    %c0_i32_0 = arith.constant 0 : i32
    %c0_i32_1 = arith.constant 0 : i32
    return %c0_i32, %c0_i32_0 : i32, i32
  }
  func.func @transform_20(%arg0: i32) -> (i32, i32) {
    %c0_i32 = arith.constant 0 : i32
    %c0_i32_0 = arith.constant 0 : i32
    %c0_i32_1 = arith.constant 0 : i32
    return %c0_i32, %c0_i32_0 : i32, i32
  }
  func.func @transform_21(%arg0: i32) -> (i32, i32) {
    %c0_i32 = arith.constant 0 : i32
    %c0_i32_0 = arith.constant 0 : i32
    %c0_i32_1 = arith.constant 0 : i32
    return %c0_i32, %c0_i32_0 : i32, i32
  }
  func.func @transform_22(%arg0: i32) -> (i32, i32) {
    %c0_i32 = arith.constant 0 : i32
    %c0_i32_0 = arith.constant 0 : i32
    %c0_i32_1 = arith.constant 0 : i32
    return %c0_i32, %c0_i32_0 : i32, i32
  }
  func.func @transform_23(%arg0: i32) -> i32 {
    %c0_i32 = arith.constant 0 : i32
    %c0_i32_0 = arith.constant 0 : i32
    return %c0_i32 : i32
  }
  func.func @transform_24(%arg0: i32) -> (i32, i32) {
    %c0_i32 = arith.constant 0 : i32
    %c0_i32_0 = arith.constant 0 : i32
    %c0_i32_1 = arith.constant 0 : i32
    return %c0_i32, %c0_i32_0 : i32, i32
  }
}

</mosaic_0001>

<bundles_post_ra>
// kernel: forward.1
= control target key start
LH: loop header
LB: loop body
LE: loop exit
PB: predicated region body
PF: predicated region fallthrough
CT: control target
= control target key end

     0   :  { %s6926_s0 = inlined_call_operand.vmem [shape: bf16[64,24], index: 0, kind: input, shape index: {}]   ;;  %s6927_s1 = inlined_call_operand.vmem [shape: f32[64,1], index: 1, kind: input, shape index: {}]   ;;  %s6928_s2 = inlined_call_operand.vmem [shape: bf16[64,64], index: 2, kind: input, shape index: {}]   ;;  %s6929_s3 = inlined_call_operand.vmem [shape: bf16[24,128], index: 3, kind: input, shape index: {}]   ;;  %s6930_s4 = inlined_call_operand.vmem [shape: f32[1,128], index: 4, kind: input, shape index: {}]   ;;  %s6931_s5 = inlined_call_operand.vmem [shape: bf16[8,128,128], index: 5, kind: input, shape index: {}]   ;;  %s6932_s6 = inlined_call_operand.vmem [shape: f32[8,1,128], index: 6, kind: input, shape index: {}]   ;;  %s6933_s7 = inlined_call_operand.vmem [shape: f32[8,1,128], index: 7, kind: input, shape index: {}]   ;;  %s6934_s8 = inlined_call_operand.vmem [shape: f32[8,1,128], index: 8, kind: input, shape index: {}]   ;;  %s6935_s9 = inlined_call_operand.vmem [shape: bf16[256,256], index: 9, kind: input, shape index: {}]   ;;  %s6936_s10 = inlined_call_operand.vmem [shape: f32[1,256], index: 10, kind: input, shape index: {}]   ;;  %s6937_s11 = inlined_call_operand.vmem [shape: bf16[512,256], index: 11, kind: input, shape index: {}]   ;;  %s6938_s12 = inlined_call_operand.vmem [shape: f32[1,256], index: 12, kind: input, shape index: {}]   ;;  %s6939_s13 = inlined_call_operand.vmem [shape: bf16[256,256], index: 13, kind: input, shape index: {}]   ;;  %s6940_s14 = inlined_call_operand.vmem [shape: f32[1,256], index: 14, kind: input, shape index: {}]   ;;  %s6941_s15 = inlined_call_operand.vmem [shape: f32[1,256], index: 15, kind: input, shape index: {}]   ;;  %s6942_s16 = inlined_call_operand.vmem [shape: f32[1,256], index: 16, kind: input, shape index: {}]   ;;  %s6943_s17 = inlined_call_operand.vmem [shape: bf16[256,128], index: 17, kind: input, shape index: {}]   ;;  %s6944_s18 = inlined_call_operand.vmem [shape: f32[1,128], index: 18, kind: input, shape index: {}]   ;;  %s6945_s19 = inlined_call_operand.vmem [shape: f32[1,128], index: 19, kind: input, shape index: {}]   ;;  %s6946_s20 = inlined_call_operand.vmem [shape: f32[1,128], index: 20, kind: input, shape index: {}]   ;;  %s6947_s21 = inlined_call_operand.vmem [shape: bf16[128,1], index: 21, kind: input, shape index: {}]   ;;  %s6948_s22 = inlined_call_operand.<no memory space> [shape: f32[1,1], index: 22, kind: input, shape index: {}]   ;;  %s6949_s23 = inlined_call_operand.vmem [shape: f32[10], index: 23, kind: input, shape index: {}]   ;;  %s6950_s24 = inlined_call_operand.vmem [shape: f32[64,1], index: 24, kind: output, shape index: {}]  }
   0x1   :  { %6959 = sst [smem:[#allocation6_spill]] %s6926_s0  ;;  %v29_v0 = vstv %s6948_s22 }
   0x2   :  { %6960 = sst [smem:[#allocation7_spill]] %s6927_s1  ;;  %30 = vst [vmem:[#allocation2] sm:$0x1] %v29_v0 }
   0x3   :  { %6961 = sst [smem:[#allocation8_spill]] %s6928_s2 }
   0x4   :  { %6962 = sst [smem:[#allocation9_spill]] %s6929_s3 }
   0x5   :  { %6963 = sst [smem:[#allocation10_spill]] %s6930_s4 }
   0x6   :  { %6964 = sst [smem:[#allocation11_spill]] %s6931_s5 }
   0x7   :  { %6965 = sst [smem:[#allocation12_spill]] %s6932_s6 }
   0x8   :  { %6966 = sst [smem:[#allocation13_spill]] %s6933_s7 }
   0x9   :  { %6967 = sst [smem:[#allocation14_spill]] %s6934_s8 }
   0xa   :  { %31 = vsyncpa [#allocation4], 0  ;;  %s84_s6 = sshll.u32 %s6949_s23, 4  ;;  %s85_s6 = int_to_ptr.vmem [resolvable:$true] %s84_s6 }
   0xb   :  { %s5429_s2 = scalar_lea.vmem %s85_s6, 16  ;;  %p5434_p1 = scmp.lt.s32.totalorder %s85_s6, %s85_s6 }
   0xc   :  { %p5430_p0 = scmp.ne.s32.totalorder %s85_s6, %s5429_s2  ;;  %p5435_p2 = scmp.lt.s32.totalorder %s5429_s2, %s5429_s2 }
   0xe   :  { %p5436_p3 = por %p5435_p2, %p5434_p1 }
  0x10   :  { %p5437_p4 = pnand %p5436_p3, %p5430_p0 }
  0x12   :  { %5440 = shalt.err (!%p5437_p4)
}
  0x13   :  { %s5443_s29 = smov [#allocation3]  }
  0x14   :  { %87 = dma.vmem_to_smem %s85_s6, 16, %s5443_s29, [#allocation4]  }
  0x15   :  { %5441 = dma.done.wait [#allocation4], 16  }
  0x16   :  { %5442 = vsyncadd [#allocation4], 4294967280 }
  0x17   :  { %91 = sfence }
  0x18   :  { %s6968_s7 = sld [smem:[#allocation9_spill]]  ;;  %vm209_vm0 = vcmask 1043456   ;;  %vm196_vm1 = vcmask 195584   ;;  %v5444_v5 = vmov 0  }
  0x19   :  { %s6969_s8 = sld [smem:[#allocation6_spill]]  ;;  %5115 = vset.pattern.permute.xlu0 %v5444_v5  ;;  %5116 = vset.pattern.permute.xlu1 %v5444_v5 }
  0x1a   :  { %s6970_s5 = sld [smem:[#allocation7_spill]] }
  0x1b   :  { %s6971_s25 = sld [smem:[#allocation11_spill]] }
  0x1c   :  { %s6973_s3 = sld [smem:[#allocation12_spill]] }
  0x1d   :  { %s6974_s26 = sld [smem:[#allocation13_spill]] }
  0x1e   :  { %v5117_v1 = vld [vmem:[%s6968_s7 + $0x8] ss:$0 sps:$4 sm:$0xff]   ;;  %v5118_v2 = vld [vmem:[%s6968_s7] sm:$0xff]   ;;  %s6972_s7 = sld [smem:[#allocation10_spill]] }
  0x1f   :  { %5111 = vmatprep.subr.msk.bf16.mxu0 %vm209_vm0, %v5117_v1  ;;  %v211_v3 = vsel %vm209_vm0, %v5117_v1, 0  ;;  %v5119_v4 = vld [vmem:[%s6969_s8] sm:$0xff]   ;;  %v5120_v7 = vld [vmem:[%s6969_s8 + $0x8] sm:$0xff]   ;;  %v5121_v9 = vld [vmem:[%s6969_s8 + $0x10] sm:$0xff]   ;;  %s6975_s28 = sld [smem:[#allocation14_spill]] }
  0x20   :  { %4868 = vmatpush3.bf16.msra.mxu0 %v211_v3  ;;  %4871 = vmatprep.mubr.msk.bf16.mxu0 %vm196_vm1, %v5119_v4  ;;  %v105_v6 = vld [vmem:[%s6970_s5] sm:$0xff]  ;;  %v107_v8 = vld [vmem:[%s6970_s5 + $0x10] sm:$0xff]  ;;  %v106_v10 = vld [vmem:[%s6970_s5 + $0x8] sm:$0xff]  ;;  %s4384_s29 = sld [smem:[#allocation3 + $0x2]] }
  0x21   :  { %4869 = vmatprep.subr.bf16.mxu0 %v5118_v2  ;;  %121 = vperm.xlu0 %5115, %v105_v6   ;;  %v108_v11 = vld [vmem:[%s6970_s5 + $0x18] sm:$0xff]  ;;  %v5124_v13 = vld [vmem:[%s6971_s25 + $0x30] sm:$0xff]   ;;  %v109_v14 = vld [vmem:[%s6970_s5 + $0x20] sm:$0xff]  ;;  %s4414_s27 = sld [smem:[#allocation3 + $0x3]] }
  0x22   :  { %131 = vperm.xlu1 %5116, %v107_v8   ;;  %v5123_v12 = vld [vmem:[%s6971_s25 + $0x38] sm:$0xff]   ;;  %v110_v16 = vld [vmem:[%s6970_s5 + $0x28] sm:$0xff]  ;;  %v111_v17 = vld [vmem:[%s6970_s5 + $0x30] sm:$0xff]  ;;  %s4444_s4 = sld [smem:[#allocation3 + $0x4]] }
  0x23   :  { %v5122_v15 = vld [vmem:[%s6969_s8 + $0x18] sm:$0xff]   ;;  %4879 = vmatprep.subr.bf16.mxu1 %v5123_v12  ;;  %v5125_v19 = vld [vmem:[%s6971_s25 + $0x28] sm:$0xff]   ;;  %v5126_v20 = vld [vmem:[%s6971_s25 + $0x20] sm:$0xff]   ;;  %s420_s8 = sld [smem:[#allocation3]] }
  0x24   :  { %4870 = vmatpush3.bf16.msra.mxu0 %v5118_v2  ;;  %4880 = vmatpush3.bf16.msra.mxu1 %v5123_v12  ;;  %v112_v18 = vld [vmem:[%s6970_s5 + $0x38] sm:$0xff]  ;;  %v5128_v22 = vld [vmem:[%s6971_s25 + $0x10] sm:$0xff]   ;;  %v5129_v23 = vld [vmem:[%s6971_s25 + $0x8] sm:$0xff]   ;;  %s4474_s30 = sld [smem:[#allocation3 + $0x5]] }
  0x25   :  { %126 = vperm.xlu0 %5115, %v106_v10   ;;  %4881 = vmatprep.subr.bf16.mxu1 %v5124_v13  ;;  %v5127_v21 = vld [vmem:[%s6971_s25 + $0x18] sm:$0xff]   ;;  %v5130_v24 = vld [vmem:[%s6971_s25] sm:$0xff]   ;;  %v5132_v63 = vld [vmem:[%s6971_s25 + $0x70] sm:$0xff]  }
  0x26   :  { %136 = vperm.xlu1 %5116, %v108_v11   ;;  %v4305_v30 = vld [vmem:[%s6972_s7] ss:$0 sm:$0xff]  ;;  %v5131_v62 = vld [vmem:[%s6971_s25 + $0x78] sm:$0xff]   ;;  %v5133_v0 = vld [vmem:[%s6971_s25 + $0x68] sm:$0xff]   ;;  %s4354_s7 = sld [smem:[#allocation3 + $0x1]] }
  0x27   :  { %4872 = vmatmul.mubr.msk.bf16.vlgmr.msra.gmra.mxu0 %vm196_vm1, %v5120_v7  ;;  %4903 = vmatprep.subr.bf16.mxu0 %v5131_v62  ;;  %v5134_v1 = vld [vmem:[%s6971_s25 + $0x60] sm:$0xff]   ;;  %v5135_v2 = vld [vmem:[%s6971_s25 + $0x58] sm:$0xff]   ;;  %v5136_v3 = vld [vmem:[%s6971_s25 + $0x50] sm:$0xff]  }
  0x28   :  { %4875 = vmatprep.mubr.msk.bf16.mxu0 %vm196_vm1, %v5121_v9  ;;  %4882 = vmatpush3.bf16.msra.mxu1 %v5124_v13  ;;  %v5137_v4 = vld [vmem:[%s6971_s25 + $0x48] sm:$0xff]   ;;  %v5138_v6 = vld [vmem:[%s6971_s25 + $0x40] sm:$0xff]  }
  0x29   :  { %141 = vperm.xlu0 %5115, %v109_v14   ;;  %4883 = vmatprep.subr.bf16.mxu1 %v5125_v19  ;;  %v4316_v9 = vld [vmem:[%s6973_s3] ss:$0 sm:$0xff] }
  0x2a   :  { %146 = vperm.xlu1 %5116, %v110_v16   ;;  %4904 = vmatpush3.bf16.msra.mxu0 %v5131_v62 }
  0x2b   :  { %4905 = vmatprep.subr.bf16.mxu0 %v5132_v63 }
  0x2c   :  { %4884 = vmatpush3.bf16.msra.mxu1 %v5125_v19 }
  0x2d   :  { %151 = vperm.xlu0 %5115, %v111_v17   ;;  %4885 = vmatprep.subr.bf16.mxu1 %v5126_v20 }
  0x2e   :  { %156 = vperm.xlu1 %5116, %v112_v18   ;;  %4906 = vmatpush3.bf16.msra.mxu0 %v5132_v63 }
  0x2f   :  { %4876 = vmatmul.mubr.msk.bf16.gmra.mxu0 %vm196_vm1, %v5122_v15  ;;  %4907 = vmatprep.subr.bf16.mxu0 %v5133_v0 }
  0x30   :  { %4886 = vmatpush3.bf16.msra.mxu1 %v5126_v20 }
  0x31   :  { %4887 = vmatprep.subr.bf16.mxu1 %v5127_v21 }
  0x32   :  { %4908 = vmatpush3.bf16.msra.mxu0 %v5133_v0  ;;  %v473_v0 = vlaneseq }
  0x33   :  { %4909 = vmatprep.subr.bf16.mxu0 %v5134_v1 }
  0x34   :  { %4888 = vmatpush3.bf16.msra.mxu1 %v5127_v21 }
  0x35   :  { %4889 = vmatprep.subr.bf16.mxu1 %v5128_v22 }
  0x36   :  { %4910 = vmatpush3.bf16.msra.mxu0 %v5134_v1  ;;  %v5704_v1 = vshrl.u32 %v473_v0, 7  ;;  %v4343_v0 = vld [vmem:[%s6973_s3 + $0x1] ss:$0 sm:$0xff] }
  0x37   :  { %4911 = vmatprep.subr.bf16.mxu0 %v5135_v2 }
  0x38   :  { %4890 = vmatpush3.bf16.msra.mxu1 %v5128_v22 }
  0x39   :  { %4891 = vmatprep.subr.bf16.mxu1 %v5129_v23 }
  0x3a   :  { %4912 = vmatpush3.bf16.msra.mxu0 %v5135_v2  ;;  %v418_v2 = vld [vmem:[%s6974_s26] sm:$0x1] }
  0x3b   :  { %4913 = vmatprep.subr.bf16.mxu0 %v5136_v3 }
  0x3c   :  { %4892 = vmatpush3.bf16.msra.mxu1 %v5129_v23 }
  0x3d   :  { %4893 = vmatprep.subr.bf16.mxu1 %v5130_v24 }
  0x3e   :  { %4914 = vmatpush3.bf16.msra.mxu0 %v5136_v3  ;;  %v5710_v3 = vsub.s32 0, %v5704_v1 }
  0x3f   :  { %4915 = vmatprep.subr.bf16.mxu0 %v5137_v4 }
  0x40   :  { %4894 = vmatpush3.bf16.msra.mxu1 %v5130_v24 }
  0x42   :  { %4916 = vmatpush3.bf16.msra.mxu0 %v5137_v4 }
  0x43   :  { %4917 = vmatprep.subr.bf16.mxu0 %v5138_v6 }
  0x46   :  { %4918 = vmatpush3.bf16.msra.mxu0 %v5138_v6 }
  0x9c   :  { %v122_v26 = vpop.permute.xlu0 %121 }
  0x9d   :  { %v132_v25 = vpop.permute.xlu1 %131  ;;  %v159_v33 = vmul.f32 %v4305_v30, %v122_v26 }
  0x9e   :  { %v161_v35 = vmul.f32 %v4305_v30, %v132_v25 }
  0xa0   :  { %v127_v28 = vpop.permute.xlu0 %126 }
  0xa1   :  { %v137_v27 = vpop.permute.xlu1 %136  ;;  %v160_v37 = vmul.f32 %v4305_v30, %v127_v28 }
  0xa2   :  { %v162_v31 = vmul.f32 %v4305_v30, %v137_v27 }
  0xa4   :  { %v142_v38 = vpop.permute.xlu0 %141 }
  0xa5   :  { %v147_v34 = vpop.permute.xlu1 %146  ;;  %v163_v52 = vmul.f32 %v4305_v30, %v142_v38 }
  0xa6   :  { %v164_v53 = vmul.f32 %v4305_v30, %v147_v34 }
  0xa8   :  { %v152_v49 = vpop.permute.xlu0 %151 }
  0xa9   :  { %v157_v45 = vpop.permute.xlu1 %156  ;;  %v165_v54 = vmul.f32 %v4305_v30, %v152_v49 }
  0xaa   :  { %v166_v50 = vmul.f32 %v4305_v30, %v157_v45 }
  0xe7   :  { %v4873_v29 = vpop.f32.mrf.mxu0 }
  0xe8   :  { %v256_v43 = vadd.f32 %v4873_v29, %v161_v35 }
  0xe9   :  { %v247_v32 = vpop.f32.mrf.mxu0 }
  0xea   :  { %v248_v41 = vadd.f32 %v247_v32, %v159_v33 }
  0xeb   :  { %v4874_v36 = vpop.f32.mrf.mxu0 }
  0xec   :  { %v259_v39 = vadd.f32 %v4874_v36, %v162_v31 }
  0xed   :  { %v250_v40 = vpop.f32.mrf.mxu0 }
  0xee   :  { %v251_v42 = vadd.f32 %v250_v40, %v160_v37  ;;  %v279_v47 = vpack.c.bf16 %v259_v39, %v256_v43 }
  0xef   :  { %v4877_v44 = vpop.f32.mrf.mxu0 }
  0xf0   :  { %v278_v46 = vpack.c.bf16 %v251_v42, %v248_v41  ;;  %v272_v59 = vadd.f32 %v4877_v44, %v165_v54 }
  0xf1   :  { %v263_v48 = vpop.f32.mrf.mxu0 }
  0xf2   :  { %4895 = vmatprep.mubr.bf16.mxu1 %v278_v46  ;;  %v264_v57 = vadd.f32 %v263_v48, %v163_v52 }
  0xf3   :  { %v4878_v51 = vpop.f32.mrf.mxu0  ;;  %4896 = vmatmul.mubr.bf16.vlgmr.msra.gmra.mxu1 %v279_v47 }
  0xf4   :  { %v275_v55 = vadd.f32 %v4878_v51, %v166_v50 }
  0xf5   :  { %v266_v56 = vpop.f32.mrf.mxu0 }
  0xf6   :  { %v267_v58 = vadd.f32 %v266_v56, %v164_v53  ;;  %v281_v61 = vpack.c.bf16 %v275_v55, %v272_v59 }
  0xf8   :  { %v280_v60 = vpack.c.bf16 %v267_v58, %v264_v57 }
  0xfa   :  { %4899 = vmatprep.mubr.bf16.mxu1 %v280_v60 }
  0xfb   :  { %4900 = vmatmul.mubr.bf16.gmra.mxu1 %v281_v61 }
 0x1b3   :  { %v4897_v7 = vpop.f32.mrf.mxu1 }
 0x1b4   :  { %v5681_v13 = vadd.f32 %v4897_v7, %v4316_v9 }
 0x1b5   :  { %v387_v8 = vpop.f32.mrf.mxu1 }
 0x1b6   :  { %v5679_v11 = vadd.f32 %v4316_v9, %v387_v8  ;;  %v438_v21 = vmul.f32 %v5681_v13, %v5681_v13  ;;  %v508_v8 = vstv %s420_s8 }
 0x1b7   :  { %v4898_v10 = vpop.f32.mrf.mxu1 }
 0x1b8   :  { %v436_v16 = vmul.f32 %v5679_v11, %v5679_v11  ;;  %v5687_v17 = vadd.f32 %v4898_v10, %v4316_v9 }
 0x1b9   :  { %v390_v12 = vpop.f32.mrf.mxu1 }
 0x1ba   :  { %v5683_v14 = vadd.f32 %v4316_v9, %v390_v12  ;;  %v439_v26 = vmul.f32 %v5687_v17, %v5687_v17 }
 0x1bb   :  { %v4901_v15 = vpop.f32.mrf.mxu1 }
 0x1bc   :  { %v421_v18 = vadd.f32 %v5683_v14, %v5679_v11  ;;  %v437_v19 = vmul.f32 %v5683_v14, %v5683_v14  ;;  %v412_v29 = vadd.f32 %v4901_v15, %v4316_v9 }
 0x1bd   :  { %v403_v20 = vpop.f32.mrf.mxu1 }
 0x1be   :  { %v422_v22 = vadd.f32 %v421_v18, %v5681_v13  ;;  %v444_v23 = vadd.f32 %v437_v19, %v436_v16  ;;  %v5696_v24 = vadd.f32 %v4316_v9, %v403_v20  ;;  %v442_v39 = vmul.f32 %v412_v29, %v412_v29  ;;  %v4325_v16 = vld [vmem:[%s6975_s28] ss:$0 sm:$0xff] }
 0x1bf   :  { %v4902_v25 = vpop.f32.mrf.mxu1 }
 0x1c0   :  { %v445_v27 = vadd.f32 %v444_v23, %v438_v21  ;;  %v423_v28 = vadd.f32 %v422_v22, %v5687_v17  ;;  %v440_v32 = vmul.f32 %v5696_v24, %v5696_v24  ;;  %v415_v36 = vadd.f32 %v4902_v25, %v4316_v9 }
 0x1c1   :  { %v406_v30 = vpop.f32.mrf.mxu1 }
 0x1c2   :  { %v424_v31 = vadd.f32 %v423_v28, %v5696_v24  ;;  %v446_v33 = vadd.f32 %v445_v27, %v439_v26  ;;  %v407_v34 = vadd.f32 %v4316_v9, %v406_v30  ;;  %v443_v42 = vmul.f32 %v415_v36, %v415_v36 }
 0x1c4   :  { %v447_v35 = vadd.f32 %v446_v33, %v440_v32  ;;  %v425_v37 = vadd.f32 %v424_v31, %v407_v34  ;;  %v441_v38 = vmul.f32 %v407_v34, %v407_v34 }
 0x1c6   :  { %v426_v40 = vadd.f32 %v425_v37, %v412_v29  ;;  %v448_v41 = vadd.f32 %v447_v35, %v441_v38 }
 0x1c8   :  { %v427_v43 = vadd.f32 %v426_v40, %v415_v36  ;;  %v449_v44 = vadd.f32 %v448_v41, %v442_v39 }
 0x1ca   :  { %v428_v45 = vrot.slane %v427_v43, 4  ;;  %v450_v46 = vadd.f32 %v449_v44, %v443_v42 }
 0x1cc   :  { %v429_v47 = vadd.f32 %v428_v45, %v427_v43  ;;  %v451_v48 = vrot.slane %v450_v46, 4 }
 0x1ce   :  { %v430_v49 = vrot.slane %v429_v47, 2  ;;  %v452_v50 = vadd.f32 %v451_v48, %v450_v46 }
 0x1d0   :  { %v431_v51 = vadd.f32 %v430_v49, %v429_v47  ;;  %v453_v52 = vrot.slane %v452_v50, 2 }
 0x1d2   :  { %v432_v53 = vrot.slane %v431_v51, 1  ;;  %v454_v54 = vadd.f32 %v453_v52, %v452_v50 }
 0x1d4   :  { %v433_v55 = vadd.f32 %v432_v53, %v431_v51  ;;  %v455_v56 = vrot.slane %v454_v54, 1 }
 0x1d6   :  { %v435_v57 = vmul.f32 0.015625, %v433_v55  ;;  %v456_v58 = vadd.f32 %v455_v56, %v454_v54  ;;  %v5139_v54 = vld [vmem:[%s6971_s25 + $0xb8] sm:$0xff]   ;;  %v5140_v55 = vld [vmem:[%s6971_s25 + $0xb0] sm:$0xff]   ;;  %v5141_v56 = vld [vmem:[%s6971_s25 + $0xa8] sm:$0xff]  }
 0x1d7   :  { %4927 = vmatprep.subr.bf16.mxu1 %v5139_v54 }
 0x1d8   :  { %v457_v59 = vmul.f32 0.015625, %v456_v58  ;;  %v458_v60 = vmul.f32 %v435_v57, %v435_v57  ;;  %v469_v7 = vsub.f32 %v407_v34, %v435_v57  ;;  %v464_v10 = vsub.f32 %v5679_v11, %v435_v57  ;;  %4928 = vmatpush3.bf16.msra.mxu1 %v5139_v54  ;;  %v5143_v58 = vld [vmem:[%s6971_s25 + $0x98] sm:$0xff]  }
 0x1d9   :  { %v465_v12 = vsub.f32 %v5683_v14, %v435_v57  ;;  %v466_v15 = vsub.f32 %v5681_v13, %v435_v57  ;;  %v467_v18 = vsub.f32 %v5687_v17, %v435_v57  ;;  %v468_v19 = vsub.f32 %v5696_v24, %v435_v57  ;;  %4929 = vmatprep.subr.bf16.mxu1 %v5140_v55 }
 0x1da   :  { %v459_v61 = vsub.f32 %v457_v59, %v458_v60  ;;  %v470_v20 = vsub.f32 %v412_v29, %v435_v57  ;;  %v471_v21 = vsub.f32 %v415_v36, %v435_v57  ;;  %v5142_v57 = vld [vmem:[%s6971_s25 + $0xa0] sm:$0xff]   ;;  %v5144_v59 = vld [vmem:[%s6971_s25 + $0x90] sm:$0xff]   ;;  %v5145_v60 = vld [vmem:[%s6971_s25 + $0x88] sm:$0xff]  }
 0x1dc   :  { %v460_v62 = vmax.f32 %v459_v61, 0.0  ;;  %4930 = vmatpush3.bf16.msra.mxu1 %v5140_v55  ;;  %v5146_v61 = vld [vmem:[%s6971_s25 + $0x80] sm:$0xff]  }
 0x1dd   :  { %4931 = vmatprep.subr.bf16.mxu1 %v5141_v56 }
 0x1de   :  { %v461_v63 = vadd.f32 1e-05, %v460_v62 }
 0x1e0   :  { %5407 = vrsqrt.f32 %v461_v63  ;;  %4932 = vmatpush3.bf16.msra.mxu1 %v5141_v56 }
 0x1e1   :  { %4933 = vmatprep.subr.bf16.mxu1 %v5142_v57 }
 0x1e4   :  { %4934 = vmatpush3.bf16.msra.mxu1 %v5142_v57 }
 0x1e5   :  { %4935 = vmatprep.subr.bf16.mxu1 %v5143_v58 }
 0x1e8   :  { %4936 = vmatpush3.bf16.msra.mxu1 %v5143_v58  ;;  %v4352_v58 = vld [vmem:[%s6974_s26 + $0x1] sm:$0x1] }
 0x1e9   :  { %4937 = vmatprep.subr.bf16.mxu1 %v5144_v59 }
 0x1ec   :  { %4938 = vmatpush3.bf16.msra.mxu1 %v5144_v59 }
 0x1ed   :  { %v5408_v4 = vpop.eup %5407  ;;  %4939 = vmatprep.subr.bf16.mxu1 %v5145_v60 }
 0x1ee   :  { %v463_v6 = vmul.f32 %v5408_v4, %v418_v2 }
 0x1f0   :  { %v476_v9 = vrot.slane %v463_v6, %v5710_v3  ;;  %4940 = vmatpush3.bf16.msra.mxu1 %v5145_v60 }
 0x1f1   :  { %4941 = vmatprep.subr.bf16.mxu1 %v5146_v61 }
 0x1f2   :  { %v483_v22 = vmul.f32 %v476_v9, %v469_v7  ;;  %v478_v23 = vmul.f32 %v476_v9, %v464_v10  ;;  %v479_v25 = vmul.f32 %v476_v9, %v465_v12  ;;  %v480_v26 = vmul.f32 %v476_v9, %v466_v15 }
 0x1f3   :  { %v481_v27 = vmul.f32 %v476_v9, %v467_v18  ;;  %v482_v11 = vmul.f32 %v476_v9, %v468_v19  ;;  %v484_v28 = vmul.f32 %v476_v9, %v470_v20  ;;  %v485_v14 = vmul.f32 %v476_v9, %v471_v21 }
 0x1f4   :  { %v497_v30 = vadd.f32 %v4325_v16, %v483_v22  ;;  %v492_v13 = vadd.f32 %v4325_v16, %v478_v23  ;;  %v493_v31 = vadd.f32 %v4325_v16, %v479_v25  ;;  %v494_v32 = vadd.f32 %v4325_v16, %v480_v26  ;;  %4942 = vmatpush3.bf16.msra.mxu1 %v5146_v61 }
 0x1f5   :  { %v495_v33 = vadd.f32 %v4325_v16, %v481_v27  ;;  %v496_v34 = vadd.f32 %v4325_v16, %v482_v11  ;;  %v498_v35 = vadd.f32 %v4325_v16, %v484_v28  ;;  %v499_v17 = vadd.f32 %v4325_v16, %v485_v14 }
 0x1f6   :  { %vm500_vm2 = vcmp.ge.f32.partialorder %v492_v13, 0.0  ;;  %vm501_vm3 = vcmp.ge.f32.partialorder %v493_v31, 0.0  ;;  %v509_v24 = vmul.f32 %v508_v8, %v492_v13  ;;  %v510_v29 = vmul.f32 %v508_v8, %v493_v31 }
 0x1f7   :  { %vm502_vm4 = vcmp.ge.f32.partialorder %v494_v32, 0.0  ;;  %vm503_vm5 = vcmp.ge.f32.partialorder %v495_v33, 0.0  ;;  %v511_v36 = vmul.f32 %v508_v8, %v494_v32  ;;  %v512_v37 = vmul.f32 %v508_v8, %v495_v33 }
 0x1f8   :  { %v517_v38 = vsel %vm500_vm2, %v492_v13, %v509_v24  ;;  %v518_v39 = vsel %vm501_vm3, %v493_v31, %v510_v29  ;;  %vm504_vm6 = vcmp.ge.f32.partialorder %v496_v34, 0.0  ;;  %vm505_vm7 = vcmp.ge.f32.partialorder %v497_v30, 0.0 }
 0x1f9   :  { %v525_v40 = vpack.c.bf16 %v518_v39, %v517_v38  ;;  %v519_v41 = vsel %vm502_vm4, %v494_v32, %v511_v36  ;;  %v520_v42 = vsel %vm503_vm5, %v495_v33, %v512_v37  ;;  %v513_v43 = vmul.f32 %v508_v8, %v496_v34 }
 0x1fa   :  { %v526_v44 = vpack.c.bf16 %v520_v42, %v519_v41  ;;  %v514_v45 = vmul.f32 %v508_v8, %v497_v30  ;;  %v515_v47 = vmul.f32 %v508_v8, %v498_v35  ;;  %v516_v48 = vmul.f32 %v508_v8, %v499_v17 }
 0x1fb   :  { %4919 = vmatprep.mubr.bf16.mxu0 %v525_v40  ;;  %v521_v46 = vsel %vm504_vm6, %v496_v34, %v513_v43  ;;  %vm506_vm8 = vcmp.ge.f32.partialorder %v498_v35, 0.0  ;;  %vm507_vm9 = vcmp.ge.f32.partialorder %v499_v17, 0.0 }
 0x1fc   :  { %4920 = vmatmul.mubr.bf16.vlgmr.msra.gmra.mxu0 %v526_v44  ;;  %v522_v49 = vsel %vm505_vm7, %v497_v30, %v514_v45  ;;  %v523_v51 = vsel %vm506_vm8, %v498_v35, %v515_v47  ;;  %v524_v52 = vsel %vm507_vm9, %v499_v17, %v516_v48 }
 0x1fd   :  { %v527_v50 = vpack.c.bf16 %v522_v49, %v521_v46  ;;  %v528_v53 = vpack.c.bf16 %v524_v52, %v523_v51 }
 0x1ff   :  { %4923 = vmatprep.mubr.bf16.mxu0 %v527_v50 }
 0x204   :  { %4924 = vmatmul.mubr.bf16.gmra.mxu0 %v528_v53 }
 0x2bc   :  { %v4921_v62 = vpop.f32.mrf.mxu0 }
 0x2bd   :  { %v5750_v7 = vadd.f32 %v4921_v62, %v4343_v0  ;;  %v758_v62 = vstv %s4354_s7 }
 0x2be   :  { %v636_v63 = vpop.f32.mrf.mxu0 }
 0x2bf   :  { %v5748_v4 = vadd.f32 %v4343_v0, %v636_v63  ;;  %v688_v19 = vmul.f32 %v5750_v7, %v5750_v7 }
 0x2c0   :  { %v4922_v2 = vpop.f32.mrf.mxu0 }
 0x2c1   :  { %v686_v10 = vmul.f32 %v5748_v4, %v5748_v4  ;;  %v5756_v12 = vadd.f32 %v4922_v2, %v4343_v0 }
 0x2c2   :  { %v639_v6 = vpop.f32.mrf.mxu0 }
 0x2c3   :  { %v5752_v8 = vadd.f32 %v4343_v0, %v639_v6  ;;  %v689_v25 = vmul.f32 %v5756_v12, %v5756_v12 }
 0x2c4   :  { %v4925_v9 = vpop.f32.mrf.mxu0 }
 0x2c5   :  { %v672_v15 = vadd.f32 %v5752_v8, %v5748_v4  ;;  %v687_v16 = vmul.f32 %v5752_v8, %v5752_v8  ;;  %v661_v11 = vadd.f32 %v4925_v9, %v4343_v0  ;;  %v4355_v9 = vld [vmem:[%s6975_s28 + $0x1] ss:$0 sm:$0xff] }
 0x2c6   :  { %v652_v18 = vpop.f32.mrf.mxu0 }
 0x2c7   :  { %v673_v20 = vadd.f32 %v672_v15, %v5750_v7  ;;  %v694_v21 = vadd.f32 %v687_v16, %v686_v10  ;;  %v653_v22 = vadd.f32 %v4343_v0, %v652_v18  ;;  %v692_v17 = vmul.f32 %v661_v11, %v661_v11 }
 0x2c8   :  { %v4926_v23 = vpop.f32.mrf.mxu0 }
 0x2c9   :  { %v695_v26 = vadd.f32 %v694_v21, %v688_v19  ;;  %v674_v27 = vadd.f32 %v673_v20, %v5756_v12  ;;  %v690_v30 = vmul.f32 %v653_v22, %v653_v22  ;;  %v664_v33 = vadd.f32 %v4926_v23, %v4343_v0 }
 0x2ca   :  { %v655_v28 = vpop.f32.mrf.mxu0 }
 0x2cb   :  { %v675_v14 = vadd.f32 %v674_v27, %v653_v22  ;;  %v696_v13 = vadd.f32 %v695_v26, %v689_v25  ;;  %v656_v31 = vadd.f32 %v4343_v0, %v655_v28  ;;  %v693_v36 = vmul.f32 %v664_v33, %v664_v33 }
 0x2cd   :  { %v697_v32 = vadd.f32 %v696_v13, %v690_v30  ;;  %v676_v34 = vadd.f32 %v675_v14, %v656_v31  ;;  %v691_v35 = vmul.f32 %v656_v31, %v656_v31 }
 0x2cf   :  { %v677_v24 = vadd.f32 %v676_v34, %v661_v11  ;;  %v698_v29 = vadd.f32 %v697_v32, %v691_v35 }
 0x2d1   :  { %v678_v37 = vadd.f32 %v677_v24, %v664_v33  ;;  %v699_v38 = vadd.f32 %v698_v29, %v692_v17 }
 0x2d3   :  { %v679_v39 = vrot.slane %v678_v37, 4  ;;  %v700_v40 = vadd.f32 %v699_v38, %v693_v36 }
 0x2d5   :  { %v680_v41 = vadd.f32 %v679_v39, %v678_v37  ;;  %v701_v42 = vrot.slane %v700_v40, 4 }
 0x2d7   :  { %v681_v43 = vrot.slane %v680_v41, 2  ;;  %v702_v44 = vadd.f32 %v701_v42, %v700_v40 }
 0x2d9   :  { %v682_v45 = vadd.f32 %v681_v43, %v680_v41  ;;  %v703_v46 = vrot.slane %v702_v44, 2 }
 0x2db   :  { %v683_v47 = vrot.slane %v682_v45, 1  ;;  %v704_v48 = vadd.f32 %v703_v46, %v702_v44 }
 0x2dd   :  { %v684_v49 = vadd.f32 %v683_v47, %v682_v45  ;;  %v705_v50 = vrot.slane %v704_v48, 1  ;;  %v5147_v47 = vld [vmem:[%s6971_s25 + $0xf8] sm:$0xff]  }
 0x2de   :  { %4951 = vmatprep.subr.bf16.mxu0 %v5147_v47 }
 0x2df   :  { %v685_v51 = vmul.f32 0.015625, %v684_v49  ;;  %v706_v52 = vadd.f32 %v705_v50, %v704_v48  ;;  %4952 = vmatpush3.bf16.msra.mxu0 %v5147_v47  ;;  %v5148_v48 = vld [vmem:[%s6971_s25 + $0xf0] sm:$0xff]   ;;  %v5149_v49 = vld [vmem:[%s6971_s25 + $0xe8] sm:$0xff]   ;;  %v5150_v50 = vld [vmem:[%s6971_s25 + $0xe0] sm:$0xff]  }
 0x2e0   :  { %4953 = vmatprep.subr.bf16.mxu0 %v5148_v48 }
 0x2e1   :  { %v707_v53 = vmul.f32 0.015625, %v706_v52  ;;  %v708_v54 = vmul.f32 %v685_v51, %v685_v51  ;;  %v719_v61 = vsub.f32 %v656_v31, %v685_v51  ;;  %v714_v0 = vsub.f32 %v5748_v4, %v685_v51  ;;  %v5152_v52 = vld [vmem:[%s6971_s25 + $0xd0] sm:$0xff]  }
 0x2e2   :  { %v715_v2 = vsub.f32 %v5752_v8, %v685_v51  ;;  %v716_v6 = vsub.f32 %v5750_v7, %v685_v51  ;;  %v717_v10 = vsub.f32 %v5756_v12, %v685_v51  ;;  %v718_v15 = vsub.f32 %v653_v22, %v685_v51 }
 0x2e3   :  { %v709_v55 = vsub.f32 %v707_v53, %v708_v54  ;;  %v720_v16 = vsub.f32 %v661_v11, %v685_v51  ;;  %v721_v18 = vsub.f32 %v664_v33, %v685_v51  ;;  %4954 = vmatpush3.bf16.msra.mxu0 %v5148_v48  ;;  %v5151_v51 = vld [vmem:[%s6971_s25 + $0xd8] sm:$0xff]   ;;  %v5153_v53 = vld [vmem:[%s6971_s25 + $0xc8] sm:$0xff]   ;;  %v5154_v54 = vld [vmem:[%s6971_s25 + $0xc0] sm:$0xff]  }
 0x2e4   :  { %4955 = vmatprep.subr.bf16.mxu0 %v5149_v49 }
 0x2e5   :  { %v710_v56 = vmax.f32 %v709_v55, 0.0 }
 0x2e7   :  { %v711_v57 = vadd.f32 1e-05, %v710_v56  ;;  %4956 = vmatpush3.bf16.msra.mxu0 %v5149_v49 }
 0x2e8   :  { %4957 = vmatprep.subr.bf16.mxu0 %v5150_v50 }
 0x2e9   :  { %5409 = vrsqrt.f32 %v711_v57  ;;  %v4373_v57 = vld [vmem:[%s6973_s3 + $0x2] ss:$0 sm:$0xff] }
 0x2eb   :  { %4958 = vmatpush3.bf16.msra.mxu0 %v5150_v50 }
 0x2ec   :  { %4959 = vmatprep.subr.bf16.mxu0 %v5151_v51 }
 0x2ef   :  { %4960 = vmatpush3.bf16.msra.mxu0 %v5151_v51  ;;  %v4382_v51 = vld [vmem:[%s6974_s26 + $0x2] sm:$0x1] }
 0x2f0   :  { %4961 = vmatprep.subr.bf16.mxu0 %v5152_v52 }
 0x2f3   :  { %4962 = vmatpush3.bf16.msra.mxu0 %v5152_v52 }
 0x2f4   :  { %4963 = vmatprep.subr.bf16.mxu0 %v5153_v53 }
 0x2f6   :  { %v5410_v59 = vpop.eup %5409 }
 0x2f7   :  { %v713_v60 = vmul.f32 %v5410_v59, %v4352_v58  ;;  %4964 = vmatpush3.bf16.msra.mxu0 %v5153_v53 }
 0x2f8   :  { %4965 = vmatprep.subr.bf16.mxu0 %v5154_v54 }
 0x2f9   :  { %v726_v63 = vrot.slane %v713_v60, %v5710_v3 }
 0x2fb   :  { %v733_v19 = vmul.f32 %v726_v63, %v719_v61  ;;  %v728_v20 = vmul.f32 %v726_v63, %v714_v0  ;;  %v729_v21 = vmul.f32 %v726_v63, %v715_v2  ;;  %v730_v23 = vmul.f32 %v726_v63, %v716_v6  ;;  %4966 = vmatpush3.bf16.msra.mxu0 %v5154_v54 }
 0x2fc   :  { %v731_v25 = vmul.f32 %v726_v63, %v717_v10  ;;  %v732_v26 = vmul.f32 %v726_v63, %v718_v15  ;;  %v734_v4 = vmul.f32 %v726_v63, %v720_v16  ;;  %v735_v27 = vmul.f32 %v726_v63, %v721_v18 }
 0x2fd   :  { %v747_v8 = vadd.f32 %v4355_v9, %v733_v19  ;;  %v742_v28 = vadd.f32 %v4355_v9, %v728_v20  ;;  %v743_v7 = vadd.f32 %v4355_v9, %v729_v21  ;;  %v744_v14 = vadd.f32 %v4355_v9, %v730_v23 }
 0x2fe   :  { %v745_v30 = vadd.f32 %v4355_v9, %v731_v25  ;;  %v746_v13 = vadd.f32 %v4355_v9, %v732_v26  ;;  %v748_v31 = vadd.f32 %v4355_v9, %v734_v4  ;;  %v749_v32 = vadd.f32 %v4355_v9, %v735_v27 }
 0x2ff   :  { %vm750_vm10 = vcmp.ge.f32.partialorder %v742_v28, 0.0  ;;  %vm751_vm11 = vcmp.ge.f32.partialorder %v743_v7, 0.0  ;;  %v759_v12 = vmul.f32 %v758_v62, %v742_v28  ;;  %v760_v22 = vmul.f32 %v758_v62, %v743_v7 }
 0x300   :  { %vm752_vm12 = vcmp.ge.f32.partialorder %v744_v14, 0.0  ;;  %vm753_vm13 = vcmp.ge.f32.partialorder %v745_v30, 0.0  ;;  %v761_v11 = vmul.f32 %v758_v62, %v744_v14  ;;  %v762_v33 = vmul.f32 %v758_v62, %v745_v30 }
 0x301   :  { %v767_v34 = vsel %vm750_vm10, %v742_v28, %v759_v12  ;;  %v768_v35 = vsel %vm751_vm11, %v743_v7, %v760_v22  ;;  %vm754_vm14 = vcmp.ge.f32.partialorder %v746_v13, 0.0  ;;  %vm755_vm15 = vcmp.ge.f32.partialorder %v747_v8, 0.0 }
 0x302   :  { %v775_v17 = vpack.c.bf16 %v768_v35, %v767_v34  ;;  %v769_v24 = vsel %vm752_vm12, %v744_v14, %v761_v11  ;;  %v770_v29 = vsel %vm753_vm13, %v745_v30, %v762_v33  ;;  %v763_v36 = vmul.f32 %v758_v62, %v746_v13 }
 0x303   :  { %v776_v37 = vpack.c.bf16 %v770_v29, %v769_v24  ;;  %v764_v38 = vmul.f32 %v758_v62, %v747_v8  ;;  %v765_v40 = vmul.f32 %v758_v62, %v748_v31  ;;  %v766_v41 = vmul.f32 %v758_v62, %v749_v32 }
 0x304   :  { %4943 = vmatprep.mubr.bf16.mxu1 %v775_v17  ;;  %v771_v39 = vsel %vm754_vm14, %v746_v13, %v763_v36  ;;  %vm756_vm0 = vcmp.ge.f32.partialorder %v748_v31, 0.0  ;;  %vm757_vm1 = vcmp.ge.f32.partialorder %v749_v32, 0.0 }
 0x305   :  { %4944 = vmatmul.mubr.bf16.vlgmr.msra.gmra.mxu1 %v776_v37  ;;  %v772_v42 = vsel %vm755_vm15, %v747_v8, %v764_v38  ;;  %v773_v44 = vsel %vm756_vm0, %v748_v31, %v765_v40  ;;  %v774_v45 = vsel %vm757_vm1, %v749_v32, %v766_v41 }
 0x306   :  { %v777_v43 = vpack.c.bf16 %v772_v42, %v771_v39  ;;  %v778_v46 = vpack.c.bf16 %v774_v45, %v773_v44 }
 0x308   :  { %4947 = vmatprep.mubr.bf16.mxu1 %v777_v43 }
 0x30d   :  { %4948 = vmatmul.mubr.bf16.gmra.mxu1 %v778_v46 }
 0x3c5   :  { %v4945_v55 = vpop.f32.mrf.mxu1 }
 0x3c6   :  { %v5808_v61 = vadd.f32 %v4945_v55, %v4373_v57  ;;  %v1008_v55 = vstv %s4384_s29  ;;  %s4534_s29 = sld [smem:[#allocation3 + $0x7]] }
 0x3c7   :  { %v886_v56 = vpop.f32.mrf.mxu1 }
 0x3c8   :  { %v5806_v59 = vadd.f32 %v4373_v57, %v886_v56  ;;  %v938_v15 = vmul.f32 %v5808_v61, %v5808_v61 }
 0x3c9   :  { %v4946_v58 = vpop.f32.mrf.mxu1 }
 0x3ca   :  { %v936_v0 = vmul.f32 %v5806_v59, %v5806_v59  ;;  %v5814_v2 = vadd.f32 %v4946_v58, %v4373_v57 }
 0x3cb   :  { %v889_v60 = vpop.f32.mrf.mxu1 }
 0x3cc   :  { %v5810_v62 = vadd.f32 %v4373_v57, %v889_v60  ;;  %v939_v21 = vmul.f32 %v5814_v2, %v5814_v2 }
 0x3cd   :  { %v4949_v63 = vpop.f32.mrf.mxu1 }
 0x3ce   :  { %v922_v6 = vadd.f32 %v5810_v62, %v5806_v59  ;;  %v937_v9 = vmul.f32 %v5810_v62, %v5810_v62  ;;  %v911_v26 = vadd.f32 %v4949_v63, %v4373_v57  ;;  %v4385_v63 = vld [vmem:[%s6975_s28 + $0x2] ss:$0 sm:$0xff] }
 0x3cf   :  { %v902_v10 = vpop.f32.mrf.mxu1 }
 0x3d0   :  { %v923_v16 = vadd.f32 %v922_v6, %v5808_v61  ;;  %v944_v18 = vadd.f32 %v937_v9, %v936_v0  ;;  %v903_v19 = vadd.f32 %v4373_v57, %v902_v10  ;;  %v942_v32 = vmul.f32 %v911_v26, %v911_v26 }
 0x3d1   :  { %v4950_v20 = vpop.f32.mrf.mxu1 }
 0x3d2   :  { %v945_v23 = vadd.f32 %v944_v18, %v938_v15  ;;  %v924_v25 = vadd.f32 %v923_v16, %v5814_v2  ;;  %v940_v8 = vmul.f32 %v903_v19, %v903_v19  ;;  %v914_v30 = vadd.f32 %v4950_v20, %v4373_v57 }
 0x3d3   :  { %v905_v4 = vpop.f32.mrf.mxu1 }
 0x3d4   :  { %v925_v27 = vadd.f32 %v924_v25, %v903_v19  ;;  %v946_v28 = vadd.f32 %v945_v23, %v939_v21  ;;  %v906_v7 = vadd.f32 %v4373_v57, %v905_v4  ;;  %v943_v11 = vmul.f32 %v914_v30, %v914_v30 }
 0x3d6   :  { %v947_v14 = vadd.f32 %v946_v28, %v940_v8  ;;  %v926_v13 = vadd.f32 %v925_v27, %v906_v7  ;;  %v941_v31 = vmul.f32 %v906_v7, %v906_v7 }
 0x3d8   :  { %v927_v12 = vadd.f32 %v926_v13, %v911_v26  ;;  %v948_v22 = vadd.f32 %v947_v14, %v941_v31 }
 0x3da   :  { %v928_v33 = vadd.f32 %v927_v12, %v914_v30  ;;  %v949_v34 = vadd.f32 %v948_v22, %v942_v32 }
 0x3dc   :  { %v929_v35 = vrot.slane %v928_v33, 4  ;;  %v950_v17 = vadd.f32 %v949_v34, %v943_v11 }
 0x3de   :  { %v930_v24 = vadd.f32 %v929_v35, %v928_v33  ;;  %v951_v29 = vrot.slane %v950_v17, 4 }
 0x3e0   :  { %v931_v36 = vrot.slane %v930_v24, 2  ;;  %v952_v37 = vadd.f32 %v951_v29, %v950_v17 }
 0x3e2   :  { %v932_v38 = vadd.f32 %v931_v36, %v930_v24  ;;  %v953_v39 = vrot.slane %v952_v37, 2 }
 0x3e4   :  { %v933_v40 = vrot.slane %v932_v38, 1  ;;  %v954_v41 = vadd.f32 %v953_v39, %v952_v37 }
 0x3e6   :  { %v934_v42 = vadd.f32 %v933_v40, %v932_v38  ;;  %v955_v43 = vrot.slane %v954_v41, 1  ;;  %v5155_v40 = vld [vmem:[%s6971_s25 + $0x138] sm:$0xff]  }
 0x3e7   :  { %4975 = vmatprep.subr.bf16.mxu1 %v5155_v40 }
 0x3e8   :  { %v935_v44 = vmul.f32 0.015625, %v934_v42  ;;  %v956_v45 = vadd.f32 %v955_v43, %v954_v41  ;;  %4976 = vmatpush3.bf16.msra.mxu1 %v5155_v40  ;;  %v5156_v41 = vld [vmem:[%s6971_s25 + $0x130] sm:$0xff]   ;;  %v5157_v42 = vld [vmem:[%s6971_s25 + $0x128] sm:$0xff]   ;;  %v5158_v43 = vld [vmem:[%s6971_s25 + $0x120] sm:$0xff]  }
 0x3e9   :  { %4977 = vmatprep.subr.bf16.mxu1 %v5156_v41 }
 0x3ea   :  { %v957_v46 = vmul.f32 0.015625, %v956_v45  ;;  %v958_v47 = vmul.f32 %v935_v44, %v935_v44  ;;  %v969_v54 = vsub.f32 %v906_v7, %v935_v44  ;;  %v964_v57 = vsub.f32 %v5806_v59, %v935_v44  ;;  %v5160_v45 = vld [vmem:[%s6971_s25 + $0x110] sm:$0xff]  }
 0x3eb   :  { %v965_v58 = vsub.f32 %v5810_v62, %v935_v44  ;;  %v966_v60 = vsub.f32 %v5808_v61, %v935_v44  ;;  %v967_v0 = vsub.f32 %v5814_v2, %v935_v44  ;;  %v968_v6 = vsub.f32 %v903_v19, %v935_v44 }
 0x3ec   :  { %v959_v48 = vsub.f32 %v957_v46, %v958_v47  ;;  %v970_v9 = vsub.f32 %v911_v26, %v935_v44  ;;  %v971_v10 = vsub.f32 %v914_v30, %v935_v44  ;;  %4978 = vmatpush3.bf16.msra.mxu1 %v5156_v41  ;;  %v5159_v44 = vld [vmem:[%s6971_s25 + $0x118] sm:$0xff]   ;;  %v5161_v46 = vld [vmem:[%s6971_s25 + $0x108] sm:$0xff]   ;;  %v5162_v47 = vld [vmem:[%s6971_s25 + $0x100] sm:$0xff]  }
 0x3ed   :  { %4979 = vmatprep.subr.bf16.mxu1 %v5157_v42 }
 0x3ee   :  { %v960_v49 = vmax.f32 %v959_v48, 0.0 }
 0x3f0   :  { %v961_v50 = vadd.f32 1e-05, %v960_v49  ;;  %4980 = vmatpush3.bf16.msra.mxu1 %v5157_v42 }
 0x3f1   :  { %4981 = vmatprep.subr.bf16.mxu1 %v5158_v43 }
 0x3f2   :  { %5411 = vrsqrt.f32 %v961_v50  ;;  %v4403_v50 = vld [vmem:[%s6973_s3 + $0x3] ss:$0 sm:$0xff] }
 0x3f4   :  { %4982 = vmatpush3.bf16.msra.mxu1 %v5158_v43 }
 0x3f5   :  { %4983 = vmatprep.subr.bf16.mxu1 %v5159_v44 }
 0x3f8   :  { %4984 = vmatpush3.bf16.msra.mxu1 %v5159_v44  ;;  %v4412_v44 = vld [vmem:[%s6974_s26 + $0x3] sm:$0x1] }
 0x3f9   :  { %4985 = vmatprep.subr.bf16.mxu1 %v5160_v45 }
 0x3fc   :  { %4986 = vmatpush3.bf16.msra.mxu1 %v5160_v45 }
 0x3fd   :  { %4987 = vmatprep.subr.bf16.mxu1 %v5161_v46 }
 0x3ff   :  { %v5412_v52 = vpop.eup %5411 }
 0x400   :  { %v963_v53 = vmul.f32 %v5412_v52, %v4382_v51  ;;  %4988 = vmatpush3.bf16.msra.mxu1 %v5161_v46 }
 0x401   :  { %4989 = vmatprep.subr.bf16.mxu1 %v5162_v47 }
 0x402   :  { %v976_v56 = vrot.slane %v963_v53, %v5710_v3 }
 0x404   :  { %v983_v15 = vmul.f32 %v976_v56, %v969_v54  ;;  %v978_v16 = vmul.f32 %v976_v56, %v964_v57  ;;  %v979_v18 = vmul.f32 %v976_v56, %v965_v58  ;;  %v980_v20 = vmul.f32 %v976_v56, %v966_v60  ;;  %4990 = vmatpush3.bf16.msra.mxu1 %v5162_v47 }
 0x405   :  { %v981_v21 = vmul.f32 %v976_v56, %v967_v0  ;;  %v982_v23 = vmul.f32 %v976_v56, %v968_v6  ;;  %v984_v59 = vmul.f32 %v976_v56, %v970_v9  ;;  %v985_v25 = vmul.f32 %v976_v56, %v971_v10 }
 0x406   :  { %v997_v62 = vadd.f32 %v4385_v63, %v983_v15  ;;  %v992_v4 = vadd.f32 %v4385_v63, %v978_v16  ;;  %v993_v61 = vadd.f32 %v4385_v63, %v979_v18  ;;  %v994_v27 = vadd.f32 %v4385_v63, %v980_v20 }
 0x407   :  { %v995_v8 = vadd.f32 %v4385_v63, %v981_v21  ;;  %v996_v28 = vadd.f32 %v4385_v63, %v982_v23  ;;  %v998_v7 = vadd.f32 %v4385_v63, %v984_v59  ;;  %v999_v14 = vadd.f32 %v4385_v63, %v985_v25 }
 0x408   :  { %vm1000_vm2 = vcmp.ge.f32.partialorder %v992_v4, 0.0  ;;  %vm1001_vm3 = vcmp.ge.f32.partialorder %v993_v61, 0.0  ;;  %v1009_v2 = vmul.f32 %v1008_v55, %v992_v4  ;;  %v1010_v19 = vmul.f32 %v1008_v55, %v993_v61 }
 0x409   :  { %vm1002_vm4 = vcmp.ge.f32.partialorder %v994_v27, 0.0  ;;  %vm1003_vm5 = vcmp.ge.f32.partialorder %v995_v8, 0.0  ;;  %v1011_v26 = vmul.f32 %v1008_v55, %v994_v27  ;;  %v1012_v30 = vmul.f32 %v1008_v55, %v995_v8 }
 0x40a   :  { %v1017_v13 = vsel %vm1000_vm2, %v992_v4, %v1009_v2  ;;  %v1018_v31 = vsel %vm1001_vm3, %v993_v61, %v1010_v19  ;;  %vm1004_vm6 = vcmp.ge.f32.partialorder %v996_v28, 0.0  ;;  %vm1005_vm7 = vcmp.ge.f32.partialorder %v997_v62, 0.0 }
 0x40b   :  { %v1025_v32 = vpack.c.bf16 %v1018_v31, %v1017_v13  ;;  %v1019_v12 = vsel %vm1002_vm4, %v994_v27, %v1011_v26  ;;  %v1020_v22 = vsel %vm1003_vm5, %v995_v8, %v1012_v30  ;;  %v1013_v11 = vmul.f32 %v1008_v55, %v996_v28 }
 0x40c   :  { %v1026_v33 = vpack.c.bf16 %v1020_v22, %v1019_v12  ;;  %v1014_v34 = vmul.f32 %v1008_v55, %v997_v62  ;;  %v1015_v17 = vmul.f32 %v1008_v55, %v998_v7  ;;  %v1016_v24 = vmul.f32 %v1008_v55, %v999_v14 }
 0x40d   :  { %4967 = vmatprep.mubr.bf16.mxu0 %v1025_v32  ;;  %v1021_v35 = vsel %vm1004_vm6, %v996_v28, %v1013_v11  ;;  %vm1006_vm8 = vcmp.ge.f32.partialorder %v998_v7, 0.0  ;;  %vm1007_vm9 = vcmp.ge.f32.partialorder %v999_v14, 0.0 }
 0x40e   :  { %4968 = vmatmul.mubr.bf16.vlgmr.msra.gmra.mxu0 %v1026_v33  ;;  %v1022_v29 = vsel %vm1005_vm7, %v997_v62, %v1014_v34  ;;  %v1023_v37 = vsel %vm1006_vm8, %v998_v7, %v1015_v17  ;;  %v1024_v38 = vsel %vm1007_vm9, %v999_v14, %v1016_v24 }
 0x40f   :  { %v1027_v36 = vpack.c.bf16 %v1022_v29, %v1021_v35  ;;  %v1028_v39 = vpack.c.bf16 %v1024_v38, %v1023_v37 }
 0x411   :  { %4971 = vmatprep.mubr.bf16.mxu0 %v1027_v36 }
 0x416   :  { %4972 = vmatmul.mubr.bf16.gmra.mxu0 %v1028_v39 }
 0x4ce   :  { %v4969_v48 = vpop.f32.mrf.mxu0 }
 0x4cf   :  { %v5866_v54 = vadd.f32 %v4969_v48, %v4403_v50  ;;  %v1258_v48 = vstv %s4414_s27 }
 0x4d0   :  { %v1136_v49 = vpop.f32.mrf.mxu0 }
 0x4d1   :  { %v5864_v52 = vadd.f32 %v4403_v50, %v1136_v49  ;;  %v1188_v6 = vmul.f32 %v5866_v54, %v5866_v54 }
 0x4d2   :  { %v4970_v51 = vpop.f32.mrf.mxu0 }
 0x4d3   :  { %v1186_v57 = vmul.f32 %v5864_v52, %v5864_v52  ;;  %v5872_v58 = vadd.f32 %v4970_v51, %v4403_v50 }
 0x4d4   :  { %v1139_v53 = vpop.f32.mrf.mxu0 }
 0x4d5   :  { %v5868_v55 = vadd.f32 %v4403_v50, %v1139_v53  ;;  %v1189_v18 = vmul.f32 %v5872_v58, %v5872_v58 }
 0x4d6   :  { %v4973_v56 = vpop.f32.mrf.mxu0 }
 0x4d7   :  { %v1172_v60 = vadd.f32 %v5868_v55, %v5864_v52  ;;  %v1187_v63 = vmul.f32 %v5868_v55, %v5868_v55  ;;  %v1161_v23 = vadd.f32 %v4973_v56, %v4403_v50  ;;  %v4415_v56 = vld [vmem:[%s6975_s28 + $0x3] ss:$0 sm:$0xff] }
 0x4d8   :  { %v1152_v0 = vpop.f32.mrf.mxu0 }
 0x4d9   :  { %v1173_v9 = vadd.f32 %v1172_v60, %v5866_v54  ;;  %v1194_v10 = vadd.f32 %v1187_v63, %v1186_v57  ;;  %v1153_v15 = vadd.f32 %v4403_v50, %v1152_v0  ;;  %v1192_v14 = vmul.f32 %v1161_v23, %v1161_v23 }
 0x4da   :  { %v4974_v16 = vpop.f32.mrf.mxu0 }
 0x4db   :  { %v1195_v20 = vadd.f32 %v1194_v10, %v1188_v6  ;;  %v1174_v21 = vadd.f32 %v1173_v9, %v5872_v58  ;;  %v1190_v62 = vmul.f32 %v1153_v15, %v1153_v15  ;;  %v1164_v8 = vadd.f32 %v4974_v16, %v4403_v50 }
 0x4dc   :  { %v1155_v59 = vpop.f32.mrf.mxu0 }
 0x4dd   :  { %v1175_v25 = vadd.f32 %v1174_v21, %v1153_v15  ;;  %v1196_v4 = vadd.f32 %v1195_v20, %v1189_v18  ;;  %v1156_v61 = vadd.f32 %v4403_v50, %v1155_v59  ;;  %v1193_v26 = vmul.f32 %v1164_v8, %v1164_v8 }
 0x4df   :  { %v1197_v27 = vadd.f32 %v1196_v4, %v1190_v62  ;;  %v1176_v28 = vadd.f32 %v1175_v25, %v1156_v61  ;;  %v1191_v7 = vmul.f32 %v1156_v61, %v1156_v61 }
 0x4e1   :  { %v1177_v2 = vadd.f32 %v1176_v28, %v1161_v23  ;;  %v1198_v19 = vadd.f32 %v1197_v27, %v1191_v7 }
 0x4e3   :  { %v1178_v30 = vadd.f32 %v1177_v2, %v1164_v8  ;;  %v1199_v13 = vadd.f32 %v1198_v19, %v1192_v14 }
 0x4e5   :  { %v1179_v31 = vrot.slane %v1178_v30, 4  ;;  %v1200_v32 = vadd.f32 %v1199_v13, %v1193_v26 }
 0x4e7   :  { %v1180_v12 = vadd.f32 %v1179_v31, %v1178_v30  ;;  %v1201_v22 = vrot.slane %v1200_v32, 4 }
 0x4e9   :  { %v1181_v11 = vrot.slane %v1180_v12, 2  ;;  %v1202_v33 = vadd.f32 %v1201_v22, %v1200_v32 }
 0x4eb   :  { %v1182_v34 = vadd.f32 %v1181_v11, %v1180_v12  ;;  %v1203_v35 = vrot.slane %v1202_v33, 2 }
 0x4ed   :  { %v1183_v17 = vrot.slane %v1182_v34, 1  ;;  %v1204_v24 = vadd.f32 %v1203_v35, %v1202_v33 }
 0x4ef   :  { %v1184_v29 = vadd.f32 %v1183_v17, %v1182_v34  ;;  %v1205_v36 = vrot.slane %v1204_v24, 1  ;;  %v5163_v17 = vld [vmem:[%s6971_s25 + $0x178] sm:$0xff]  }
 0x4f0   :  { %4999 = vmatprep.subr.bf16.mxu0 %v5163_v17 }
 0x4f1   :  { %v1185_v37 = vmul.f32 0.015625, %v1184_v29  ;;  %v1206_v38 = vadd.f32 %v1205_v36, %v1204_v24  ;;  %5000 = vmatpush3.bf16.msra.mxu0 %v5163_v17  ;;  %v5164_v24 = vld [vmem:[%s6971_s25 + $0x170] sm:$0xff]   ;;  %v5165_v29 = vld [vmem:[%s6971_s25 + $0x168] sm:$0xff]   ;;  %v5166_v36 = vld [vmem:[%s6971_s25 + $0x160] sm:$0xff]  }
 0x4f2   :  { %5001 = vmatprep.subr.bf16.mxu0 %v5164_v24 }
 0x4f3   :  { %v1207_v39 = vmul.f32 0.015625, %v1206_v38  ;;  %v1208_v40 = vmul.f32 %v1185_v37, %v1185_v37  ;;  %v1219_v47 = vsub.f32 %v1156_v61, %v1185_v37  ;;  %v1214_v50 = vsub.f32 %v5864_v52, %v1185_v37  ;;  %v5168_v38 = vld [vmem:[%s6971_s25 + $0x150] sm:$0xff]  }
 0x4f4   :  { %v1215_v51 = vsub.f32 %v5868_v55, %v1185_v37  ;;  %v1216_v53 = vsub.f32 %v5866_v54, %v1185_v37  ;;  %v1217_v57 = vsub.f32 %v5872_v58, %v1185_v37  ;;  %v1218_v60 = vsub.f32 %v1153_v15, %v1185_v37 }
 0x4f5   :  { %v1209_v41 = vsub.f32 %v1207_v39, %v1208_v40  ;;  %v1220_v63 = vsub.f32 %v1161_v23, %v1185_v37  ;;  %v1221_v0 = vsub.f32 %v1164_v8, %v1185_v37  ;;  %5002 = vmatpush3.bf16.msra.mxu0 %v5164_v24  ;;  %v5167_v37 = vld [vmem:[%s6971_s25 + $0x158] sm:$0xff]   ;;  %v5169_v39 = vld [vmem:[%s6971_s25 + $0x148] sm:$0xff]   ;;  %v5170_v40 = vld [vmem:[%s6971_s25 + $0x140] sm:$0xff]  }
 0x4f6   :  { %5003 = vmatprep.subr.bf16.mxu0 %v5165_v29 }
 0x4f7   :  { %v1210_v42 = vmax.f32 %v1209_v41, 0.0 }
 0x4f9   :  { %v1211_v43 = vadd.f32 1e-05, %v1210_v42  ;;  %5004 = vmatpush3.bf16.msra.mxu0 %v5165_v29 }
 0x4fa   :  { %5005 = vmatprep.subr.bf16.mxu0 %v5166_v36 }
 0x4fb   :  { %5413 = vrsqrt.f32 %v1211_v43  ;;  %v4433_v43 = vld [vmem:[%s6973_s3 + $0x4] ss:$0 sm:$0xff] }
 0x4fd   :  { %5006 = vmatpush3.bf16.msra.mxu0 %v5166_v36 }
 0x4fe   :  { %5007 = vmatprep.subr.bf16.mxu0 %v5167_v37 }
 0x501   :  { %5008 = vmatpush3.bf16.msra.mxu0 %v5167_v37  ;;  %v4442_v37 = vld [vmem:[%s6974_s26 + $0x4] sm:$0x1] }
 0x502   :  { %5009 = vmatprep.subr.bf16.mxu0 %v5168_v38 }
 0x505   :  { %5010 = vmatpush3.bf16.msra.mxu0 %v5168_v38 }
 0x506   :  { %5011 = vmatprep.subr.bf16.mxu0 %v5169_v39 }
 0x508   :  { %v5414_v45 = vpop.eup %5413 }
 0x509   :  { %v1213_v46 = vmul.f32 %v5414_v45, %v4412_v44  ;;  %5012 = vmatpush3.bf16.msra.mxu0 %v5169_v39 }
 0x50a   :  { %5013 = vmatprep.subr.bf16.mxu0 %v5170_v40 }
 0x50b   :  { %v1226_v49 = vrot.slane %v1213_v46, %v5710_v3 }
 0x50d   :  { %v1233_v6 = vmul.f32 %v1226_v49, %v1219_v47  ;;  %v1228_v9 = vmul.f32 %v1226_v49, %v1214_v50  ;;  %v1229_v10 = vmul.f32 %v1226_v49, %v1215_v51  ;;  %v1230_v16 = vmul.f32 %v1226_v49, %v1216_v53  ;;  %5014 = vmatpush3.bf16.msra.mxu0 %v5170_v40 }
 0x50e   :  { %v1231_v18 = vmul.f32 %v1226_v49, %v1217_v57  ;;  %v1232_v20 = vmul.f32 %v1226_v49, %v1218_v60  ;;  %v1234_v52 = vmul.f32 %v1226_v49, %v1220_v63  ;;  %v1235_v21 = vmul.f32 %v1226_v49, %v1221_v0 }
 0x50f   :  { %v1247_v55 = vadd.f32 %v4415_v56, %v1233_v6  ;;  %v1242_v59 = vadd.f32 %v4415_v56, %v1228_v9  ;;  %v1243_v54 = vadd.f32 %v4415_v56, %v1229_v10  ;;  %v1244_v25 = vadd.f32 %v4415_v56, %v1230_v16 }
 0x510   :  { %v1245_v62 = vadd.f32 %v4415_v56, %v1231_v18  ;;  %v1246_v4 = vadd.f32 %v4415_v56, %v1232_v20  ;;  %v1248_v61 = vadd.f32 %v4415_v56, %v1234_v52  ;;  %v1249_v27 = vadd.f32 %v4415_v56, %v1235_v21 }
 0x511   :  { %vm1250_vm10 = vcmp.ge.f32.partialorder %v1242_v59, 0.0  ;;  %vm1251_vm11 = vcmp.ge.f32.partialorder %v1243_v54, 0.0  ;;  %v1259_v58 = vmul.f32 %v1258_v48, %v1242_v59  ;;  %v1260_v15 = vmul.f32 %v1258_v48, %v1243_v54 }
 0x512   :  { %vm1252_vm12 = vcmp.ge.f32.partialorder %v1244_v25, 0.0  ;;  %vm1253_vm13 = vcmp.ge.f32.partialorder %v1245_v62, 0.0  ;;  %v1261_v23 = vmul.f32 %v1258_v48, %v1244_v25  ;;  %v1262_v8 = vmul.f32 %v1258_v48, %v1245_v62 }
 0x513   :  { %v1267_v28 = vsel %vm1250_vm10, %v1242_v59, %v1259_v58  ;;  %v1268_v7 = vsel %vm1251_vm11, %v1243_v54, %v1260_v15  ;;  %vm1254_vm14 = vcmp.ge.f32.partialorder %v1246_v4, 0.0  ;;  %vm1255_vm15 = vcmp.ge.f32.partialorder %v1247_v55, 0.0 }
 0x514   :  { %v1275_v14 = vpack.c.bf16 %v1268_v7, %v1267_v28  ;;  %v1269_v2 = vsel %vm1252_vm12, %v1244_v25, %v1261_v23  ;;  %v1270_v19 = vsel %vm1253_vm13, %v1245_v62, %v1262_v8  ;;  %v1263_v26 = vmul.f32 %v1258_v48, %v1246_v4 }
 0x515   :  { %v1276_v30 = vpack.c.bf16 %v1270_v19, %v1269_v2  ;;  %v1264_v13 = vmul.f32 %v1258_v48, %v1247_v55  ;;  %v1265_v32 = vmul.f32 %v1258_v48, %v1248_v61  ;;  %v1266_v12 = vmul.f32 %v1258_v48, %v1249_v27 }
 0x516   :  { %4991 = vmatprep.mubr.bf16.mxu1 %v1275_v14  ;;  %v1271_v31 = vsel %vm1254_vm14, %v1246_v4, %v1263_v26  ;;  %vm1256_vm0 = vcmp.ge.f32.partialorder %v1248_v61, 0.0  ;;  %vm1257_vm1 = vcmp.ge.f32.partialorder %v1249_v27, 0.0 }
 0x517   :  { %4992 = vmatmul.mubr.bf16.vlgmr.msra.gmra.mxu1 %v1276_v30  ;;  %v1272_v22 = vsel %vm1255_vm15, %v1247_v55, %v1264_v13  ;;  %v1273_v33 = vsel %vm1256_vm0, %v1248_v61, %v1265_v32  ;;  %v1274_v34 = vsel %vm1257_vm1, %v1249_v27, %v1266_v12 }
 0x518   :  { %v1277_v11 = vpack.c.bf16 %v1272_v22, %v1271_v31  ;;  %v1278_v35 = vpack.c.bf16 %v1274_v34, %v1273_v33 }
 0x51a   :  { %4995 = vmatprep.mubr.bf16.mxu1 %v1277_v11 }
 0x51f   :  { %4996 = vmatmul.mubr.bf16.gmra.mxu1 %v1278_v35 }
 0x5d7   :  { %v4993_v41 = vpop.f32.mrf.mxu1 }
 0x5d8   :  { %v5924_v47 = vadd.f32 %v4993_v41, %v4433_v43  ;;  %v1508_v41 = vstv %s4444_s4  ;;  %s6976_s4 = sld [smem:[#allocation8_spill]] }
 0x5d9   :  { %v1386_v42 = vpop.f32.mrf.mxu1 }
 0x5da   :  { %v5922_v45 = vadd.f32 %v4433_v43, %v1386_v42  ;;  %v1438_v60 = vmul.f32 %v5924_v47, %v5924_v47 }
 0x5db   :  { %v4994_v44 = vpop.f32.mrf.mxu1 }
 0x5dc   :  { %v1436_v50 = vmul.f32 %v5922_v45, %v5922_v45  ;;  %v5930_v51 = vadd.f32 %v4994_v44, %v4433_v43 }
 0x5dd   :  { %v1389_v46 = vpop.f32.mrf.mxu1 }
 0x5de   :  { %v5926_v48 = vadd.f32 %v4433_v43, %v1389_v46  ;;  %v1439_v10 = vmul.f32 %v5930_v51, %v5930_v51 }
 0x5df   :  { %v4997_v49 = vpop.f32.mrf.mxu1 }
 0x5e0   :  { %v1422_v53 = vadd.f32 %v5926_v48, %v5922_v45  ;;  %v1437_v56 = vmul.f32 %v5926_v48, %v5926_v48  ;;  %v1411_v20 = vadd.f32 %v4997_v49, %v4433_v43  ;;  %v4445_v49 = vld [vmem:[%s6975_s28 + $0x4] ss:$0 sm:$0xff] }
 0x5e1   :  { %v1402_v57 = vpop.f32.mrf.mxu1 }
 0x5e2   :  { %v1423_v63 = vadd.f32 %v1422_v53, %v5924_v47  ;;  %v1444_v0 = vadd.f32 %v1437_v56, %v1436_v50  ;;  %v1403_v6 = vadd.f32 %v4433_v43, %v1402_v57  ;;  %v1442_v27 = vmul.f32 %v1411_v20, %v1411_v20 }
 0x5e3   :  { %v4998_v9 = vpop.f32.mrf.mxu1 }
 0x5e4   :  { %v1445_v16 = vadd.f32 %v1444_v0, %v1438_v60  ;;  %v1424_v18 = vadd.f32 %v1423_v63, %v5930_v51  ;;  %v1440_v55 = vmul.f32 %v1403_v6, %v1403_v6  ;;  %v1414_v62 = vadd.f32 %v4998_v9, %v4433_v43 }
 0x5e5   :  { %v1405_v52 = vpop.f32.mrf.mxu1 }
 0x5e6   :  { %v1425_v21 = vadd.f32 %v1424_v18, %v1403_v6  ;;  %v1446_v59 = vadd.f32 %v1445_v16, %v1439_v10  ;;  %v1406_v54 = vadd.f32 %v4433_v43, %v1405_v52  ;;  %v1443_v23 = vmul.f32 %v1414_v62, %v1414_v62 }
 0x5e8   :  { %v1447_v25 = vadd.f32 %v1446_v59, %v1440_v55  ;;  %v1426_v4 = vadd.f32 %v1425_v21, %v1406_v54  ;;  %v1441_v61 = vmul.f32 %v1406_v54, %v1406_v54 }
 0x5ea   :  { %v1427_v58 = vadd.f32 %v1426_v4, %v1411_v20  ;;  %v1448_v15 = vadd.f32 %v1447_v25, %v1441_v61 }
 0x5ec   :  { %v1428_v8 = vadd.f32 %v1427_v58, %v1414_v62  ;;  %v1449_v28 = vadd.f32 %v1448_v15, %v1442_v27 }
 0x5ee   :  { %v1429_v7 = vrot.slane %v1428_v8, 4  ;;  %v1450_v14 = vadd.f32 %v1449_v28, %v1443_v23 }
 0x5f0   :  { %v1430_v2 = vadd.f32 %v1429_v7, %v1428_v8  ;;  %v1451_v19 = vrot.slane %v1450_v14, 4 }
 0x5f2   :  { %v1431_v26 = vrot.slane %v1430_v2, 2  ;;  %v1452_v30 = vadd.f32 %v1451_v19, %v1450_v14 }
 0x5f4   :  { %v1432_v13 = vadd.f32 %v1431_v26, %v1430_v2  ;;  %v1453_v31 = vrot.slane %v1452_v30, 2 }
 0x5f6   :  { %v1433_v32 = vrot.slane %v1432_v13, 1  ;;  %v1454_v12 = vadd.f32 %v1453_v31, %v1452_v30 }
 0x5f8   :  { %v1434_v22 = vadd.f32 %v1433_v32, %v1432_v13  ;;  %v1455_v11 = vrot.slane %v1454_v12, 1  ;;  %v5171_v32 = vld [vmem:[%s6971_s25 + $0x1b8] sm:$0xff]  }
 0x5f9   :  { %5023 = vmatprep.subr.bf16.mxu1 %v5171_v32 }
 0x5fa   :  { %v1435_v33 = vmul.f32 0.015625, %v1434_v22  ;;  %v1456_v34 = vadd.f32 %v1455_v11, %v1454_v12  ;;  %5024 = vmatpush3.bf16.msra.mxu1 %v5171_v32  ;;  %v5172_v12 = vld [vmem:[%s6971_s25 + $0x1b0] sm:$0xff]   ;;  %v5173_v22 = vld [vmem:[%s6971_s25 + $0x1a8] sm:$0xff]   ;;  %v5174_v11 = vld [vmem:[%s6971_s25 + $0x1a0] sm:$0xff]  }
 0x5fb   :  { %5025 = vmatprep.subr.bf16.mxu1 %v5172_v12 }
 0x5fc   :  { %v1457_v35 = vmul.f32 0.015625, %v1456_v34  ;;  %v1458_v17 = vmul.f32 %v1435_v33, %v1435_v33  ;;  %v1469_v40 = vsub.f32 %v1406_v54, %v1435_v33  ;;  %v1464_v43 = vsub.f32 %v5922_v45, %v1435_v33  ;;  %v5176_v34 = vld [vmem:[%s6971_s25 + $0x190] sm:$0xff]  }
 0x5fd   :  { %v1465_v44 = vsub.f32 %v5926_v48, %v1435_v33  ;;  %v1466_v46 = vsub.f32 %v5924_v47, %v1435_v33  ;;  %v1467_v50 = vsub.f32 %v5930_v51, %v1435_v33  ;;  %v1468_v53 = vsub.f32 %v1403_v6, %v1435_v33 }
 0x5fe   :  { %v1459_v24 = vsub.f32 %v1457_v35, %v1458_v17  ;;  %v1470_v56 = vsub.f32 %v1411_v20, %v1435_v33  ;;  %v1471_v57 = vsub.f32 %v1414_v62, %v1435_v33  ;;  %5026 = vmatpush3.bf16.msra.mxu1 %v5172_v12  ;;  %v5175_v33 = vld [vmem:[%s6971_s25 + $0x198] sm:$0xff]   ;;  %v5177_v35 = vld [vmem:[%s6971_s25 + $0x188] sm:$0xff]   ;;  %v5178_v17 = vld [vmem:[%s6971_s25 + $0x180] sm:$0xff]  }
 0x5ff   :  { %5027 = vmatprep.subr.bf16.mxu1 %v5173_v22 }
 0x600   :  { %v1460_v29 = vmax.f32 %v1459_v24, 0.0 }
 0x602   :  { %v1461_v36 = vadd.f32 1e-05, %v1460_v29  ;;  %5028 = vmatpush3.bf16.msra.mxu1 %v5173_v22 }
 0x603   :  { %5029 = vmatprep.subr.bf16.mxu1 %v5174_v11 }
 0x604   :  { %5415 = vrsqrt.f32 %v1461_v36  ;;  %v4463_v36 = vld [vmem:[%s6973_s3 + $0x5] ss:$0 sm:$0xff] }
 0x606   :  { %5030 = vmatpush3.bf16.msra.mxu1 %v5174_v11 }
 0x607   :  { %5031 = vmatprep.subr.bf16.mxu1 %v5175_v33 }
 0x60a   :  { %5032 = vmatpush3.bf16.msra.mxu1 %v5175_v33  ;;  %v4472_v33 = vld [vmem:[%s6974_s26 + $0x5] sm:$0x1] }
 0x60b   :  { %5033 = vmatprep.subr.bf16.mxu1 %v5176_v34 }
 0x60e   :  { %5034 = vmatpush3.bf16.msra.mxu1 %v5176_v34 }
 0x60f   :  { %5035 = vmatprep.subr.bf16.mxu1 %v5177_v35 }
 0x611   :  { %v5416_v38 = vpop.eup %5415 }
 0x612   :  { %v1463_v39 = vmul.f32 %v5416_v38, %v4442_v37  ;;  %5036 = vmatpush3.bf16.msra.mxu1 %v5177_v35 }
 0x613   :  { %5037 = vmatprep.subr.bf16.mxu1 %v5178_v17 }
 0x614   :  { %v1476_v42 = vrot.slane %v1463_v39, %v5710_v3 }
 0x616   :  { %v1483_v60 = vmul.f32 %v1476_v42, %v1469_v40  ;;  %v1478_v63 = vmul.f32 %v1476_v42, %v1464_v43  ;;  %v1479_v0 = vmul.f32 %v1476_v42, %v1465_v44  ;;  %v1480_v9 = vmul.f32 %v1476_v42, %v1466_v46  ;;  %5038 = vmatpush3.bf16.msra.mxu1 %v5178_v17 }
 0x617   :  { %v1481_v10 = vmul.f32 %v1476_v42, %v1467_v50  ;;  %v1482_v16 = vmul.f32 %v1476_v42, %v1468_v53  ;;  %v1484_v45 = vmul.f32 %v1476_v42, %v1470_v56  ;;  %v1485_v18 = vmul.f32 %v1476_v42, %v1471_v57 }
 0x618   :  { %v1497_v48 = vadd.f32 %v4445_v49, %v1483_v60  ;;  %v1492_v52 = vadd.f32 %v4445_v49, %v1478_v63  ;;  %v1493_v47 = vadd.f32 %v4445_v49, %v1479_v0  ;;  %v1494_v21 = vadd.f32 %v4445_v49, %v1480_v9 }
 0x619   :  { %v1495_v55 = vadd.f32 %v4445_v49, %v1481_v10  ;;  %v1496_v59 = vadd.f32 %v4445_v49, %v1482_v16  ;;  %v1498_v54 = vadd.f32 %v4445_v49, %v1484_v45  ;;  %v1499_v25 = vadd.f32 %v4445_v49, %v1485_v18 }
 0x61a   :  { %vm1500_vm2 = vcmp.ge.f32.partialorder %v1492_v52, 0.0  ;;  %vm1501_vm3 = vcmp.ge.f32.partialorder %v1493_v47, 0.0  ;;  %v1509_v51 = vmul.f32 %v1508_v41, %v1492_v52  ;;  %v1510_v6 = vmul.f32 %v1508_v41, %v1493_v47 }
 0x61b   :  { %vm1502_vm4 = vcmp.ge.f32.partialorder %v1494_v21, 0.0  ;;  %vm1503_vm5 = vcmp.ge.f32.partialorder %v1495_v55, 0.0  ;;  %v1511_v20 = vmul.f32 %v1508_v41, %v1494_v21  ;;  %v1512_v62 = vmul.f32 %v1508_v41, %v1495_v55 }
 0x61c   :  { %v1517_v4 = vsel %vm1500_vm2, %v1492_v52, %v1509_v51  ;;  %v1518_v61 = vsel %vm1501_vm3, %v1493_v47, %v1510_v6  ;;  %vm1504_vm6 = vcmp.ge.f32.partialorder %v1496_v59, 0.0  ;;  %vm1505_vm7 = vcmp.ge.f32.partialorder %v1497_v48, 0.0 }
 0x61d   :  { %v1525_v27 = vpack.c.bf16 %v1518_v61, %v1517_v4  ;;  %v1519_v58 = vsel %vm1502_vm4, %v1494_v21, %v1511_v20  ;;  %v1520_v15 = vsel %vm1503_vm5, %v1495_v55, %v1512_v62  ;;  %v1513_v23 = vmul.f32 %v1508_v41, %v1496_v59 }
 0x61e   :  { %v1526_v8 = vpack.c.bf16 %v1520_v15, %v1519_v58  ;;  %v1514_v28 = vmul.f32 %v1508_v41, %v1497_v48  ;;  %v1515_v14 = vmul.f32 %v1508_v41, %v1498_v54  ;;  %v1516_v2 = vmul.f32 %v1508_v41, %v1499_v25 }
 0x61f   :  { %5015 = vmatprep.mubr.bf16.mxu0 %v1525_v27  ;;  %v1521_v7 = vsel %vm1504_vm6, %v1496_v59, %v1513_v23  ;;  %vm1506_vm8 = vcmp.ge.f32.partialorder %v1498_v54, 0.0  ;;  %vm1507_vm9 = vcmp.ge.f32.partialorder %v1499_v25, 0.0 }
 0x620   :  { %5016 = vmatmul.mubr.bf16.vlgmr.msra.gmra.mxu0 %v1526_v8  ;;  %v1522_v19 = vsel %vm1505_vm7, %v1497_v48, %v1514_v28  ;;  %v1523_v30 = vsel %vm1506_vm8, %v1498_v54, %v1515_v14  ;;  %v1524_v13 = vsel %vm1507_vm9, %v1499_v25, %v1516_v2 }
 0x621   :  { %v1527_v26 = vpack.c.bf16 %v1522_v19, %v1521_v7  ;;  %v1528_v31 = vpack.c.bf16 %v1524_v13, %v1523_v30 }
 0x623   :  { %5019 = vmatprep.mubr.bf16.mxu0 %v1527_v26 }
 0x628   :  { %5020 = vmatmul.mubr.bf16.gmra.mxu0 %v1528_v31 }
 0x6e0   :  { %v5017_v24 = vpop.f32.mrf.mxu0 }
 0x6e1   :  { %v5982_v40 = vadd.f32 %v5017_v24, %v4463_v36  ;;  %v1758_v24 = vstv %s4474_s30 }
 0x6e2   :  { %v1636_v29 = vpop.f32.mrf.mxu0 }
 0x6e3   :  { %v5980_v38 = vadd.f32 %v4463_v36, %v1636_v29  ;;  %v1688_v53 = vmul.f32 %v5982_v40, %v5982_v40 }
 0x6e4   :  { %v5018_v37 = vpop.f32.mrf.mxu0 }
 0x6e5   :  { %v1686_v43 = vmul.f32 %v5980_v38, %v5980_v38  ;;  %v5988_v44 = vadd.f32 %v5018_v37, %v4463_v36 }
 0x6e6   :  { %v1639_v39 = vpop.f32.mrf.mxu0 }
 0x6e7   :  { %v5984_v41 = vadd.f32 %v4463_v36, %v1639_v39  ;;  %v1689_v0 = vmul.f32 %v5988_v44, %v5988_v44 }
 0x6e8   :  { %v5021_v42 = vpop.f32.mrf.mxu0 }
 0x6e9   :  { %v1672_v46 = vadd.f32 %v5984_v41, %v5980_v38  ;;  %v1687_v49 = vmul.f32 %v5984_v41, %v5984_v41  ;;  %v1661_v16 = vadd.f32 %v5021_v42, %v4463_v36  ;;  %v4475_v42 = vld [vmem:[%s6975_s28 + $0x5] ss:$0 sm:$0xff] }
 0x6ea   :  { %v1652_v50 = vpop.f32.mrf.mxu0 }
 0x6eb   :  { %v1673_v56 = vadd.f32 %v1672_v46, %v5982_v40  ;;  %v1694_v57 = vadd.f32 %v1687_v49, %v1686_v43  ;;  %v1653_v60 = vadd.f32 %v4463_v36, %v1652_v50  ;;  %v1692_v25 = vmul.f32 %v1661_v16, %v1661_v16 }
 0x6ec   :  { %v5022_v63 = vpop.f32.mrf.mxu0 }
 0x6ed   :  { %v1695_v9 = vadd.f32 %v1694_v57, %v1688_v53  ;;  %v1674_v10 = vadd.f32 %v1673_v56, %v5988_v44  ;;  %v1690_v48 = vmul.f32 %v1653_v60, %v1653_v60  ;;  %v1664_v55 = vadd.f32 %v5022_v63, %v4463_v36 }
 0x6ee   :  { %v1655_v45 = vpop.f32.mrf.mxu0 }
 0x6ef   :  { %v1675_v18 = vadd.f32 %v1674_v10, %v1653_v60  ;;  %v1696_v52 = vadd.f32 %v1695_v9, %v1689_v0  ;;  %v1656_v47 = vadd.f32 %v4463_v36, %v1655_v45  ;;  %v1693_v20 = vmul.f32 %v1664_v55, %v1664_v55 }
 0x6f1   :  { %v1697_v21 = vadd.f32 %v1696_v52, %v1690_v48  ;;  %v1676_v59 = vadd.f32 %v1675_v18, %v1656_v47  ;;  %v1691_v54 = vmul.f32 %v1656_v47, %v1656_v47 }
 0x6f3   :  { %v1677_v51 = vadd.f32 %v1676_v59, %v1661_v16  ;;  %v1698_v6 = vadd.f32 %v1697_v21, %v1691_v54 }
 0x6f5   :  { %v1678_v62 = vadd.f32 %v1677_v51, %v1664_v55  ;;  %v1699_v4 = vadd.f32 %v1698_v6, %v1692_v25 }
 0x6f7   :  { %v1679_v61 = vrot.slane %v1678_v62, 4  ;;  %v1700_v27 = vadd.f32 %v1699_v4, %v1693_v20 }
 0x6f9   :  { %v1680_v58 = vadd.f32 %v1679_v61, %v1678_v62  ;;  %v1701_v15 = vrot.slane %v1700_v27, 4 }
 0x6fb   :  { %v1681_v23 = vrot.slane %v1680_v58, 2  ;;  %v1702_v8 = vadd.f32 %v1701_v15, %v1700_v27 }
 0x6fd   :  { %v1682_v28 = vadd.f32 %v1681_v23, %v1680_v58  ;;  %v1703_v7 = vrot.slane %v1702_v8, 2 }
 0x6ff   :  { %v1683_v14 = vrot.slane %v1682_v28, 1  ;;  %v1704_v2 = vadd.f32 %v1703_v7, %v1702_v8 }
 0x701   :  { %v1684_v19 = vadd.f32 %v1683_v14, %v1682_v28  ;;  %v1705_v26 = vrot.slane %v1704_v2, 1  ;;  %v5179_v14 = vld [vmem:[%s6971_s25 + $0x1f8] sm:$0xff]  }
 0x702   :  { %5047 = vmatprep.subr.bf16.mxu0 %v5179_v14 }
 0x703   :  { %v1685_v30 = vmul.f32 0.015625, %v1684_v19  ;;  %v1706_v13 = vadd.f32 %v1705_v26, %v1704_v2  ;;  %5048 = vmatpush3.bf16.msra.mxu0 %v5179_v14  ;;  %v5180_v2 = vld [vmem:[%s6971_s25 + $0x1f0] sm:$0xff]   ;;  %v5181_v19 = vld [vmem:[%s6971_s25 + $0x1e8] sm:$0xff]   ;;  %v5182_v26 = vld [vmem:[%s6971_s25 + $0x1e0] sm:$0xff]  }
 0x704   :  { %5049 = vmatprep.subr.bf16.mxu0 %v5180_v2 }
 0x705   :  { %v1707_v31 = vmul.f32 0.015625, %v1706_v13  ;;  %v1708_v32 = vmul.f32 %v1685_v30, %v1685_v30  ;;  %v1719_v17 = vsub.f32 %v1656_v47, %v1685_v30  ;;  %v1714_v36 = vsub.f32 %v5980_v38, %v1685_v30  ;;  %v5184_v13 = vld [vmem:[%s6971_s25 + $0x1d0] sm:$0xff]  }
 0x706   :  { %v1715_v37 = vsub.f32 %v5984_v41, %v1685_v30  ;;  %v1716_v39 = vsub.f32 %v5982_v40, %v1685_v30  ;;  %v1717_v43 = vsub.f32 %v5988_v44, %v1685_v30  ;;  %v1718_v46 = vsub.f32 %v1653_v60, %v1685_v30 }
 0x707   :  { %v1709_v12 = vsub.f32 %v1707_v31, %v1708_v32  ;;  %v1720_v49 = vsub.f32 %v1661_v16, %v1685_v30  ;;  %v1721_v50 = vsub.f32 %v1664_v55, %v1685_v30  ;;  %5050 = vmatpush3.bf16.msra.mxu0 %v5180_v2  ;;  %v5183_v30 = vld [vmem:[%s6971_s25 + $0x1d8] sm:$0xff]   ;;  %v5185_v31 = vld [vmem:[%s6971_s25 + $0x1c8] sm:$0xff]   ;;  %v5186_v32 = vld [vmem:[%s6971_s25 + $0x1c0] sm:$0xff]   ;;  %s4504_s25 = sld [smem:[#allocation3 + $0x6]] }
 0x708   :  { %5051 = vmatprep.subr.bf16.mxu0 %v5181_v19 }
 0x709   :  { %v1710_v22 = vmax.f32 %v1709_v12, 0.0 }
 0x70b   :  { %v1711_v11 = vadd.f32 1e-05, %v1710_v22  ;;  %5052 = vmatpush3.bf16.msra.mxu0 %v5181_v19 }
 0x70c   :  { %5053 = vmatprep.subr.bf16.mxu0 %v5182_v26 }
 0x70d   :  { %5417 = vrsqrt.f32 %v1711_v11  ;;  %v4493_v11 = vld [vmem:[%s6973_s3 + $0x6] ss:$0 sm:$0xff] }
 0x70f   :  { %5054 = vmatpush3.bf16.msra.mxu0 %v5182_v26 }
 0x710   :  { %5055 = vmatprep.subr.bf16.mxu0 %v5183_v30 }
 0x713   :  { %5056 = vmatpush3.bf16.msra.mxu0 %v5183_v30  ;;  %v4502_v30 = vld [vmem:[%s6974_s26 + $0x6] sm:$0x1] }
 0x714   :  { %5057 = vmatprep.subr.bf16.mxu0 %v5184_v13 }
 0x717   :  { %5058 = vmatpush3.bf16.msra.mxu0 %v5184_v13 }
 0x718   :  { %5059 = vmatprep.subr.bf16.mxu0 %v5185_v31 }
 0x71a   :  { %v5418_v34 = vpop.eup %5417 }
 0x71b   :  { %v1713_v35 = vmul.f32 %v5418_v34, %v4472_v33  ;;  %5060 = vmatpush3.bf16.msra.mxu0 %v5185_v31 }
 0x71c   :  { %5061 = vmatprep.subr.bf16.mxu0 %v5186_v32 }
 0x71d   :  { %v1726_v29 = vrot.slane %v1713_v35, %v5710_v3 }
 0x71f   :  { %v1733_v53 = vmul.f32 %v1726_v29, %v1719_v17  ;;  %v1728_v56 = vmul.f32 %v1726_v29, %v1714_v36  ;;  %v1729_v57 = vmul.f32 %v1726_v29, %v1715_v37  ;;  %v1730_v63 = vmul.f32 %v1726_v29, %v1716_v39  ;;  %5062 = vmatpush3.bf16.msra.mxu0 %v5186_v32 }
 0x720   :  { %v1731_v0 = vmul.f32 %v1726_v29, %v1717_v43  ;;  %v1732_v9 = vmul.f32 %v1726_v29, %v1718_v46  ;;  %v1734_v38 = vmul.f32 %v1726_v29, %v1720_v49  ;;  %v1735_v10 = vmul.f32 %v1726_v29, %v1721_v50 }
 0x721   :  { %v1747_v41 = vadd.f32 %v4475_v42, %v1733_v53  ;;  %v1742_v45 = vadd.f32 %v4475_v42, %v1728_v56  ;;  %v1743_v40 = vadd.f32 %v4475_v42, %v1729_v57  ;;  %v1744_v18 = vadd.f32 %v4475_v42, %v1730_v63 }
 0x722   :  { %v1745_v48 = vadd.f32 %v4475_v42, %v1731_v0  ;;  %v1746_v52 = vadd.f32 %v4475_v42, %v1732_v9  ;;  %v1748_v47 = vadd.f32 %v4475_v42, %v1734_v38  ;;  %v1749_v21 = vadd.f32 %v4475_v42, %v1735_v10 }
 0x723   :  { %vm1750_vm10 = vcmp.ge.f32.partialorder %v1742_v45, 0.0  ;;  %vm1751_vm11 = vcmp.ge.f32.partialorder %v1743_v40, 0.0  ;;  %v1759_v44 = vmul.f32 %v1758_v24, %v1742_v45  ;;  %v1760_v60 = vmul.f32 %v1758_v24, %v1743_v40 }
 0x724   :  { %vm1752_vm12 = vcmp.ge.f32.partialorder %v1744_v18, 0.0  ;;  %vm1753_vm13 = vcmp.ge.f32.partialorder %v1745_v48, 0.0  ;;  %v1761_v16 = vmul.f32 %v1758_v24, %v1744_v18  ;;  %v1762_v55 = vmul.f32 %v1758_v24, %v1745_v48 }
 0x725   :  { %v1767_v59 = vsel %vm1750_vm10, %v1742_v45, %v1759_v44  ;;  %v1768_v54 = vsel %vm1751_vm11, %v1743_v40, %v1760_v60  ;;  %vm1754_vm14 = vcmp.ge.f32.partialorder %v1746_v52, 0.0  ;;  %vm1755_vm15 = vcmp.ge.f32.partialorder %v1747_v41, 0.0 }
 0x726   :  { %v1775_v25 = vpack.c.bf16 %v1768_v54, %v1767_v59  ;;  %v1769_v51 = vsel %vm1752_vm12, %v1744_v18, %v1761_v16  ;;  %v1770_v6 = vsel %vm1753_vm13, %v1745_v48, %v1762_v55  ;;  %v1763_v20 = vmul.f32 %v1758_v24, %v1746_v52 }
 0x727   :  { %v1776_v62 = vpack.c.bf16 %v1770_v6, %v1769_v51  ;;  %v1764_v4 = vmul.f32 %v1758_v24, %v1747_v41  ;;  %v1765_v27 = vmul.f32 %v1758_v24, %v1748_v47  ;;  %v1766_v58 = vmul.f32 %v1758_v24, %v1749_v21 }
 0x728   :  { %5039 = vmatprep.mubr.bf16.mxu1 %v1775_v25  ;;  %v1771_v61 = vsel %vm1754_vm14, %v1746_v52, %v1763_v20  ;;  %vm1756_vm0 = vcmp.ge.f32.partialorder %v1748_v47, 0.0  ;;  %vm1757_vm1 = vcmp.ge.f32.partialorder %v1749_v21, 0.0  ;;  %vm2307_vm10 = vcmask 523264  }
 0x729   :  { %5040 = vmatmul.mubr.bf16.vlgmr.msra.gmra.mxu1 %v1776_v62  ;;  %v1772_v15 = vsel %vm1755_vm15, %v1747_v41, %v1764_v4  ;;  %v1773_v8 = vsel %vm1756_vm0, %v1748_v47, %v1765_v27  ;;  %v1774_v28 = vsel %vm1757_vm1, %v1749_v21, %v1766_v58 }
 0x72a   :  { %v1777_v23 = vpack.c.bf16 %v1772_v15, %v1771_v61  ;;  %v1778_v7 = vpack.c.bf16 %v1774_v28, %v1773_v8 }
 0x72c   :  { %5043 = vmatprep.mubr.bf16.mxu1 %v1777_v23 }
 0x731   :  { %5044 = vmatmul.mubr.bf16.gmra.mxu1 %v1778_v7 }
 0x7e9   :  { %v5041_v12 = vpop.f32.mrf.mxu1 }
 0x7ea   :  { %v6040_v17 = vadd.f32 %v5041_v12, %v4493_v11  ;;  %v2008_v12 = vstv %s4504_s25 }
 0x7eb   :  { %v1886_v22 = vpop.f32.mrf.mxu1 }
 0x7ec   :  { %v6038_v34 = vadd.f32 %v4493_v11, %v1886_v22  ;;  %v1938_v46 = vmul.f32 %v6040_v17, %v6040_v17 }
 0x7ed   :  { %v5042_v33 = vpop.f32.mrf.mxu1 }
 0x7ee   :  { %v1936_v36 = vmul.f32 %v6038_v34, %v6038_v34  ;;  %v6046_v37 = vadd.f32 %v5042_v33, %v4493_v11 }
 0x7ef   :  { %v1889_v35 = vpop.f32.mrf.mxu1 }
 0x7f0   :  { %v6042_v24 = vadd.f32 %v4493_v11, %v1889_v35  ;;  %v1939_v57 = vmul.f32 %v6046_v37, %v6046_v37 }
 0x7f1   :  { %v5045_v29 = vpop.f32.mrf.mxu1 }
 0x7f2   :  { %v1922_v39 = vadd.f32 %v6042_v24, %v6038_v34  ;;  %v1937_v42 = vmul.f32 %v6042_v24, %v6042_v24  ;;  %v1911_v9 = vadd.f32 %v5045_v29, %v4493_v11  ;;  %v4505_v29 = vld [vmem:[%s6975_s28 + $0x6] ss:$0 sm:$0xff] }
 0x7f3   :  { %v1902_v43 = vpop.f32.mrf.mxu1 }
 0x7f4   :  { %v1923_v49 = vadd.f32 %v1922_v39, %v6040_v17  ;;  %v1944_v50 = vadd.f32 %v1937_v42, %v1936_v36  ;;  %v1903_v53 = vadd.f32 %v4493_v11, %v1902_v43  ;;  %v1942_v21 = vmul.f32 %v1911_v9, %v1911_v9 }
 0x7f5   :  { %v5046_v56 = vpop.f32.mrf.mxu1 }
 0x7f6   :  { %v1945_v63 = vadd.f32 %v1944_v50, %v1938_v46  ;;  %v1924_v0 = vadd.f32 %v1923_v49, %v6046_v37  ;;  %v1940_v41 = vmul.f32 %v1903_v53, %v1903_v53  ;;  %v1914_v48 = vadd.f32 %v5046_v56, %v4493_v11 }
 0x7f7   :  { %v1905_v38 = vpop.f32.mrf.mxu1 }
 0x7f8   :  { %v1925_v10 = vadd.f32 %v1924_v0, %v1903_v53  ;;  %v1946_v45 = vadd.f32 %v1945_v63, %v1939_v57  ;;  %v1906_v40 = vadd.f32 %v4493_v11, %v1905_v38  ;;  %v1943_v16 = vmul.f32 %v1914_v48, %v1914_v48 }
 0x7fa   :  { %v1947_v18 = vadd.f32 %v1946_v45, %v1940_v41  ;;  %v1926_v52 = vadd.f32 %v1925_v10, %v1906_v40  ;;  %v1941_v47 = vmul.f32 %v1906_v40, %v1906_v40 }
 0x7fc   :  { %v1927_v44 = vadd.f32 %v1926_v52, %v1911_v9  ;;  %v1948_v60 = vadd.f32 %v1947_v18, %v1941_v47 }
 0x7fe   :  { %v1928_v55 = vadd.f32 %v1927_v44, %v1914_v48  ;;  %v1949_v59 = vadd.f32 %v1948_v60, %v1942_v21 }
 0x800   :  { %v1929_v54 = vrot.slane %v1928_v55, 4  ;;  %v1950_v25 = vadd.f32 %v1949_v59, %v1943_v16 }
 0x802   :  { %v1930_v51 = vadd.f32 %v1929_v54, %v1928_v55  ;;  %v1951_v6 = vrot.slane %v1950_v25, 4 }
 0x804   :  { %v1931_v20 = vrot.slane %v1930_v51, 2  ;;  %v1952_v62 = vadd.f32 %v1951_v6, %v1950_v25 }
 0x806   :  { %v1932_v4 = vadd.f32 %v1931_v20, %v1930_v51  ;;  %v1953_v61 = vrot.slane %v1952_v62, 2 }
 0x808   :  { %v1933_v27 = vrot.slane %v1932_v4, 1  ;;  %v1954_v58 = vadd.f32 %v1953_v61, %v1952_v62 }
 0x80a   :  { %v1934_v15 = vadd.f32 %v1933_v27, %v1932_v4  ;;  %v1955_v23 = vrot.slane %v1954_v58, 1  ;;  %v6072_v27 = vld [vmem:[%s6976_s4] sm:$0xff]  }
 0x80b   :  { %5079 = vmatprep.mubr.msk.bf16.mxu1 %vm2307_vm10, %v6072_v27 }
 0x80c   :  { %v1935_v8 = vmul.f32 0.015625, %v1934_v15  ;;  %v1956_v28 = vadd.f32 %v1955_v23, %v1954_v58  ;;  %v5191_v58 = vld [vmem:[%s6935_s9 + $0x70] ss:$8 sps:$4 sm:$0xff]   ;;  %v5193_v15 = vld [vmem:[%s6935_s9 + $0x74] ss:$8 sps:$4 sm:$0xff]  }
 0x80d   :  { %v5196_v23 = vld [vmem:[%s6935_s9 + $0x64] ss:$8 sps:$4 sm:$0xff]   ;;  %2593 = vmatprep.subr.bf16.mxu0 %v5193_v15 }
 0x80e   :  { %v1957_v7 = vmul.f32 0.015625, %v1956_v28  ;;  %v1958_v14 = vmul.f32 %v1935_v8, %v1935_v8  ;;  %v1969_v32 = vsub.f32 %v1906_v40, %v1935_v8  ;;  %v1964_v11 = vsub.f32 %v6038_v34, %v1935_v8  ;;  %v5199_v28 = vld [vmem:[%s6935_s9 + $0x54] ss:$8 sps:$4 sm:$0xff]  }
 0x80f   :  { %v1965_v33 = vsub.f32 %v6042_v24, %v1935_v8  ;;  %v1966_v35 = vsub.f32 %v6040_v17, %v1935_v8  ;;  %v1967_v36 = vsub.f32 %v6046_v37, %v1935_v8  ;;  %v1968_v39 = vsub.f32 %v1903_v53, %v1935_v8 }
 0x810   :  { %v1959_v2 = vsub.f32 %v1957_v7, %v1958_v14  ;;  %v1970_v42 = vsub.f32 %v1911_v9, %v1935_v8  ;;  %v1971_v43 = vsub.f32 %v1914_v48, %v1935_v8  ;;  %v5194_v8 = vld [vmem:[%s6935_s9 + $0x60] ss:$8 sps:$4 sm:$0xff]   ;;  %v5197_v7 = vld [vmem:[%s6935_s9 + $0x50] ss:$8 sps:$4 sm:$0xff]   ;;  %v5202_v14 = vld [vmem:[%s6935_s9 + $0x44] ss:$8 sps:$4 sm:$0xff]  }
 0x812   :  { %v1960_v19 = vmax.f32 %v1959_v2, 0.0  ;;  %v5200_v2 = vld [vmem:[%s6935_s9 + $0x40] ss:$8 sps:$4 sm:$0xff]  }
 0x814   :  { %v1961_v26 = vadd.f32 1e-05, %v1960_v19  ;;  %v5205_v19 = vld [vmem:[%s6935_s9 + $0x34] ss:$8 sps:$4 sm:$0xff]  }
 0x816   :  { %5419 = vrsqrt.f32 %v1961_v26  ;;  %v5203_v26 = vld [vmem:[%s6935_s9 + $0x30] ss:$8 sps:$4 sm:$0xff]  }
 0x823   :  { %v5420_v13 = vpop.eup %5419 }
 0x824   :  { %v1963_v31 = vmul.f32 %v5420_v13, %v4502_v30  ;;  %v5208_v30 = vld [vmem:[%s6935_s9 + $0x24] ss:$8 sps:$4 sm:$0xff]   ;;  %v5206_v13 = vld [vmem:[%s6935_s9 + $0x20] ss:$8 sps:$4 sm:$0xff]  }
 0x826   :  { %v1976_v22 = vrot.slane %v1963_v31, %v5710_v3  ;;  %v5211_v31 = vld [vmem:[%s6935_s9 + $0x14] ss:$8 sps:$4 sm:$0xff]  }
 0x828   :  { %v1983_v46 = vmul.f32 %v1976_v22, %v1969_v32  ;;  %v1978_v49 = vmul.f32 %v1976_v22, %v1964_v11  ;;  %v1979_v50 = vmul.f32 %v1976_v22, %v1965_v33  ;;  %v1980_v56 = vmul.f32 %v1976_v22, %v1966_v35  ;;  %v5209_v32 = vld [vmem:[%s6935_s9 + $0x10] ss:$8 sps:$4 sm:$0xff]   ;;  %v5217_v11 = vld [vmem:[%s6935_s9 + $0xf4] ss:$8 sps:$4 sm:$0xff]  }
 0x829   :  { %v1981_v57 = vmul.f32 %v1976_v22, %v1967_v36  ;;  %v1982_v63 = vmul.f32 %v1976_v22, %v1968_v39  ;;  %v1984_v34 = vmul.f32 %v1976_v22, %v1970_v42  ;;  %v1985_v0 = vmul.f32 %v1976_v22, %v1971_v43  ;;  %v5212_v22 = vld [vmem:[%s6935_s9] ss:$8 sps:$4 sm:$0xff]   ;;  %v5215_v33 = vld [vmem:[%s6935_s9 + $0xf0] ss:$8 sps:$4 sm:$0xff]   ;;  %v4523_v42 = vld [vmem:[%s6973_s3 + $0x7] ss:$0 sm:$0xff] }
 0x82a   :  { %v1997_v24 = vadd.f32 %v4505_v29, %v1983_v46  ;;  %v1992_v38 = vadd.f32 %v4505_v29, %v1978_v49  ;;  %v1993_v17 = vadd.f32 %v4505_v29, %v1979_v50  ;;  %v1994_v10 = vadd.f32 %v4505_v29, %v1980_v56  ;;  %v5218_v39 = vld [vmem:[%s6935_s9 + $0xe0] ss:$8 sps:$4 sm:$0xff]   ;;  %v5223_v46 = vld [vmem:[%s6935_s9 + $0xd4] ss:$8 sps:$4 sm:$0xff]  }
 0x82b   :  { %v1995_v41 = vadd.f32 %v4505_v29, %v1981_v57  ;;  %v1996_v45 = vadd.f32 %v4505_v29, %v1982_v63  ;;  %v1998_v40 = vadd.f32 %v4505_v29, %v1984_v34  ;;  %v1999_v18 = vadd.f32 %v4505_v29, %v1985_v0  ;;  %v5220_v29 = vld [vmem:[%s6935_s9 + $0xe4] ss:$8 sps:$4 sm:$0xff]   ;;  %v5221_v63 = vld [vmem:[%s6935_s9 + $0xd0] ss:$8 sps:$4 sm:$0xff]  }
 0x82c   :  { %vm2000_vm2 = vcmp.ge.f32.partialorder %v1992_v38, 0.0  ;;  %vm2001_vm3 = vcmp.ge.f32.partialorder %v1993_v17, 0.0  ;;  %v2009_v37 = vmul.f32 %v2008_v12, %v1992_v38  ;;  %v2010_v53 = vmul.f32 %v2008_v12, %v1993_v17  ;;  %v5226_v0 = vld [vmem:[%s6935_s9 + $0xc4] ss:$8 sps:$4 sm:$0xff]  }
 0x82d   :  { %vm2002_vm4 = vcmp.ge.f32.partialorder %v1994_v10, 0.0  ;;  %vm2003_vm5 = vcmp.ge.f32.partialorder %v1995_v41, 0.0  ;;  %v2011_v9 = vmul.f32 %v2008_v12, %v1994_v10  ;;  %v2012_v48 = vmul.f32 %v2008_v12, %v1995_v41 }
 0x82e   :  { %v2017_v52 = vsel %vm2000_vm2, %v1992_v38, %v2009_v37  ;;  %v2018_v47 = vsel %vm2001_vm3, %v1993_v17, %v2010_v53  ;;  %vm2004_vm6 = vcmp.ge.f32.partialorder %v1996_v45, 0.0  ;;  %vm2005_vm7 = vcmp.ge.f32.partialorder %v1997_v24, 0.0  ;;  %v5224_v53 = vld [vmem:[%s6935_s9 + $0xc0] ss:$8 sps:$4 sm:$0xff]  }
 0x82f   :  { %v2025_v21 = vpack.c.bf16 %v2018_v47, %v2017_v52  ;;  %v2019_v44 = vsel %vm2002_vm4, %v1994_v10, %v2011_v9  ;;  %v2020_v60 = vsel %vm2003_vm5, %v1995_v41, %v2012_v48  ;;  %v2013_v16 = vmul.f32 %v2008_v12, %v1996_v45  ;;  %v5229_v48 = vld [vmem:[%s6935_s9 + $0xb4] ss:$8 sps:$4 sm:$0xff]  }
 0x830   :  { %v2026_v55 = vpack.c.bf16 %v2020_v60, %v2019_v44  ;;  %v2014_v59 = vmul.f32 %v2008_v12, %v1997_v24  ;;  %v2015_v25 = vmul.f32 %v2008_v12, %v1998_v40  ;;  %v2016_v51 = vmul.f32 %v2008_v12, %v1999_v18  ;;  %v5214_v12 = vld [vmem:[%s6935_s9 + $0x4] ss:$8 sps:$4 sm:$0xff]  }
 0x831   :  { %5063 = vmatprep.mubr.bf16.mxu0 %v2025_v21  ;;  %v2021_v54 = vsel %vm2004_vm6, %v1996_v45, %v2013_v16  ;;  %vm2006_vm8 = vcmp.ge.f32.partialorder %v1998_v40, 0.0  ;;  %vm2007_vm9 = vcmp.ge.f32.partialorder %v1999_v18, 0.0 }
 0x832   :  { %5064 = vmatmul.mubr.bf16.vlgmr.msra.gmra.mxu0 %v2026_v55  ;;  %v2022_v6 = vsel %vm2005_vm7, %v1997_v24, %v2014_v59  ;;  %v2023_v62 = vsel %vm2006_vm8, %v1998_v40, %v2015_v25  ;;  %v2024_v4 = vsel %vm2007_vm9, %v1999_v18, %v2016_v51  ;;  %v5227_v25 = vld [vmem:[%s6935_s9 + $0xb0] ss:$8 sps:$4 sm:$0xff]   ;;  %v5232_v51 = vld [vmem:[%s6935_s9 + $0xa4] ss:$8 sps:$4 sm:$0xff]  }
 0x833   :  { %v2027_v20 = vpack.c.bf16 %v2022_v6, %v2021_v54  ;;  %v2028_v61 = vpack.c.bf16 %v2024_v4, %v2023_v62  ;;  %2594 = vmatpush1.bf16.msra.mxu0 %v5191_v58 }
 0x834   :  { %2595 = vmatprep.subr.bf16.mxu0 %v5196_v23  ;;  %v5230_v23 = vld [vmem:[%s6935_s9 + $0xa0] ss:$8 sps:$4 sm:$0xff]  }
 0x835   :  { %5067 = vmatprep.mubr.bf16.mxu0 %v2027_v20 }
 0x837   :  { %2596 = vmatpush1.bf16.msra.mxu0 %v5194_v8 }
 0x838   :  { %2597 = vmatprep.subr.bf16.mxu0 %v5199_v28 }
 0x83a   :  { %5068 = vmatmul.mubr.bf16.gmra.mxu0 %v2028_v61 }
 0x83b   :  { %2598 = vmatpush1.bf16.msra.mxu0 %v5197_v7 }
 0x83c   :  { %2599 = vmatprep.subr.bf16.mxu0 %v5202_v14 }
 0x83f   :  { %2600 = vmatpush1.bf16.msra.mxu0 %v5200_v2 }
 0x840   :  { %2601 = vmatprep.subr.bf16.mxu0 %v5205_v19 }
 0x843   :  { %2602 = vmatpush1.bf16.msra.mxu0 %v5203_v26 }
 0x844   :  { %2603 = vmatprep.subr.bf16.mxu0 %v5208_v30 }
 0x847   :  { %2604 = vmatpush1.bf16.msra.mxu0 %v5206_v13 }
 0x848   :  { %2605 = vmatprep.subr.bf16.mxu0 %v5211_v31 }
 0x84b   :  { %2606 = vmatpush1.bf16.msra.mxu0 %v5209_v32 }
 0x84c   :  { %2607 = vmatprep.subr.bf16.mxu0 %v5214_v12 }
 0x84f   :  { %2608 = vmatpush1.bf16.msra.mxu0 %v5212_v22 }
 0x850   :  { %2609 = vmatprep.subr.bf16.mxu0 %v5217_v11 }
 0x853   :  { %2610 = vmatpush2.bf16.msra.mxu0 %v5215_v33 }
 0x854   :  { %2611 = vmatprep.subr.bf16.mxu0 %v5220_v29 }
 0x857   :  { %2612 = vmatpush2.bf16.msra.mxu0 %v5218_v39 }
 0x858   :  { %2613 = vmatprep.subr.bf16.mxu0 %v5223_v46 }
 0x85b   :  { %2614 = vmatpush2.bf16.msra.mxu0 %v5221_v63 }
 0x85c   :  { %2615 = vmatprep.subr.bf16.mxu0 %v5226_v0 }
 0x85f   :  { %2616 = vmatpush2.bf16.msra.mxu0 %v5224_v53 }
 0x860   :  { %2617 = vmatprep.subr.bf16.mxu0 %v5229_v48 }
 0x863   :  { %2618 = vmatpush2.bf16.msra.mxu0 %v5227_v25 }
 0x864   :  { %2619 = vmatprep.subr.bf16.mxu0 %v5232_v51 }
 0x867   :  { %2620 = vmatpush2.bf16.msra.mxu0 %v5230_v23 }
 0x8f2   :  { %v5065_v35 = vpop.f32.mrf.mxu0 }
 0x8f3   :  { %v6144_v56 = vadd.f32 %v5065_v35, %v4523_v42 }
 0x8f4   :  { %v2136_v36 = vpop.f32.mrf.mxu0 }
 0x8f5   :  { %v6142_v49 = vadd.f32 %v4523_v42, %v2136_v36  ;;  %v2188_v45 = vmul.f32 %v6144_v56, %v6144_v56 }
 0x8f6   :  { %v5066_v43 = vpop.f32.mrf.mxu0 }
 0x8f7   :  { %v2186_v24 = vmul.f32 %v6142_v49, %v6142_v49  ;;  %v6156_v38 = vadd.f32 %v5066_v43, %v4523_v42 }
 0x8f8   :  { %v2139_v50 = vpop.f32.mrf.mxu0 }
 0x8f9   :  { %v6146_v57 = vadd.f32 %v4523_v42, %v2139_v50  ;;  %v2189_v52 = vmul.f32 %v6156_v38, %v6156_v38  ;;  %v4532_v50 = vld [vmem:[%s6974_s26 + $0x7] sm:$0x1] }
 0x8fa   :  { %v5069_v34 = vpop.f32.mrf.mxu0 }
 0x8fb   :  { %v2172_v17 = vadd.f32 %v6146_v57, %v6142_v49  ;;  %v2187_v10 = vmul.f32 %v6146_v57, %v6146_v57  ;;  %v2161_v44 = vadd.f32 %v5069_v34, %v4523_v42 }
 0x8fc   :  { %v2152_v41 = vpop.f32.mrf.mxu0 }
 0x8fd   :  { %v2173_v40 = vadd.f32 %v2172_v17, %v6144_v56  ;;  %v2194_v18 = vadd.f32 %v2187_v10, %v2186_v24  ;;  %v6165_v37 = vadd.f32 %v4523_v42, %v2152_v41  ;;  %v2192_v61 = vmul.f32 %v2161_v44, %v2161_v44 }
 0x8fe   :  { %v5070_v9 = vpop.f32.mrf.mxu0  ;;  %v2258_v24 = vstv %s4534_s29 }
 0x8ff   :  { %v2195_v47 = vadd.f32 %v2194_v18, %v2188_v45  ;;  %v2174_v21 = vadd.f32 %v2173_v40, %v6156_v38  ;;  %v2190_v55 = vmul.f32 %v6165_v37, %v6165_v37  ;;  %v2164_v20 = vadd.f32 %v5070_v9, %v4523_v42  ;;  %v4535_v40 = vld [vmem:[%s6975_s28 + $0x7] ss:$0 sm:$0xff] }
 0x900   :  { %v2155_v60 = vpop.f32.mrf.mxu0 }
 0x901   :  { %v2175_v16 = vadd.f32 %v2174_v21, %v6165_v37  ;;  %v2196_v59 = vadd.f32 %v2195_v47, %v2189_v52  ;;  %v2156_v54 = vadd.f32 %v4523_v42, %v2155_v60  ;;  %v2193_v8 = vmul.f32 %v2164_v20, %v2164_v20 }
 0x903   :  { %v2197_v6 = vadd.f32 %v2196_v59, %v2190_v55  ;;  %v2176_v62 = vadd.f32 %v2175_v16, %v2156_v54  ;;  %v2191_v4 = vmul.f32 %v2156_v54, %v2156_v54 }
 0x905   :  { %v2177_v58 = vadd.f32 %v2176_v62, %v2161_v44  ;;  %v2198_v15 = vadd.f32 %v2197_v6, %v2191_v4 }
 0x907   :  { %v2178_v28 = vadd.f32 %v2177_v58, %v2164_v20  ;;  %v2199_v7 = vadd.f32 %v2198_v15, %v2192_v61 }
 0x909   :  { %v2179_v14 = vrot.slane %v2178_v28, 4  ;;  %v2200_v2 = vadd.f32 %v2199_v7, %v2193_v8 }
 0x90b   :  { %v2180_v19 = vadd.f32 %v2179_v14, %v2178_v28  ;;  %v2201_v26 = vrot.slane %v2200_v2, 4 }
 0x90d   :  { %v2181_v30 = vrot.slane %v2180_v19, 2  ;;  %v2202_v13 = vadd.f32 %v2201_v26, %v2200_v2 }
 0x90f   :  { %v2182_v31 = vadd.f32 %v2181_v30, %v2180_v19  ;;  %v2203_v32 = vrot.slane %v2202_v13, 2 }
 0x911   :  { %v2183_v12 = vrot.slane %v2182_v31, 1  ;;  %v2204_v22 = vadd.f32 %v2203_v32, %v2202_v13 }
 0x913   :  { %v2184_v11 = vadd.f32 %v2183_v12, %v2182_v31  ;;  %v2205_v33 = vrot.slane %v2204_v22, 1 }
 0x915   :  { %v2185_v35 = vmul.f32 0.015625, %v2184_v11  ;;  %v2206_v29 = vadd.f32 %v2205_v33, %v2204_v22  ;;  %v6207_v22 = vld [vmem:[%s6976_s4 + $0x8] sm:$0xff]   ;;  %v6212_v11 = vld [vmem:[%s6976_s4 + $0x10] sm:$0xff]   ;;  %v6221_v33 = vld [vmem:[%s6976_s4 + $0x18] sm:$0xff]  }
 0x917   :  { %v2207_v36 = vmul.f32 0.015625, %v2206_v29  ;;  %v2208_v39 = vmul.f32 %v2185_v35, %v2185_v35  ;;  %v2219_v0 = vsub.f32 %v2156_v54, %v2185_v35  ;;  %v2220_v10 = vsub.f32 %v2161_v44, %v2185_v35  ;;  %v5235_v29 = vld [vmem:[%s6935_s9 + $0x94] ss:$8 sps:$4 sm:$0xff]  }
 0x918   :  { %v2221_v41 = vsub.f32 %v2164_v20, %v2185_v35  ;;  %v2214_v45 = vsub.f32 %v6142_v49, %v2185_v35  ;;  %v2215_v18 = vsub.f32 %v6146_v57, %v2185_v35  ;;  %v2218_v53 = vsub.f32 %v6165_v37, %v2185_v35  ;;  %2621 = vmatprep.subr.bf16.mxu0 %v5235_v29 }
 0x919   :  { %v2209_v42 = vsub.f32 %v2207_v36, %v2208_v39  ;;  %v2216_v9 = vsub.f32 %v6144_v56, %v2185_v35  ;;  %v2217_v48 = vsub.f32 %v6156_v38, %v2185_v35  ;;  %v5233_v35 = vld [vmem:[%s6935_s9 + $0x90] ss:$8 sps:$4 sm:$0xff]   ;;  %v5236_v36 = vld [vmem:[%s6935_s9 + $0x80] ss:$8 sps:$4 sm:$0xff]   ;;  %v5238_v39 = vld [vmem:[%s6935_s9 + $0x84] ss:$8 sps:$4 sm:$0xff]  }
 0x91a   :  { %2622 = vmatpush2.bf16.msra.mxu0 %v5233_v35 }
 0x91b   :  { %v2210_v43 = vmax.f32 %v2209_v42, 0.0  ;;  %2623 = vmatprep.subr.bf16.mxu0 %v5238_v39  ;;  %v5241_v42 = vld [vmem:[%s6937_s11 + $0x174] ss:$8 sps:$4 sm:$0xff]  }
 0x91d   :  { %v2211_v46 = vadd.f32 1e-05, %v2210_v43 }
 0x91e   :  { %2624 = vmatpush2.bf16.msra.mxu0 %v5236_v36 }
 0x91f   :  { %5421 = vrsqrt.f32 %v2211_v46  ;;  %3240 = vmatprep.subr.bf16.mxu0 %v5241_v42 }
 0x92c   :  { %v5422_v63 = vpop.eup %5421 }
 0x92d   :  { %v2213_v34 = vmul.f32 %v5422_v63, %v4532_v50 }
 0x92f   :  { %v2226_v17 = vrot.slane %v2213_v34, %v5710_v3  ;;  %v5239_v34 = vld [vmem:[%s6937_s11 + $0x170] ss:$8 sps:$4 sm:$0xff]  }
 0x931   :  { %v2233_v52 = vmul.f32 %v2226_v17, %v2219_v0  ;;  %v2234_v47 = vmul.f32 %v2226_v17, %v2220_v10  ;;  %v2235_v21 = vmul.f32 %v2226_v17, %v2221_v41  ;;  %v2228_v60 = vmul.f32 %v2226_v17, %v2214_v45  ;;  %v5242_v10 = vld [vmem:[%s6937_s11 + $0x160] ss:$8 sps:$4 sm:$0xff]   ;;  %v5247_v41 = vld [vmem:[%s6937_s11 + $0x154] ss:$8 sps:$4 sm:$0xff]  }
 0x932   :  { %v2229_v44 = vmul.f32 %v2226_v17, %v2215_v18  ;;  %v2232_v16 = vmul.f32 %v2226_v17, %v2218_v53  ;;  %v2230_v55 = vmul.f32 %v2226_v17, %v2216_v9  ;;  %v2231_v49 = vmul.f32 %v2226_v17, %v2217_v48  ;;  %v5250_v53 = vld [vmem:[%s6937_s11 + $0x144] ss:$8 sps:$4 sm:$0xff]   ;;  %v5248_v48 = vld [vmem:[%s6937_s11 + $0x140] ss:$8 sps:$4 sm:$0xff]  }
 0x933   :  { %v2247_v59 = vadd.f32 %v4535_v40, %v2233_v52  ;;  %v2248_v54 = vadd.f32 %v4535_v40, %v2234_v47  ;;  %v2249_v25 = vadd.f32 %v4535_v40, %v2235_v21  ;;  %v2242_v51 = vadd.f32 %v4535_v40, %v2228_v60  ;;  %v5253_v52 = vld [vmem:[%s6937_s11 + $0x134] ss:$8 sps:$4 sm:$0xff]   ;;  %v5251_v21 = vld [vmem:[%s6937_s11 + $0x130] ss:$8 sps:$4 sm:$0xff]  }
 0x934   :  { %v2243_v6 = vadd.f32 %v4535_v40, %v2229_v44  ;;  %v2246_v57 = vadd.f32 %v4535_v40, %v2232_v16  ;;  %v2244_v20 = vadd.f32 %v4535_v40, %v2230_v55  ;;  %v2245_v37 = vadd.f32 %v4535_v40, %v2231_v49  ;;  %v5245_v40 = vld [vmem:[%s6937_s11 + $0x150] ss:$8 sps:$4 sm:$0xff]   ;;  %v5256_v44 = vld [vmem:[%s6937_s11 + $0x124] ss:$8 sps:$4 sm:$0xff]   ;;  %v5254_v16 = vld [vmem:[%s6937_s11 + $0x120] ss:$8 sps:$4 sm:$0xff]  }
 0x935   :  { %vm2256_vm11 = vcmp.ge.f32.partialorder %v2248_v54, 0.0  ;;  %vm2257_vm12 = vcmp.ge.f32.partialorder %v2249_v25, 0.0  ;;  %v2265_v56 = vmul.f32 %v2258_v24, %v2248_v54  ;;  %v2266_v38 = vmul.f32 %v2258_v24, %v2249_v25  ;;  %v5259_v55 = vld [vmem:[%s6937_s11 + $0x114] ss:$8 sps:$4 sm:$0xff]   ;;  %v5257_v49 = vld [vmem:[%s6937_s11 + $0x110] ss:$8 sps:$4 sm:$0xff]  }
 0x936   :  { %vm2250_vm13 = vcmp.ge.f32.partialorder %v2242_v51, 0.0  ;;  %vm2251_vm14 = vcmp.ge.f32.partialorder %v2243_v6, 0.0  ;;  %v2259_v62 = vmul.f32 %v2258_v24, %v2242_v51  ;;  %v2260_v4 = vmul.f32 %v2258_v24, %v2243_v6 }
 0x937   :  { %v2273_v61 = vsel %vm2256_vm11, %v2248_v54, %v2265_v56  ;;  %v2274_v58 = vsel %vm2257_vm12, %v2249_v25, %v2266_v38  ;;  %vm2254_vm15 = vcmp.ge.f32.partialorder %v2246_v57, 0.0  ;;  %vm2255_vm0 = vcmp.ge.f32.partialorder %v2247_v59, 0.0  ;;  %v5262_v54 = vld [vmem:[%s6937_s11 + $0x104] ss:$8 sps:$4 sm:$0xff]   ;;  %v5260_v25 = vld [vmem:[%s6937_s11 + $0x100] ss:$8 sps:$4 sm:$0xff]  }
 0x938   :  { %v6200_v15 = vpack.c.bf16 %v2274_v58, %v2273_v61  ;;  %v2267_v23 = vsel %vm2250_vm13, %v2242_v51, %v2259_v62  ;;  %v2268_v8 = vsel %vm2251_vm14, %v2243_v6, %v2260_v4  ;;  %v2263_v28 = vmul.f32 %v2258_v24, %v2246_v57  ;;  %v5265_v51 = vld [vmem:[%s6937_s11 + $0x1f4] ss:$8 sps:$4 sm:$0xff]   ;;  %v5263_v6 = vld [vmem:[%s6937_s11 + $0x1f0] ss:$8 sps:$4 sm:$0xff]   ;;  %v5274_v38 = vld [vmem:[%s6937_s11 + $0x1c4] ss:$8 sps:$4 sm:$0xff]  }
 0x939   :  { %v2275_v7 = vpack.c.bf16 %v2268_v8, %v2267_v23  ;;  %v2264_v14 = vmul.f32 %v2258_v24, %v2247_v59  ;;  %vm2252_vm1 = vcmp.ge.f32.partialorder %v2244_v20, 0.0  ;;  %vm2253_vm2 = vcmp.ge.f32.partialorder %v2245_v37, 0.0  ;;  %v5269_v56 = vld [vmem:[%s6937_s11 + $0x1d0] ss:$8 sps:$4 sm:$0xff]   ;;  %v5272_v62 = vld [vmem:[%s6937_s11 + $0x1c0] ss:$8 sps:$4 sm:$0xff]  }
 0x93a   :  { %5071 = vmatprep.subr.bf16.mxu1 %v6200_v15  ;;  %v2271_v2 = vsel %vm2254_vm15, %v2246_v57, %v2263_v28  ;;  %v2261_v19 = vmul.f32 %v2258_v24, %v2244_v20  ;;  %v2262_v26 = vmul.f32 %v2258_v24, %v2245_v37  ;;  %v5244_v24 = vld [vmem:[%s6937_s11 + $0x164] ss:$8 sps:$4 sm:$0xff]   ;;  %v5277_v4 = vld [vmem:[%s6937_s11 + $0x1b4] ss:$8 sps:$4 sm:$0xff]   ;;  %v5275_v61 = vld [vmem:[%s6937_s11 + $0x1b0] ss:$8 sps:$4 sm:$0xff]  }
 0x93b   :  { %2625 = vmatprep.mubr.bf16.mxu0 %v2275_v7  ;;  %5072 = vmatpush3.bf16.msra.mxu1 %v6200_v15  ;;  %v2272_v30 = vsel %vm2255_vm0, %v2247_v59, %v2264_v14  ;;  %v5268_v57 = vld [vmem:[%s6937_s11 + $0x1e4] ss:$8 sps:$4 sm:$0xff]   ;;  %v5278_v58 = vld [vmem:[%s6937_s11 + $0x1a0] ss:$8 sps:$4 sm:$0xff]   ;;  %v5283_v23 = vld [vmem:[%s6937_s11 + $0x194] ss:$8 sps:$4 sm:$0xff]  }
 0x93c   :  { %v2277_v13 = vpack.c.bf16 %v2272_v30, %v2271_v2  ;;  %v2269_v31 = vsel %vm2252_vm1, %v2244_v20, %v2261_v19  ;;  %v2270_v32 = vsel %vm2253_vm2, %v2245_v37, %v2262_v26  ;;  %v5266_v20 = vld [vmem:[%s6937_s11 + $0x1e0] ss:$8 sps:$4 sm:$0xff]   ;;  %v5271_v37 = vld [vmem:[%s6937_s11 + $0x1d4] ss:$8 sps:$4 sm:$0xff]   ;;  %v5281_v8 = vld [vmem:[%s6937_s11 + $0x190] ss:$8 sps:$4 sm:$0xff]  }
 0x93d   :  { %v2276_v12 = vpack.c.bf16 %v2270_v32, %v2269_v31  ;;  %v5284_v28 = vld [vmem:[%s6937_s11 + $0x180] ss:$8 sps:$4 sm:$0xff]   ;;  %v6336_v14 = vsub.s32 1, %v5704_v1 }
 0x93e   :  { %5073 = vmatprep.subr.bf16.mxu1 %v2277_v13  ;;  %v2421_v2 = vld [vmem:[%s6936_s10] sm:$0x3] }
 0x93f   :  { %5074 = vmatpush3.bf16.msra.mxu1 %v2277_v13  ;;  %v2430_v26 = vrot.slane %v2421_v2, %v6336_v14  ;;  %v2426_v30 = vrot.slane %v2421_v2, %v5710_v3 }
 0x940   :  { %5075 = vmatprep.subr.bf16.mxu1 %v2276_v12 }
 0x943   :  { %5076 = vmatpush3.bf16.msra.mxu1 %v2276_v12 }
 0x944   :  { %5077 = vmatprep.subr.bf16.mxu1 %v2275_v7 }
 0x947   :  { %5078 = vmatpush3.bf16.msra.mxu1 %v2275_v7  ;;  %v5286_v7 = vld [vmem:[%s6937_s11 + $0x184] ss:$8 sps:$4 sm:$0xff]  }
 0x94a   :  { %5080 = vmatmul.mubr.msk.bf16.vlgmr.msra.gmra.mxu1 %vm2307_vm10, %v6207_v22 }
 0x94b   :  { %5083 = vmatprep.mubr.msk.bf16.mxu1 %vm2307_vm10, %v6212_v11 }
 0x952   :  { %5084 = vmatmul.mubr.msk.bf16.gmra.mxu1 %vm2307_vm10, %v6221_v33 }
 0x953   :  { %2722 = vmatprep.mubr.bf16.mxu1 %v5444_v5 }
 0xa0a   :  { %v5081_v43 = vpop.f32.mrf.mxu1 }
 0xa0c   :  { %v2354_v46 = vpop.f32.mrf.mxu1 }
 0xa0e   :  { %v5082_v50 = vpop.f32.mrf.mxu1 }
 0xa0f   :  { %v2386_v18 = vpack.c.bf16 %v5082_v50, %v5081_v43 }
 0xa10   :  { %v2357_v63 = vpop.f32.mrf.mxu1 }
 0xa11   :  { %v2385_v0 = vpack.c.bf16 %v2357_v63, %v2354_v46 }
 0xa12   :  { %v5085_v17 = vpop.f32.mrf.mxu1 }
 0xa13   :  { %2626 = vmatmul.mubr.bf16.vlgmr.msra.gmra.mxu0 %v2385_v0 }
 0xa14   :  { %2635 = vmatprep.mubr.bf16.mxu0 %v2276_v12  ;;  %3241 = vmatpush1.bf16.msra.mxu0 %v5239_v34  ;;  %v2370_v45 = vpop.f32.mrf.mxu1 }
 0xa15   :  { %3242 = vmatprep.subr.bf16.mxu0 %v5244_v24 }
 0xa16   :  { %v5086_v9 = vpop.f32.mrf.mxu1 }
 0xa17   :  { %v2388_v59 = vpack.c.bf16 %v5086_v9, %v5085_v17 }
 0xa18   :  { %3243 = vmatpush1.bf16.msra.mxu0 %v5242_v10  ;;  %v2373_v47 = vpop.f32.mrf.mxu1 }
 0xa19   :  { %3244 = vmatprep.subr.bf16.mxu0 %v5247_v41  ;;  %v2387_v60 = vpack.c.bf16 %v2373_v47, %v2370_v45 }
 0xa1b   :  { %2636 = vmatmul.mubr.bf16.gmra.mxu0 %v2386_v18 }
 0xa1c   :  { %2645 = vmatprep.mubr.bf16.mxu0 %v2277_v13  ;;  %3245 = vmatpush1.bf16.msra.mxu0 %v5245_v40 }
 0xa1d   :  { %3246 = vmatprep.subr.bf16.mxu0 %v5250_v53 }
 0xa20   :  { %3247 = vmatpush1.bf16.msra.mxu0 %v5248_v48 }
 0xa21   :  { %3248 = vmatprep.subr.bf16.mxu0 %v5253_v52 }
 0xa23   :  { %2646 = vmatmul.mubr.bf16.gmra.mxu0 %v2387_v60 }
 0xa24   :  { %2655 = vmatprep.mubr.bf16.mxu0 %v6200_v15  ;;  %3249 = vmatpush1.bf16.msra.mxu0 %v5251_v21  ;;  %v5280_v15 = vld [vmem:[%s6937_s11 + $0x1a4] ss:$8 sps:$4 sm:$0xff]  }
 0xa25   :  { %3250 = vmatprep.subr.bf16.mxu0 %v5256_v44 }
 0xa28   :  { %3251 = vmatpush1.bf16.msra.mxu0 %v5254_v16 }
 0xa29   :  { %3252 = vmatprep.subr.bf16.mxu0 %v5259_v55 }
 0xa2b   :  { %2656 = vmatmul.mubr.bf16.gmra.mxu0 %v2388_v59 }
 0xa2c   :  { %3253 = vmatpush1.bf16.msra.mxu0 %v5257_v49 }
 0xa2d   :  { %3254 = vmatprep.subr.bf16.mxu0 %v5262_v54 }
 0xa30   :  { %3255 = vmatpush1.bf16.msra.mxu0 %v5260_v25 }
 0xa31   :  { %3256 = vmatprep.subr.bf16.mxu0 %v5265_v51 }
 0xa34   :  { %3257 = vmatpush2.bf16.msra.mxu0 %v5263_v6 }
 0xa35   :  { %3258 = vmatprep.subr.bf16.mxu0 %v5268_v57 }
 0xa38   :  { %3259 = vmatpush2.bf16.msra.mxu0 %v5266_v20 }
 0xa39   :  { %3260 = vmatprep.subr.bf16.mxu0 %v5271_v37 }
 0xa3c   :  { %3261 = vmatpush2.bf16.msra.mxu0 %v5269_v56 }
 0xa3d   :  { %3262 = vmatprep.subr.bf16.mxu0 %v5274_v38 }
 0xa40   :  { %3263 = vmatpush2.bf16.msra.mxu0 %v5272_v62 }
 0xa41   :  { %3264 = vmatprep.subr.bf16.mxu0 %v5277_v4 }
 0xa44   :  { %3265 = vmatpush2.bf16.msra.mxu0 %v5275_v61 }
 0xa45   :  { %3266 = vmatprep.subr.bf16.mxu0 %v5280_v15 }
 0xa48   :  { %3267 = vmatpush2.bf16.msra.mxu0 %v5278_v58 }
 0xa49   :  { %3268 = vmatprep.subr.bf16.mxu0 %v5283_v23 }
 0xa4c   :  { %3269 = vmatpush2.bf16.msra.mxu0 %v5281_v8 }
 0xa4d   :  { %3270 = vmatprep.subr.bf16.mxu0 %v5286_v7 }
 0xa50   :  { %3271 = vmatpush2.bf16.msra.mxu0 %v5284_v28 }
 0xad3   :  { %v2627_v19 = vpop.f32.mrf.mxu0 }
 0xad4   :  { %v2628_v35 = vadd.f32 %v2627_v19, %v2426_v30 }
 0xad5   :  { %v2629_v13 = vpop.f32.mrf.mxu0 }
 0xad6   :  { %v2630_v32 = vadd.f32 %v2629_v13, %v2430_v26  ;;  %v2666_v50 = vmax.f32 %v2628_v35, 0.0  ;;  %v5293_v35 = vld [vmem:[%s6937_s11 + $0x50] ss:$8 sps:$4 sm:$0xff]  }
 0xad7   :  { %v2631_v31 = vpop.f32.mrf.mxu0 }
 0xad8   :  { %v2632_v12 = vadd.f32 %v2631_v31, %v2426_v30  ;;  %v2667_v43 = vmax.f32 %v2630_v32, 0.0  ;;  %v5292_v31 = vld [vmem:[%s6937_s11 + $0x64] ss:$8 sps:$4 sm:$0xff]   ;;  %v5290_v32 = vld [vmem:[%s6937_s11 + $0x60] ss:$8 sps:$4 sm:$0xff]  }
 0xad9   :  { %v2633_v29 = vpop.f32.mrf.mxu0 }
 0xada   :  { %v2634_v36 = vadd.f32 %v2633_v29, %v2430_v26  ;;  %v2668_v39 = vmax.f32 %v2632_v12, 0.0  ;;  %v5295_v12 = vld [vmem:[%s6937_s11 + $0x54] ss:$8 sps:$4 sm:$0xff]   ;;  %v5296_v29 = vld [vmem:[%s6937_s11 + $0x40] ss:$8 sps:$4 sm:$0xff]  }
 0xadb   :  { %v2637_v42 = vpop.f32.mrf.mxu0 }
 0xadc   :  { %v2669_v46 = vmax.f32 %v2634_v36, 0.0  ;;  %v2682_v0 = vpack.c.bf16 %v2668_v39, %v2666_v50  ;;  %v2638_v41 = vadd.f32 %v2637_v42, %v2426_v30  ;;  %v5301_v36 = vld [vmem:[%s6937_s11 + $0x34] ss:$8 sps:$4 sm:$0xff]   ;;  %v5302_v39 = vld [vmem:[%s6937_s11 + $0x20] ss:$8 sps:$4 sm:$0xff]  }
 0xadd   :  { %v2639_v63 = vpop.f32.mrf.mxu0  ;;  %v5308_v42 = vld [vmem:[%s6937_s11] ss:$8 sps:$4 sm:$0xff]   ;;  %v5313_v50 = vld [vmem:[%s6937_s11 + $0xf4] ss:$8 sps:$4 sm:$0xff]  }
 0xade   :  { %v2683_v34 = vpack.c.bf16 %v2669_v46, %v2667_v43  ;;  %v2640_v17 = vadd.f32 %v2639_v63, %v2430_v26  ;;  %v2670_v52 = vmax.f32 %v2638_v41, 0.0  ;;  %v5310_v43 = vld [vmem:[%s6937_s11 + $0x4] ss:$8 sps:$4 sm:$0xff]   ;;  %v5311_v46 = vld [vmem:[%s6937_s11 + $0xf0] ss:$8 sps:$4 sm:$0xff]  }
 0xadf   :  { %v2641_v24 = vpop.f32.mrf.mxu0  ;;  %v5314_v63 = vld [vmem:[%s6937_s11 + $0xe0] ss:$8 sps:$4 sm:$0xff]   ;;  %v5325_v41 = vld [vmem:[%s6937_s11 + $0xb4] ss:$8 sps:$4 sm:$0xff]  }
 0xae0   :  { %v2642_v10 = vadd.f32 %v2641_v24, %v2426_v30  ;;  %3272 = vmatprep.mubr.bf16.mxu0 %v2683_v34  ;;  %v2671_v9 = vmax.f32 %v2640_v17, 0.0  ;;  %v5319_v24 = vld [vmem:[%s6937_s11 + $0xd4] ss:$8 sps:$4 sm:$0xff]   ;;  %v5320_v17 = vld [vmem:[%s6937_s11 + $0xc0] ss:$8 sps:$4 sm:$0xff]  }
 0xae1   :  { %v2643_v45 = vpop.f32.mrf.mxu0  ;;  %3273 = vmatmul.mubr.bf16.vlgmr.msra.gmra.mxu0 %v2682_v0 }
 0xae2   :  { %v2644_v40 = vadd.f32 %v2643_v45, %v2430_v26  ;;  %v2672_v18 = vmax.f32 %v2642_v10, 0.0  ;;  %v5322_v10 = vld [vmem:[%s6937_s11 + $0xc4] ss:$8 sps:$4 sm:$0xff]   ;;  %v5323_v45 = vld [vmem:[%s6937_s11 + $0xb0] ss:$8 sps:$4 sm:$0xff]  }
 0xae3   :  { %v2647_v53 = vpop.f32.mrf.mxu0 }
 0xae4   :  { %v2673_v48 = vmax.f32 %v2644_v40, 0.0  ;;  %v2684_v60 = vpack.c.bf16 %v2672_v18, %v2670_v52  ;;  %v2648_v49 = vadd.f32 %v2647_v53, %v2426_v30  ;;  %v5328_v40 = vld [vmem:[%s6937_s11 + $0xa4] ss:$8 sps:$4 sm:$0xff]   ;;  %v5326_v18 = vld [vmem:[%s6937_s11 + $0xa0] ss:$8 sps:$4 sm:$0xff]  }
 0xae5   :  { %v2649_v47 = vpop.f32.mrf.mxu0  ;;  %v5329_v53 = vld [vmem:[%s6937_s11 + $0x90] ss:$8 sps:$4 sm:$0xff]   ;;  %v5334_v52 = vld [vmem:[%s6937_s11 + $0x84] ss:$8 sps:$4 sm:$0xff]  }
 0xae6   :  { %v2685_v21 = vpack.c.bf16 %v2673_v48, %v2671_v9  ;;  %v2650_v16 = vadd.f32 %v2649_v47, %v2430_v26  ;;  %v2674_v20 = vmax.f32 %v2648_v49, 0.0  ;;  %v5331_v9 = vld [vmem:[%s6937_s11 + $0x94] ss:$8 sps:$4 sm:$0xff]   ;;  %v5332_v48 = vld [vmem:[%s6937_s11 + $0x80] ss:$8 sps:$4 sm:$0xff]  }
 0xae7   :  { %v2651_v44 = vpop.f32.mrf.mxu0  ;;  %v5337_v47 = vld [vmem:[%s6939_s13 + $0x74] ss:$8 sps:$4 sm:$0xff]   ;;  %v5335_v49 = vld [vmem:[%s6939_s13 + $0x70] ss:$8 sps:$4 sm:$0xff]  }
 0xae8   :  { %v2652_v55 = vadd.f32 %v2651_v44, %v2426_v30  ;;  %3282 = vmatprep.mubr.bf16.mxu0 %v2685_v21  ;;  %v2675_v6 = vmax.f32 %v2650_v16, 0.0 }
 0xae9   :  { %v2653_v59 = vpop.f32.mrf.mxu0  ;;  %3283 = vmatmul.mubr.bf16.gmra.mxu0 %v2684_v60 }
 0xaea   :  { %v2654_v54 = vadd.f32 %v2653_v59, %v2430_v26  ;;  %v2676_v25 = vmax.f32 %v2652_v55, 0.0 }
 0xaeb   :  { %v2657_v51 = vpop.f32.mrf.mxu0 }
 0xaec   :  { %v2677_v57 = vmax.f32 %v2654_v54, 0.0  ;;  %v2686_v38 = vpack.c.bf16 %v2676_v25, %v2674_v20  ;;  %v2658_v58 = vadd.f32 %v2657_v51, %v2426_v30  ;;  %v5340_v25 = vld [vmem:[%s6939_s13 + $0x64] ss:$8 sps:$4 sm:$0xff]   ;;  %v5343_v20 = vld [vmem:[%s6939_s13 + $0x54] ss:$8 sps:$4 sm:$0xff]  }
 0xaed   :  { %v2659_v37 = vpop.f32.mrf.mxu0 }
 0xaee   :  { %v2687_v56 = vpack.c.bf16 %v2677_v57, %v2675_v6  ;;  %v2660_v4 = vadd.f32 %v2659_v37, %v2430_v26  ;;  %v2678_v2 = vmax.f32 %v2658_v58, 0.0  ;;  %v5338_v6 = vld [vmem:[%s6939_s13 + $0x60] ss:$8 sps:$4 sm:$0xff]  }
 0xaef   :  { %v2661_v62 = vpop.f32.mrf.mxu0 }
 0xaf0   :  { %v2662_v61 = vadd.f32 %v2661_v62, %v2426_v30  ;;  %3292 = vmatprep.mubr.bf16.mxu0 %v2687_v56  ;;  %v2679_v28 = vmax.f32 %v2660_v4, 0.0  ;;  %v5289_v30 = vld [vmem:[%s6937_s11 + $0x74] ss:$8 sps:$4 sm:$0xff]  }
 0xaf1   :  { %v2663_v15 = vpop.f32.mrf.mxu0  ;;  %3293 = vmatmul.mubr.bf16.gmra.mxu0 %v2686_v38 }
 0xaf2   :  { %v2664_v23 = vadd.f32 %v2663_v15, %v2430_v26  ;;  %v2680_v8 = vmax.f32 %v2662_v61, 0.0  ;;  %v5287_v26 = vld [vmem:[%s6937_s11 + $0x70] ss:$8 sps:$4 sm:$0xff]   ;;  %v5346_v61 = vld [vmem:[%s6939_s13 + $0x44] ss:$8 sps:$4 sm:$0xff]  }
 0xaf3   :  { %v5344_v15 = vld [vmem:[%s6939_s13 + $0x40] ss:$8 sps:$4 sm:$0xff]  }
 0xaf4   :  { %v2681_v7 = vmax.f32 %v2664_v23, 0.0  ;;  %v2688_v13 = vpack.c.bf16 %v2680_v8, %v2678_v2  ;;  %v5349_v8 = vld [vmem:[%s6939_s13 + $0x34] ss:$8 sps:$4 sm:$0xff]   ;;  %v5347_v2 = vld [vmem:[%s6939_s13 + $0x30] ss:$8 sps:$4 sm:$0xff]  }
 0xaf6   :  { %v2689_v19 = vpack.c.bf16 %v2681_v7, %v2679_v28 }
 0xaf8   :  { %2698 = vmatprep.subr.bf16.mxu1 %v2689_v19  ;;  %3302 = vmatprep.mubr.bf16.mxu0 %v2689_v19 }
 0xaf9   :  { %2699 = vmatpush1.bf16.msra.mxu1 %v2688_v13  ;;  %3303 = vmatmul.mubr.bf16.gmra.mxu0 %v2688_v13 }
 0xafa   :  { %2700 = vmatprep.subr.bf16.mxu1 %v2687_v56 }
 0xafd   :  { %2701 = vmatpush1.bf16.msra.mxu1 %v2686_v38  ;;  %v5341_v38 = vld [vmem:[%s6939_s13 + $0x50] ss:$8 sps:$4 sm:$0xff]  }
 0xafe   :  { %2702 = vmatprep.subr.bf16.mxu1 %v2685_v21 }
 0xb01   :  { %2703 = vmatpush1.bf16.msra.mxu1 %v2684_v60 }
 0xb02   :  { %2704 = vmatprep.subr.bf16.mxu1 %v2683_v34  ;;  %v5316_v34 = vld [vmem:[%s6937_s11 + $0xe4] ss:$8 sps:$4 sm:$0xff]  }
 0xb05   :  { %2705 = vmatpush1.bf16.msra.mxu1 %v2682_v0  ;;  %v5317_v0 = vld [vmem:[%s6937_s11 + $0xd0] ss:$8 sps:$4 sm:$0xff]  }
 0xb06   :  { %3167 = vmatprep.subr.bf16.mxu1 %v5289_v30  ;;  %v5352_v30 = vld [vmem:[%s6939_s13 + $0x24] ss:$8 sps:$4 sm:$0xff]  }
 0xb08   :  { %4576 = vmatmul.mubr.msk.bf16.vlgmr.msra.gmra.mxu1 %vm2307_vm10, %v6072_v27  ;;  %v5298_v27 = vld [vmem:[%s6937_s11 + $0x44] ss:$8 sps:$4 sm:$0xff]  }
 0xb09   :  { %2732 = vmatprep.mubr.bf16.mxu1 %v5444_v5  ;;  %3168 = vmatpush1.bf16.msra.mxu1 %v5287_v26 }
 0xb0a   :  { %3169 = vmatprep.subr.bf16.mxu1 %v5292_v31  ;;  %v5350_v31 = vld [vmem:[%s6939_s13 + $0x20] ss:$8 sps:$4 sm:$0xff]  }
 0xb0d   :  { %3170 = vmatpush1.bf16.msra.mxu1 %v5290_v32 }
 0xb0e   :  { %3171 = vmatprep.subr.bf16.mxu1 %v5295_v12  ;;  %v5355_v12 = vld [vmem:[%s6939_s13 + $0x14] ss:$8 sps:$4 sm:$0xff]  }
 0xb10   :  { %4577 = vmatmul.mubr.msk.bf16.gmra.mxu1 %vm2307_vm10, %v6207_v22  ;;  %v5299_v22 = vld [vmem:[%s6937_s11 + $0x30] ss:$8 sps:$4 sm:$0xff]  }
 0xb11   :  { %2742 = vmatprep.mubr.bf16.mxu1 %v5444_v5  ;;  %3172 = vmatpush1.bf16.msra.mxu1 %v5293_v35 }
 0xb12   :  { %3173 = vmatprep.subr.bf16.mxu1 %v5298_v27 }
 0xb15   :  { %3174 = vmatpush1.bf16.msra.mxu1 %v5296_v29  ;;  %v5353_v29 = vld [vmem:[%s6939_s13 + $0x10] ss:$8 sps:$4 sm:$0xff]  }
 0xb16   :  { %3175 = vmatprep.subr.bf16.mxu1 %v5301_v36  ;;  %v5358_v36 = vld [vmem:[%s6939_s13 + $0x4] ss:$8 sps:$4 sm:$0xff]  }
 0xb18   :  { %4578 = vmatmul.mubr.msk.bf16.gmra.mxu1 %vm2307_vm10, %v6212_v11  ;;  %v5305_v11 = vld [vmem:[%s6937_s11 + $0x10] ss:$8 sps:$4 sm:$0xff]  }
 0xb19   :  { %2752 = vmatprep.mubr.bf16.mxu1 %v5444_v5  ;;  %3176 = vmatpush1.bf16.msra.mxu1 %v5299_v22  ;;  %v5304_v5 = vld [vmem:[%s6937_s11 + $0x24] ss:$8 sps:$4 sm:$0xff]  }
 0xb1a   :  { %3177 = vmatprep.subr.bf16.mxu1 %v5304_v5  ;;  %v5361_v5 = vld [vmem:[%s6939_s13 + $0xf4] ss:$8 sps:$4 sm:$0xff]  }
 0xb1d   :  { %3178 = vmatpush1.bf16.msra.mxu1 %v5302_v39  ;;  %v5356_v39 = vld [vmem:[%s6939_s13] ss:$8 sps:$4 sm:$0xff]  }
 0xb20   :  { %4579 = vmatmul.mubr.msk.bf16.gmra.mxu1 %vm2307_vm10, %v6221_v33  ;;  %v5307_v33 = vld [vmem:[%s6937_s11 + $0x14] ss:$8 sps:$4 sm:$0xff]  }
 0xb21   :  { %3179 = vmatprep.subr.bf16.mxu1 %v5307_v33  ;;  %v5364_v33 = vld [vmem:[%s6939_s13 + $0xe4] ss:$8 sps:$4 sm:$0xff]  }
 0xb22   :  { %3180 = vmatpush1.bf16.msra.mxu1 %v5305_v11  ;;  %v5359_v11 = vld [vmem:[%s6939_s13 + $0xf0] ss:$8 sps:$4 sm:$0xff]  }
 0xb23   :  { %3181 = vmatprep.subr.bf16.mxu1 %v5310_v43  ;;  %v5367_v43 = vld [vmem:[%s6939_s13 + $0xd4] ss:$8 sps:$4 sm:$0xff]  }
 0xb26   :  { %3182 = vmatpush1.bf16.msra.mxu1 %v5308_v42  ;;  %v5362_v42 = vld [vmem:[%s6939_s13 + $0xe0] ss:$8 sps:$4 sm:$0xff]  }
 0xb27   :  { %3183 = vmatprep.subr.bf16.mxu1 %v5313_v50  ;;  %v5370_v50 = vld [vmem:[%s6939_s13 + $0xc4] ss:$8 sps:$4 sm:$0xff]  }
 0xb2a   :  { %3184 = vmatpush2.bf16.msra.mxu1 %v5311_v46  ;;  %v5365_v46 = vld [vmem:[%s6939_s13 + $0xd0] ss:$8 sps:$4 sm:$0xff]  }
 0xb2b   :  { %3185 = vmatprep.subr.bf16.mxu1 %v5316_v34  ;;  %v5373_v34 = vld [vmem:[%s6939_s13 + $0xb4] ss:$8 sps:$4 sm:$0xff]  }
 0xb2e   :  { %3186 = vmatpush2.bf16.msra.mxu1 %v5314_v63  ;;  %v5368_v63 = vld [vmem:[%s6939_s13 + $0xc0] ss:$8 sps:$4 sm:$0xff]  }
 0xb2f   :  { %3187 = vmatprep.subr.bf16.mxu1 %v5319_v24  ;;  %v5376_v24 = vld [vmem:[%s6939_s13 + $0xa4] ss:$8 sps:$4 sm:$0xff]  }
 0xb32   :  { %3188 = vmatpush2.bf16.msra.mxu1 %v5317_v0  ;;  %v5371_v0 = vld [vmem:[%s6939_s13 + $0xb0] ss:$8 sps:$4 sm:$0xff]  }
 0xb33   :  { %3189 = vmatprep.subr.bf16.mxu1 %v5322_v10  ;;  %v5379_v10 = vld [vmem:[%s6939_s13 + $0x94] ss:$8 sps:$4 sm:$0xff]  }
 0xb36   :  { %3190 = vmatpush2.bf16.msra.mxu1 %v5320_v17  ;;  %v5374_v17 = vld [vmem:[%s6939_s13 + $0xa0] ss:$8 sps:$4 sm:$0xff]  }
 0xb37   :  { %3191 = vmatprep.subr.bf16.mxu1 %v5325_v41  ;;  %v5377_v41 = vld [vmem:[%s6939_s13 + $0x90] ss:$8 sps:$4 sm:$0xff]  }
 0xb3a   :  { %3192 = vmatpush2.bf16.msra.mxu1 %v5323_v45  ;;  %v5382_v45 = vld [vmem:[%s6939_s13 + $0x84] ss:$8 sps:$4 sm:$0xff]  }
 0xb3b   :  { %3193 = vmatprep.subr.bf16.mxu1 %v5328_v40  ;;  %v5380_v40 = vld [vmem:[%s6939_s13 + $0x80] ss:$8 sps:$4 sm:$0xff]  }
 0xb3e   :  { %3194 = vmatpush2.bf16.msra.mxu1 %v5326_v18 }
 0xb3f   :  { %3195 = vmatprep.subr.bf16.mxu1 %v5331_v9 }
 0xb42   :  { %3196 = vmatpush2.bf16.msra.mxu1 %v5329_v53 }
 0xb43   :  { %3197 = vmatprep.subr.bf16.mxu1 %v5334_v52 }
 0xb46   :  { %3198 = vmatpush2.bf16.msra.mxu1 %v5332_v48 }
 0xb47   :  { %3541 = vmatprep.subr.bf16.mxu1 %v5337_v47 }
 0xba1   :  { %v3274_v18 = vpop.f32.mrf.mxu0 }
 0xba3   :  { %v3276_v53 = vpop.f32.mrf.mxu0 }
 0xba5   :  { %v3278_v9 = vpop.f32.mrf.mxu0 }
 0xba7   :  { %v3280_v48 = vpop.f32.mrf.mxu0 }
 0xba9   :  { %v3284_v52 = vpop.f32.mrf.mxu0 }
 0xbab   :  { %v3286_v47 = vpop.f32.mrf.mxu0 }
 0xbc8   :  { %v2724_v21 = vpop.f32.mrf.mxu1 }
 0xbca   :  { %v2726_v60 = vpop.f32.mrf.mxu1 }
 0xbcc   :  { %v2728_v44 = vpop.f32.mrf.mxu1 }
 0xbcd   :  { %v2763_v59 = vpack.c.bf16 %v2728_v44, %v2724_v21  ;;  %v3288_v21 = vpop.f32.mrf.mxu0 }
 0xbce   :  { %v2730_v16 = vpop.f32.mrf.mxu1 }
 0xbcf   :  { %v2764_v55 = vpack.c.bf16 %v2730_v16, %v2726_v60  ;;  %v2835_v60 = vld [vmem:[%s6938_s12] sm:$0x3]  ;;  %v3290_v16 = vpop.f32.mrf.mxu0 }
 0xbd0   :  { %v2734_v54 = vpop.f32.mrf.mxu1  ;;  %v6550_v44 = vrot.slane %v2835_v60, %v6336_v14 }
 0xbd1   :  { %3199 = vmatprep.mubr.bf16.mxu1 %v2764_v55  ;;  %v6553_v55 = vrot.slane %v2835_v60, %v5710_v3 }
 0xbd2   :  { %v2736_v51 = vpop.f32.mrf.mxu1  ;;  %3200 = vmatmul.mubr.bf16.vlgmr.msra.gmra.mxu1 %v2763_v59 }
 0xbd3   :  { %3542 = vmatpush1.bf16.msra.mxu1 %v5335_v49 }
 0xbd4   :  { %v2738_v57 = vpop.f32.mrf.mxu1  ;;  %3543 = vmatprep.subr.bf16.mxu1 %v5340_v25  ;;  %v3294_v25 = vpop.f32.mrf.mxu0 }
 0xbd5   :  { %v2765_v62 = vpack.c.bf16 %v2738_v57, %v2734_v54 }
 0xbd6   :  { %v2740_v37 = vpop.f32.mrf.mxu1 }
 0xbd7   :  { %v2766_v56 = vpack.c.bf16 %v2740_v37, %v2736_v51  ;;  %3544 = vmatpush1.bf16.msra.mxu1 %v5338_v6 }
 0xbd8   :  { %v2744_v4 = vpop.f32.mrf.mxu1  ;;  %3545 = vmatprep.subr.bf16.mxu1 %v5343_v20 }
 0xbd9   :  { %3209 = vmatprep.mubr.bf16.mxu1 %v2766_v56 }
 0xbda   :  { %v2746_v58 = vpop.f32.mrf.mxu1  ;;  %3210 = vmatmul.mubr.bf16.gmra.mxu1 %v2765_v62  ;;  %v3296_v62 = vpop.f32.mrf.mxu0 }
 0xbdb   :  { %3546 = vmatpush1.bf16.msra.mxu1 %v5341_v38 }
 0xbdc   :  { %v2748_v23 = vpop.f32.mrf.mxu1  ;;  %3547 = vmatprep.subr.bf16.mxu1 %v5346_v61 }
 0xbdd   :  { %v2767_v19 = vpack.c.bf16 %v2748_v23, %v2744_v4 }
 0xbde   :  { %v2750_v28 = vpop.f32.mrf.mxu1 }
 0xbdf   :  { %v2768_v7 = vpack.c.bf16 %v2750_v28, %v2746_v58  ;;  %3548 = vmatpush1.bf16.msra.mxu1 %v5344_v15 }
 0xbe0   :  { %v2754_v13 = vpop.f32.mrf.mxu1  ;;  %3549 = vmatprep.subr.bf16.mxu1 %v5349_v8 }
 0xbe1   :  { %3219 = vmatprep.mubr.bf16.mxu1 %v2768_v7 }
 0xbe2   :  { %v2756_v26 = vpop.f32.mrf.mxu1  ;;  %3220 = vmatmul.mubr.bf16.gmra.mxu1 %v2767_v19 }
 0xbe3   :  { %3550 = vmatpush1.bf16.msra.mxu1 %v5347_v2  ;;  %v3298_v2 = vpop.f32.mrf.mxu0 }
 0xbe4   :  { %v2758_v32 = vpop.f32.mrf.mxu1  ;;  %3551 = vmatprep.subr.bf16.mxu1 %v5352_v30 }
 0xbe5   :  { %v2769_v22 = vpack.c.bf16 %v2758_v32, %v2754_v13 }
 0xbe6   :  { %v2760_v35 = vpop.f32.mrf.mxu1 }
 0xbe7   :  { %v2770_v27 = vpack.c.bf16 %v2760_v35, %v2756_v26  ;;  %3552 = vmatpush1.bf16.msra.mxu1 %v5350_v31 }
 0xbe8   :  { %3553 = vmatprep.subr.bf16.mxu1 %v5355_v12 }
 0xbe9   :  { %3229 = vmatprep.mubr.bf16.mxu1 %v2770_v27 }
 0xbea   :  { %3230 = vmatmul.mubr.bf16.gmra.mxu1 %v2769_v22  ;;  %v3300_v22 = vpop.f32.mrf.mxu0 }
 0xbeb   :  { %3554 = vmatpush1.bf16.msra.mxu1 %v5353_v29 }
 0xbec   :  { %3555 = vmatprep.subr.bf16.mxu1 %v5358_v36 }
 0xbef   :  { %3556 = vmatpush1.bf16.msra.mxu1 %v5356_v39 }
 0xbf0   :  { %3557 = vmatprep.subr.bf16.mxu1 %v5361_v5 }
 0xbf3   :  { %3558 = vmatpush2.bf16.msra.mxu1 %v5359_v11 }
 0xbf4   :  { %3559 = vmatprep.subr.bf16.mxu1 %v5364_v33 }
 0xbf7   :  { %3560 = vmatpush2.bf16.msra.mxu1 %v5362_v42 }
 0xbf8   :  { %3561 = vmatprep.subr.bf16.mxu1 %v5367_v43 }
 0xbfb   :  { %3562 = vmatpush2.bf16.msra.mxu1 %v5365_v46 }
 0xbfc   :  { %3563 = vmatprep.subr.bf16.mxu1 %v5370_v50  ;;  %v3304_v50 = vpop.f32.mrf.mxu0 }
 0xbff   :  { %3564 = vmatpush2.bf16.msra.mxu1 %v5368_v63 }
 0xc00   :  { %3565 = vmatprep.subr.bf16.mxu1 %v5373_v34 }
 0xc03   :  { %3566 = vmatpush2.bf16.msra.mxu1 %v5371_v0 }
 0xc04   :  { %3567 = vmatprep.subr.bf16.mxu1 %v5376_v24 }
 0xc07   :  { %3568 = vmatpush2.bf16.msra.mxu1 %v5374_v17 }
 0xc08   :  { %3569 = vmatprep.subr.bf16.mxu1 %v5379_v10 }
 0xc0b   :  { %3570 = vmatpush2.bf16.msra.mxu1 %v5377_v41 }
 0xc0c   :  { %3571 = vmatprep.subr.bf16.mxu1 %v5382_v45 }
 0xc0f   :  { %3572 = vmatpush2.bf16.msra.mxu1 %v5380_v40 }
 0xc92   :  { %v3201_v49 = vpop.f32.mrf.mxu1 }
 0xc93   :  { %v3202_v51 = vadd.f32 %v3201_v49, %v6553_v55 }
 0xc94   :  { %v3203_v59 = vpop.f32.mrf.mxu1 }
 0xc95   :  { %v3204_v54 = vadd.f32 %v3203_v59, %v6550_v44  ;;  %v3275_v4 = vadd.f32 %v3274_v18, %v3202_v51 }
 0xc96   :  { %v3205_v6 = vpop.f32.mrf.mxu1 }
 0xc97   :  { %v3206_v57 = vadd.f32 %v3205_v6, %v6553_v55  ;;  %v3277_v37 = vadd.f32 %v3276_v53, %v3204_v54  ;;  %v3313_v19 = vmax.f32 %v3275_v4, 0.0  ;;  %v3306_v53 = vpop.f32.mrf.mxu0 }
 0xc98   :  { %v3207_v20 = vpop.f32.mrf.mxu1 }
 0xc99   :  { %v3279_v56 = vadd.f32 %v3278_v9, %v3206_v57  ;;  %v3208_v38 = vadd.f32 %v3207_v20, %v6550_v44  ;;  %v3314_v8 = vmax.f32 %v3277_v37, 0.0  ;;  %v3308_v59 = vpop.f32.mrf.mxu0 }
 0xc9a   :  { %v3211_v61 = vpop.f32.mrf.mxu1 }
 0xc9b   :  { %v3281_v58 = vadd.f32 %v3280_v48, %v3208_v38  ;;  %v3315_v15 = vmax.f32 %v3279_v56, 0.0  ;;  %v3212_v13 = vadd.f32 %v3211_v61, %v6553_v55  ;;  %v3310_v4 = vpop.f32.mrf.mxu0 }
 0xc9c   :  { %v3213_v23 = vpop.f32.mrf.mxu1 }
 0xc9d   :  { %v3316_v28 = vmax.f32 %v3281_v58, 0.0  ;;  %v3214_v7 = vadd.f32 %v3213_v23, %v6550_v44  ;;  %v3329_v32 = vpack.c.bf16 %v3315_v15, %v3313_v19  ;;  %v3285_v36 = vadd.f32 %v3284_v52, %v3212_v13  ;;  %v5385_v19 = vld [vmem:[%s6943_s17 + $0x70] sm:$0xff]  }
 0xc9e   :  { %v3215_v30 = vpop.f32.mrf.mxu1  ;;  %v5386_v13 = vld [vmem:[%s6943_s17 + $0x30] sm:$0xff]  }
 0xc9f   :  { %v3216_v26 = vadd.f32 %v3215_v30, %v6553_v55  ;;  %v3330_v31 = vpack.c.bf16 %v3316_v28, %v3314_v8  ;;  %v3287_v35 = vadd.f32 %v3286_v47, %v3214_v7  ;;  %v3317_v63 = vmax.f32 %v3285_v36, 0.0  ;;  %v5387_v30 = vld [vmem:[%s6943_s17 + $0x68] sm:$0xff]  }
 0xca0   :  { %v3217_v12 = vpop.f32.mrf.mxu1  ;;  %v5396_v36 = vld [vmem:[%s6943_s17 + $0x8] sm:$0xff]  }
 0xca1   :  { %v3289_v27 = vadd.f32 %v3288_v21, %v3216_v26  ;;  %v3218_v29 = vadd.f32 %v3217_v12, %v6550_v44  ;;  %3573 = vmatprep.mubr.bf16.mxu1 %v3330_v31  ;;  %v3318_v42 = vmax.f32 %v3287_v35, 0.0  ;;  %v5388_v26 = vld [vmem:[%s6943_s17 + $0x28] sm:$0xff]   ;;  %v5389_v31 = vld [vmem:[%s6943_s17 + $0x60] sm:$0xff]   ;;  %v5391_v12 = vld [vmem:[%s6943_s17 + $0x58] sm:$0xff]  }
 0xca2   :  { %v3221_v39 = vpop.f32.mrf.mxu1  ;;  %3574 = vmatmul.mubr.bf16.vlgmr.msra.gmra.mxu1 %v3329_v32  ;;  %v5390_v32 = vld [vmem:[%s6943_s17 + $0x20] sm:$0xff]   ;;  %v5392_v35 = vld [vmem:[%s6943_s17 + $0x18] sm:$0xff]  }
 0xca3   :  { %v3291_v5 = vadd.f32 %v3290_v16, %v3218_v29  ;;  %v3319_v11 = vmax.f32 %v3289_v27, 0.0  ;;  %v3222_v34 = vadd.f32 %v3221_v39, %v6553_v55  ;;  %v5393_v27 = vld [vmem:[%s6943_s17 + $0x50] sm:$0xff]   ;;  %v5397_v39 = vld [vmem:[%s6943_s17 + $0x40] sm:$0xff]  }
 0xca4   :  { %v3223_v33 = vpop.f32.mrf.mxu1  ;;  %v5394_v29 = vld [vmem:[%s6943_s17 + $0x10] sm:$0xff]  }
 0xca5   :  { %v3320_v43 = vmax.f32 %v3291_v5, 0.0  ;;  %v3224_v46 = vadd.f32 %v3223_v33, %v6550_v44  ;;  %v3331_v41 = vpack.c.bf16 %v3319_v11, %v3317_v63  ;;  %v3295_v9 = vadd.f32 %v3294_v25, %v3222_v34  ;;  %v5398_v5 = vld [vmem:[%s6943_s17] sm:$0xff]  }
 0xca6   :  { %v3225_v0 = vpop.f32.mrf.mxu1 }
 0xca7   :  { %v3226_v24 = vadd.f32 %v3225_v0, %v6553_v55  ;;  %v3332_v17 = vpack.c.bf16 %v3320_v43, %v3318_v42  ;;  %v3297_v45 = vadd.f32 %v3296_v62, %v3224_v46  ;;  %v3321_v54 = vmax.f32 %v3295_v9, 0.0  ;;  %v3369_v43 = vld [vmem:[%s6940_s14] sm:$0x3]  ;;  %s4676_s14 = sld [smem:[#allocation3 + $0x8]] }
 0xca8   :  { %v3227_v10 = vpop.f32.mrf.mxu1  ;;  %v3374_v63 = vrot.slane %v3369_v43, %v5710_v3  ;;  %v6624_v0 = vrot.slane %v3369_v43, %v6336_v14 }
 0xca9   :  { %v3299_v40 = vadd.f32 %v3298_v2, %v3226_v24  ;;  %v3228_v18 = vadd.f32 %v3227_v10, %v6550_v44  ;;  %3583 = vmatprep.mubr.bf16.mxu1 %v3332_v17  ;;  %v3322_v60 = vmax.f32 %v3297_v45, 0.0 }
 0xcaa   :  { %v3231_v48 = vpop.f32.mrf.mxu1  ;;  %3584 = vmatmul.mubr.bf16.gmra.mxu1 %v3331_v41 }
 0xcab   :  { %v3301_v52 = vadd.f32 %v3300_v22, %v3228_v18  ;;  %v3323_v47 = vmax.f32 %v3299_v40, 0.0  ;;  %v3232_v51 = vadd.f32 %v3231_v48, %v6553_v55  ;;  %v5395_v22 = vld [vmem:[%s6943_s17 + $0x48] sm:$0xff]  }
 0xcac   :  { %v3233_v21 = vpop.f32.mrf.mxu1 }
 0xcad   :  { %v3324_v16 = vmax.f32 %v3301_v52, 0.0  ;;  %v3234_v49 = vadd.f32 %v3233_v21, %v6550_v44  ;;  %v3333_v56 = vpack.c.bf16 %v3323_v47, %v3321_v54  ;;  %v3305_v61 = vadd.f32 %v3304_v50, %v3232_v51 }
 0xcae   :  { %v3235_v6 = vpop.f32.mrf.mxu1 }
 0xcaf   :  { %v3236_v57 = vadd.f32 %v3235_v6, %v6553_v55  ;;  %v3334_v20 = vpack.c.bf16 %v3324_v16, %v3322_v60  ;;  %v3307_v25 = vadd.f32 %v3306_v53, %v3234_v49  ;;  %v3325_v28 = vmax.f32 %v3305_v61, 0.0  ;;  %v5383_v55 = vld [vmem:[%s6943_s17 + $0x78] sm:$0xff]  }
 0xcb0   :  { %v3237_v37 = vpop.f32.mrf.mxu1  ;;  %4815 = vmatprep.subr.bf16.mxu0 %v5383_v55 }
 0xcb1   :  { %v3309_v38 = vadd.f32 %v3308_v59, %v3236_v57  ;;  %v3238_v62 = vadd.f32 %v3237_v37, %v6550_v44  ;;  %3593 = vmatprep.mubr.bf16.mxu1 %v3334_v20  ;;  %v3326_v23 = vmax.f32 %v3307_v25, 0.0  ;;  %v5384_v44 = vld [vmem:[%s6943_s17 + $0x38] sm:$0xff]  }
 0xcb2   :  { %3594 = vmatmul.mubr.bf16.gmra.mxu1 %v3333_v56  ;;  %4816 = vmatpush3.bf16.msra.mxu0 %v5384_v44 }
 0xcb3   :  { %v3311_v58 = vadd.f32 %v3310_v4, %v3238_v62  ;;  %v3327_v15 = vmax.f32 %v3309_v38, 0.0  ;;  %4817 = vmatprep.subr.bf16.mxu0 %v5385_v19 }
 0xcb5   :  { %v3328_v8 = vmax.f32 %v3311_v58, 0.0  ;;  %v3335_v2 = vpack.c.bf16 %v3327_v15, %v3325_v28 }
 0xcb6   :  { %4818 = vmatpush3.bf16.msra.mxu0 %v5386_v13 }
 0xcb7   :  { %v3336_v7 = vpack.c.bf16 %v3328_v8, %v3326_v23  ;;  %4819 = vmatprep.subr.bf16.mxu0 %v5387_v30 }
 0xcb9   :  { %3603 = vmatprep.mubr.bf16.mxu1 %v3336_v7 }
 0xcba   :  { %3604 = vmatmul.mubr.bf16.gmra.mxu1 %v3335_v2  ;;  %4820 = vmatpush3.bf16.msra.mxu0 %v5388_v26 }
 0xcbb   :  { %4821 = vmatprep.subr.bf16.mxu0 %v5389_v31 }
 0xcbe   :  { %4822 = vmatpush3.bf16.msra.mxu0 %v5390_v32 }
 0xcbf   :  { %4823 = vmatprep.subr.bf16.mxu0 %v5391_v12 }
 0xcc2   :  { %4824 = vmatpush3.bf16.msra.mxu0 %v5392_v35 }
 0xcc3   :  { %4825 = vmatprep.subr.bf16.mxu0 %v5393_v27 }
 0xcc6   :  { %4826 = vmatpush3.bf16.msra.mxu0 %v5394_v29 }
 0xcc7   :  { %4827 = vmatprep.subr.bf16.mxu0 %v5395_v22 }
 0xcca   :  { %4828 = vmatpush3.bf16.msra.mxu0 %v5396_v36 }
 0xccb   :  { %4829 = vmatprep.subr.bf16.mxu0 %v5397_v39 }
 0xcce   :  { %4830 = vmatpush3.bf16.msra.mxu0 %v5398_v5 }
 0xd62   :  { %v3575_v11 = vpop.f32.mrf.mxu1 }
 0xd63   :  { %v6628_v10 = vadd.f32 %v3575_v11, %v3374_v63 }
 0xd64   :  { %v3577_v33 = vpop.f32.mrf.mxu1 }
 0xd65   :  { %v6636_v18 = vadd.f32 %v3577_v33, %v6624_v0  ;;  %v3645_v47 = vmul.f32 %v6628_v10, %v6628_v10 }
 0xd66   :  { %v3579_v42 = vpop.f32.mrf.mxu1 }
 0xd67   :  { %v6626_v24 = vadd.f32 %v3579_v42, %v3374_v63  ;;  %v3646_v54 = vmul.f32 %v6636_v18, %v6636_v18 }
 0xd68   :  { %v3581_v46 = vpop.f32.mrf.mxu1 }
 0xd69   :  { %v6631_v41 = vadd.f32 %v3581_v46, %v6624_v0  ;;  %v3647_v53 = vmul.f32 %v6626_v24, %v6626_v24  ;;  %v3617_v51 = vadd.f32 %v6626_v24, %v6628_v10 }
 0xd6a   :  { %v3585_v50 = vpop.f32.mrf.mxu1 }
 0xd6b   :  { %v6633_v45 = vadd.f32 %v3585_v50, %v3374_v63  ;;  %v3648_v21 = vmul.f32 %v6631_v41, %v6631_v41  ;;  %v3661_v6 = vadd.f32 %v3647_v53, %v3645_v47  ;;  %v3630_v25 = vadd.f32 %v6631_v41, %v6636_v18 }
 0xd6c   :  { %v3587_v34 = vpop.f32.mrf.mxu1 }
 0xd6d   :  { %v6641_v9 = vadd.f32 %v3587_v34, %v6624_v0  ;;  %v3649_v60 = vmul.f32 %v6633_v45, %v6633_v45  ;;  %v3618_v38 = vadd.f32 %v3617_v51, %v6633_v45  ;;  %v3674_v4 = vadd.f32 %v3648_v21, %v3646_v54 }
 0xd6e   :  { %v3589_v17 = vpop.f32.mrf.mxu1 }
 0xd6f   :  { %v6643_v48 = vadd.f32 %v3589_v17, %v3374_v63  ;;  %v3650_v57 = vmul.f32 %v6641_v9, %v6641_v9  ;;  %v3662_v61 = vadd.f32 %v3661_v6, %v3649_v60  ;;  %v3631_v8 = vadd.f32 %v3630_v25, %v6641_v9 }
 0xd70   :  { %v3591_v40 = vpop.f32.mrf.mxu1 }
 0xd71   :  { %v6652_v16 = vadd.f32 %v3591_v40, %v6624_v0  ;;  %v3651_v20 = vmul.f32 %v6643_v48, %v6643_v48  ;;  %v3619_v28 = vadd.f32 %v3618_v38, %v6643_v48  ;;  %v3675_v2 = vadd.f32 %v3674_v4, %v3650_v57 }
 0xd72   :  { %v3595_v52 = vpop.f32.mrf.mxu1 }
 0xd73   :  { %v6654_v49 = vadd.f32 %v3595_v52, %v3374_v63  ;;  %v3652_v58 = vmul.f32 %v6652_v16, %v6652_v16  ;;  %v3663_v55 = vadd.f32 %v3662_v61, %v3651_v20  ;;  %v3632_v30 = vadd.f32 %v3631_v8, %v6652_v16 }
 0xd74   :  { %v3597_v59 = vpop.f32.mrf.mxu1 }
 0xd75   :  { %v6665_v37 = vadd.f32 %v3597_v59, %v6624_v0  ;;  %v3653_v15 = vmul.f32 %v6654_v49, %v6654_v49  ;;  %v3620_v26 = vadd.f32 %v3619_v28, %v6654_v49  ;;  %v3676_v32 = vadd.f32 %v3675_v2, %v3652_v58 }
 0xd76   :  { %v3599_v56 = vpop.f32.mrf.mxu1 }
 0xd77   :  { %v6670_v62 = vadd.f32 %v3599_v56, %v3374_v63  ;;  %v3654_v44 = vmul.f32 %v6665_v37, %v6665_v37  ;;  %v3664_v12 = vadd.f32 %v3663_v55, %v3653_v15  ;;  %v3633_v29 = vadd.f32 %v3632_v30, %v6665_v37 }
 0xd78   :  { %v3601_v23 = vpop.f32.mrf.mxu1 }
 0xd79   :  { %v6679_v7 = vadd.f32 %v3601_v23, %v6624_v0  ;;  %v3655_v19 = vmul.f32 %v6670_v62, %v6670_v62  ;;  %v3621_v22 = vadd.f32 %v3620_v26, %v6670_v62  ;;  %v3677_v5 = vadd.f32 %v3676_v32, %v3654_v44 }
 0xd7a   :  { %v3605_v13 = vpop.f32.mrf.mxu1 }
 0xd7b   :  { %v6687_v31 = vadd.f32 %v3605_v13, %v3374_v63  ;;  %v3656_v35 = vmul.f32 %v6679_v7, %v6679_v7  ;;  %v3665_v11 = vadd.f32 %v3664_v12, %v3655_v19  ;;  %v3634_v42 = vadd.f32 %v3633_v29, %v6679_v7 }
 0xd7c   :  { %v3607_v27 = vpop.f32.mrf.mxu1 }
 0xd7d   :  { %v3657_v36 = vmul.f32 %v6687_v31, %v6687_v31  ;;  %v6696_v39 = vadd.f32 %v3607_v27, %v6624_v0  ;;  %v3622_v43 = vadd.f32 %v3621_v22, %v6687_v31  ;;  %v3678_v34 = vadd.f32 %v3677_v5, %v3656_v35 }
 0xd7e   :  { %v3609_v33 = vpop.f32.mrf.mxu1 }
 0xd7f   :  { %v3658_v46 = vmul.f32 %v6696_v39, %v6696_v39  ;;  %v6702_v50 = vadd.f32 %v3609_v33, %v3374_v63  ;;  %v3666_v17 = vadd.f32 %v3665_v11, %v3657_v36  ;;  %v3635_v53 = vadd.f32 %v3634_v42, %v6696_v39 }
 0xd80   :  { %v3611_v40 = vpop.f32.mrf.mxu1 }
 0xd81   :  { %v3623_v52 = vadd.f32 %v3622_v43, %v6702_v50  ;;  %v3659_v47 = vmul.f32 %v6702_v50, %v6702_v50  ;;  %v6709_v21 = vadd.f32 %v3611_v40, %v6624_v0  ;;  %v3679_v60 = vadd.f32 %v3678_v34, %v3658_v46 }
 0xd82   :  { %v5445_v40 = vmov 1966171168  }
 0xd83   :  { %v3624_v59 = vrot.slane %v3623_v52, 4  ;;  %v3667_v54 = vadd.f32 %v3666_v17, %v3659_v47  ;;  %v3636_v51 = vadd.f32 %v3635_v53, %v6709_v21  ;;  %v3660_v63 = vmul.f32 %v6709_v21, %v6709_v21 }
 0xd84   :  { %v3703_v53 = vunpack.c.l.s4 %v5445_v40 }
 0xd85   :  { %v3625_v6 = vadd.f32 %v3624_v59, %v3623_v52  ;;  %v3668_v57 = vrot.slane %v3667_v54, 4  ;;  %v3637_v20 = vrot.slane %v3636_v51, 4  ;;  %v3680_v56 = vadd.f32 %v3679_v60, %v3660_v63 }
 0xd86   :  { %v3704_v52 = vunpack.c.0.s8 %v3703_v53 }
 0xd87   :  { %v3626_v25 = vrot.slane %v3625_v6, 2  ;;  %v3669_v38 = vadd.f32 %v3668_v57, %v3667_v54  ;;  %v3638_v4 = vadd.f32 %v3637_v20, %v3636_v51  ;;  %v3681_v61 = vrot.slane %v3680_v56, 4  ;;  %v3615_v51 = vld [vmem:[%s6942_s16] sm:$0x3] }
 0xd88   :  { %v3707_v60 = vsub.s32 %v3704_v52, %v5704_v1  ;;  %v6730_v20 = vrot.slane %v3615_v51, %v5710_v3 }
 0xd89   :  { %v3627_v58 = vadd.f32 %v3626_v25, %v3625_v6  ;;  %v3670_v15 = vrot.slane %v3669_v38, 2  ;;  %v3639_v0 = vrot.slane %v3638_v4, 2  ;;  %v3682_v23 = vadd.f32 %v3681_v61, %v3680_v56  ;;  %v3614_v6 = vld [vmem:[%s6941_s15] sm:$0x3] }
 0xd8a   :  { %v6733_v56 = vrot.slane %v3615_v51, %v6336_v14  ;;  %v6737_v25 = vstv %s4676_s14 }
 0xd8b   :  { %v3628_v8 = vrot.slane %v3627_v58, 1  ;;  %v3671_v28 = vadd.f32 %v3670_v15, %v3669_v38  ;;  %v3640_v2 = vadd.f32 %v3639_v0, %v3638_v4  ;;  %v3683_v55 = vrot.slane %v3682_v23, 2 }
 0xd8d   :  { %v3629_v44 = vadd.f32 %v3628_v8, %v3627_v58  ;;  %v3672_v19 = vrot.slane %v3671_v28, 1  ;;  %v3641_v13 = vrot.slane %v3640_v2, 1  ;;  %v3684_v30 = vadd.f32 %v3683_v55, %v3682_v23 }
 0xd8f   :  { %v6714_v26 = vmul.f32 0.015625, %v3629_v44  ;;  %v3673_v32 = vadd.f32 %v3672_v19, %v3671_v28  ;;  %v3642_v12 = vadd.f32 %v3641_v13, %v3640_v2  ;;  %v3685_v35 = vrot.slane %v3684_v30, 1 }
 0xd91   :  { %v3687_v27 = vmul.f32 0.015625, %v3673_v32  ;;  %v3689_v29 = vmul.f32 %v6714_v26, %v6714_v26  ;;  %v6718_v22 = vmul.f32 0.015625, %v3642_v12  ;;  %v3686_v36 = vadd.f32 %v3685_v35, %v3684_v30 }
 0xd92   :  { %v3732_v1 = vsub.f32 %v6702_v50, %v6714_v26  ;;  %v3718_v38 = vsub.f32 %v6628_v10, %v6714_v26  ;;  %v3720_v4 = vsub.f32 %v6626_v24, %v6714_v26  ;;  %v3722_v0 = vsub.f32 %v6633_v45, %v6714_v26  ;;  %v5399_v50 = vld [vmem:[%s6947_s21 + $0x38] sm:$0xff]  }
 0xd93   :  { %v3691_v5 = vsub.f32 %v3687_v27, %v3689_v29  ;;  %v3690_v11 = vmul.f32 %v6718_v22, %v6718_v22  ;;  %v3688_v33 = vmul.f32 0.015625, %v3686_v36  ;;  %v3733_v58 = vsub.f32 %v6709_v21, %v6718_v22  ;;  %5087 = vmatprep.subr.bf16.mxu1 %v5399_v50 }
 0xd94   :  { %v3719_v15 = vsub.f32 %v6636_v18, %v6718_v22  ;;  %v3721_v23 = vsub.f32 %v6631_v41, %v6718_v22  ;;  %v3723_v8 = vsub.f32 %v6641_v9, %v6718_v22  ;;  %v3725_v10 = vsub.f32 %v6652_v16, %v6718_v22  ;;  %5088 = vmatpush3.bf16.msra.mxu1 %v5399_v50 }
 0xd95   :  { %v3693_v42 = vmax.f32 %v3691_v5, 0.0  ;;  %v3692_v43 = vsub.f32 %v3688_v33, %v3690_v11  ;;  %v3724_v24 = vsub.f32 %v6643_v48, %v6714_v26  ;;  %v3727_v45 = vsub.f32 %v6665_v37, %v6718_v22 }
 0xd96   :  { %v3729_v41 = vsub.f32 %v6679_v7, %v6718_v22  ;;  %v3726_v9 = vsub.f32 %v6654_v49, %v6714_v26  ;;  %v3728_v16 = vsub.f32 %v6670_v62, %v6714_v26  ;;  %v3731_v48 = vsub.f32 %v6696_v39, %v6718_v22 }
 0xd97   :  { %v3695_v46 = vadd.f32 1e-05, %v3693_v42  ;;  %v3694_v34 = vmax.f32 %v3692_v43, 0.0  ;;  %v3730_v28 = vsub.f32 %v6687_v31, %v6714_v26  ;;  %v5400_v26 = vld [vmem:[%s6947_s21 + $0x30] sm:$0xff]  }
 0xd98   :  { %5089 = vmatprep.subr.bf16.mxu1 %v5400_v26 }
 0xd99   :  { %v3696_v17 = vadd.f32 1e-05, %v3694_v34  ;;  %5423 = vrsqrt.f32 %v3695_v46  ;;  %5090 = vmatpush3.bf16.msra.mxu1 %v5400_v26 }
 0xd9b   :  { %5425 = vrsqrt.f32 %v3696_v17 }
 0xda6   :  { %v5424_v47 = vpop.eup %5423 }
 0xda8   :  { %v5426_v59 = vpop.eup %5425 }
 0xda9   :  { %v3701_v54 = vcombine.low %v5424_v47, %v5426_v59 }
 0xdab   :  { %v3708_v63 = vrot.slane %v3701_v54, %v3707_v60 }
 0xdad   :  { %v3715_v57 = vrot.slane %v3708_v63, %v3707_v60 }
 0xdaf   :  { %v3717_v61 = vmul.f32 %v3715_v57, %v3614_v6 }
 0xdb1   :  { %v6758_v21 = vrot.slane %v3717_v61, %v5710_v3  ;;  %v3742_v18 = vrot.slane %v3717_v61, %v6336_v14 }
 0xdb3   :  { %v3760_v2 = vmul.f32 %v3742_v18, %v3733_v58  ;;  %v3746_v14 = vmul.f32 %v3742_v18, %v3719_v15  ;;  %v3748_v55 = vmul.f32 %v3742_v18, %v3721_v23  ;;  %v3745_v37 = vmul.f32 %v6758_v21, %v3718_v38 }
 0xdb4   :  { %v3747_v44 = vmul.f32 %v6758_v21, %v3720_v4  ;;  %v3750_v7 = vmul.f32 %v3742_v18, %v3723_v8  ;;  %v3752_v19 = vmul.f32 %v3742_v18, %v3725_v10  ;;  %v3749_v49 = vmul.f32 %v6758_v21, %v3722_v0 }
 0xdb5   :  { %v6777_v13 = vadd.f32 %v6733_v56, %v3760_v2  ;;  %v3773_v62 = vadd.f32 %v6733_v56, %v3746_v14  ;;  %v3775_v39 = vadd.f32 %v6733_v56, %v3748_v55  ;;  %v3772_v30 = vadd.f32 %v6730_v20, %v3745_v37 }
 0xdb6   :  { %v3774_v32 = vadd.f32 %v6730_v20, %v3747_v44  ;;  %v3777_v12 = vadd.f32 %v6733_v56, %v3750_v7  ;;  %v3779_v35 = vadd.f32 %v6733_v56, %v3752_v19  ;;  %v3751_v27 = vmul.f32 %v6758_v21, %v3724_v24 }
 0xdb7   :  { %vm3789_vm3 = vcmp.ge.f32.partialorder %v3773_v62, 0.0  ;;  %vm3791_vm4 = vcmp.ge.f32.partialorder %v3775_v39, 0.0  ;;  %v3806_v29 = vmul.f32 %v6737_v25, %v3773_v62  ;;  %v3808_v22 = vmul.f32 %v6737_v25, %v3775_v39 }
 0xdb8   :  { %vm3788_vm5 = vcmp.ge.f32.partialorder %v3772_v30, 0.0  ;;  %vm3790_vm6 = vcmp.ge.f32.partialorder %v3774_v32, 0.0  ;;  %v3805_v36 = vmul.f32 %v6737_v25, %v3772_v30  ;;  %v3807_v5 = vmul.f32 %v6737_v25, %v3774_v32 }
 0xdb9   :  { %v3822_v11 = vsel %vm3789_vm3, %v3773_v62, %v3806_v29  ;;  %v3824_v33 = vsel %vm3791_vm4, %v3775_v39, %v3808_v22  ;;  %vm3793_vm7 = vcmp.ge.f32.partialorder %v3777_v12, 0.0  ;;  %vm3795_vm8 = vcmp.ge.f32.partialorder %v3779_v35, 0.0  ;;  %v5406_v29 = vld [vmem:[%s6947_s21] sm:$0xff]  }
 0xdba   :  { %v3838_v42 = vpack.c.bf16 %v3824_v33, %v3822_v11  ;;  %v3821_v43 = vsel %vm3788_vm5, %v3772_v30, %v3805_v36  ;;  %v3823_v46 = vsel %vm3790_vm6, %v3774_v32, %v3807_v5  ;;  %v3810_v34 = vmul.f32 %v6737_v25, %v3777_v12 }
 0xdbb   :  { %v3837_v17 = vpack.c.bf16 %v3823_v46, %v3821_v43  ;;  %v3812_v40 = vmul.f32 %v6737_v25, %v3779_v35  ;;  %v3776_v53 = vadd.f32 %v6730_v20, %v3749_v49  ;;  %v3778_v52 = vadd.f32 %v6730_v20, %v3751_v27  ;;  %v5405_v27 = vld [vmem:[%s6947_s21 + $0x8] sm:$0xff]  }
 0xdbc   :  { %4012 = vmatprep.mubr.bf16.mxu0 %v3838_v42  ;;  %v3826_v47 = vsel %vm3793_vm7, %v3777_v12, %v3810_v34  ;;  %v3754_v60 = vmul.f32 %v3742_v18, %v3727_v45  ;;  %v3756_v59 = vmul.f32 %v3742_v18, %v3729_v41  ;;  %v3753_v54 = vmul.f32 %v6758_v21, %v3726_v9 }
 0xdbd   :  { %4013 = vmatmul.mubr.bf16.vlgmr.msra.gmra.mxu0 %v3837_v17  ;;  %v3828_v51 = vsel %vm3795_vm8, %v3779_v35, %v3812_v40  ;;  %vm3792_vm9 = vcmp.ge.f32.partialorder %v3776_v53, 0.0  ;;  %vm3794_vm10 = vcmp.ge.f32.partialorder %v3778_v52, 0.0  ;;  %v3809_v63 = vmul.f32 %v6737_v25, %v3776_v53  ;;  %v4677_v40 = vld [vmem:[%s6944_s18] ss:$0 sm:$0xff]  ;;  %s4694_s18 = sld [smem:[#allocation3 + $0x9]] }
 0xdbe   :  { %v3840_v6 = vpack.c.bf16 %v3828_v51, %v3826_v47  ;;  %v3811_v57 = vmul.f32 %v6737_v25, %v3778_v52  ;;  %v3781_v38 = vadd.f32 %v6733_v56, %v3754_v60  ;;  %v3783_v4 = vadd.f32 %v6733_v56, %v3756_v59 }
 0xdbf   :  { %v3825_v61 = vsel %vm3792_vm9, %v3776_v53, %v3809_v63  ;;  %v3755_v58 = vmul.f32 %v6758_v21, %v3728_v16  ;;  %v3780_v15 = vadd.f32 %v6730_v20, %v3753_v54  ;;  %v3758_v0 = vmul.f32 %v3742_v18, %v3731_v48 }
 0xdc0   :  { %4020 = vmatprep.mubr.bf16.mxu0 %v3840_v6  ;;  %v3827_v23 = vsel %vm3794_vm10, %v3778_v52, %v3811_v57  ;;  %vm3797_vm11 = vcmp.ge.f32.partialorder %v3781_v38, 0.0  ;;  %vm3799_vm12 = vcmp.ge.f32.partialorder %v3783_v4, 0.0  ;;  %v3814_v8 = vmul.f32 %v6737_v25, %v3781_v38 }
 0xdc1   :  { %v3839_v10 = vpack.c.bf16 %v3827_v23, %v3825_v61  ;;  %v3816_v24 = vmul.f32 %v6737_v25, %v3783_v4  ;;  %v3782_v45 = vadd.f32 %v6730_v20, %v3755_v58  ;;  %vm3796_vm13 = vcmp.ge.f32.partialorder %v3780_v15, 0.0 }
 0xdc2   :  { %v3830_v41 = vsel %vm3797_vm11, %v3781_v38, %v3814_v8  ;;  %v3813_v9 = vmul.f32 %v6737_v25, %v3780_v15  ;;  %v3785_v16 = vadd.f32 %v6733_v56, %v3758_v0  ;;  %vm3803_vm14 = vcmp.ge.f32.partialorder %v6777_v13, 0.0 }
 0xdc3   :  { %v3832_v18 = vsel %vm3799_vm12, %v3783_v4, %v3816_v24  ;;  %vm3798_vm15 = vcmp.ge.f32.partialorder %v3782_v45, 0.0  ;;  %v3815_v48 = vmul.f32 %v6737_v25, %v3782_v45  ;;  %v3820_v2 = vmul.f32 %v6737_v25, %v6777_v13 }
 0xdc4   :  { %v3842_v14 = vpack.c.bf16 %v3832_v18, %v3830_v41  ;;  %v3829_v55 = vsel %vm3796_vm13, %v3780_v15, %v3813_v9  ;;  %vm3801_vm0 = vcmp.ge.f32.partialorder %v3785_v16, 0.0  ;;  %v3818_v37 = vmul.f32 %v6737_v25, %v3785_v16 }
 0xdc5   :  { %4021 = vmatmul.mubr.bf16.gmra.mxu0 %v3839_v10  ;;  %v3831_v44 = vsel %vm3798_vm15, %v3782_v45, %v3815_v48  ;;  %v3836_v7 = vsel %vm3803_vm14, %v6777_v13, %v3820_v2  ;;  %v3757_v56 = vmul.f32 %v6758_v21, %v3730_v28  ;;  %v3759_v19 = vmul.f32 %v6758_v21, %v3732_v1  ;;  %v5402_v1 = vld [vmem:[%s6947_s21 + $0x20] sm:$0xff]   ;;  %v5404_v21 = vld [vmem:[%s6947_s21 + $0x10] sm:$0xff]  }
 0xdc6   :  { %4028 = vmatprep.mubr.bf16.mxu0 %v3842_v14  ;;  %v3841_v49 = vpack.c.bf16 %v3831_v44, %v3829_v55  ;;  %v3834_v62 = vsel %vm3801_vm0, %v3785_v16, %v3818_v37  ;;  %vm4291_vm11 = vcmask 7168  }
 0xdc7   :  { %v3844_v39 = vpack.c.bf16 %v3836_v7, %v3834_v62  ;;  %v3784_v30 = vadd.f32 %v6730_v20, %v3757_v56  ;;  %v3786_v32 = vadd.f32 %v6730_v20, %v3759_v19  ;;  %v5401_v20 = vld [vmem:[%s6947_s21 + $0x28] sm:$0xff]  }
 0xdc8   :  { %5091 = vmatprep.subr.bf16.mxu1 %v5401_v20 }
 0xdc9   :  { %vm3800_vm1 = vcmp.ge.f32.partialorder %v3784_v30, 0.0  ;;  %vm3802_vm2 = vcmp.ge.f32.partialorder %v3786_v32, 0.0  ;;  %v3817_v13 = vmul.f32 %v6737_v25, %v3784_v30  ;;  %v3819_v31 = vmul.f32 %v6737_v25, %v3786_v32  ;;  %5092 = vmatpush3.bf16.msra.mxu1 %v5401_v20  ;;  %v5403_v25 = vld [vmem:[%s6947_s21 + $0x18] sm:$0xff]  }
 0xdca   :  { %5093 = vmatprep.subr.bf16.mxu1 %v5402_v1 }
 0xdcb   :  { %v3833_v28 = vsel %vm3800_vm1, %v3784_v30, %v3817_v13  ;;  %v3835_v12 = vsel %vm3802_vm2, %v3786_v32, %v3819_v31 }
 0xdcc   :  { %v3843_v35 = vpack.c.bf16 %v3835_v12, %v3833_v28 }
 0xdcd   :  { %4029 = vmatmul.mubr.bf16.gmra.mxu0 %v3841_v49  ;;  %5094 = vmatpush3.bf16.msra.mxu1 %v5402_v1 }
 0xdce   :  { %4036 = vmatprep.mubr.bf16.mxu0 %v3844_v39  ;;  %5095 = vmatprep.subr.bf16.mxu1 %v5403_v25 }
 0xdd1   :  { %5096 = vmatpush3.bf16.msra.mxu1 %v5403_v25 }
 0xdd2   :  { %5097 = vmatprep.subr.bf16.mxu1 %v5404_v21 }
 0xdd5   :  { %4037 = vmatmul.mubr.bf16.gmra.mxu0 %v3843_v35  ;;  %5098 = vmatpush3.bf16.msra.mxu1 %v5404_v21 }
 0xdd6   :  { %5099 = vmatprep.subr.bf16.mxu1 %v5405_v27 }
 0xdd9   :  { %5100 = vmatpush3.bf16.msra.mxu1 %v5405_v27 }
 0xdda   :  { %5101 = vmatprep.subr.bf16.mxu1 %v5406_v29 }
 0xddd   :  { %5102 = vmatpush3.bf16.msra.mxu1 %v5406_v29 }
 0xe7d   :  { %v4831_v22 = vpop.f32.mrf.mxu0 }
 0xe7f   :  { %v4832_v36 = vpop.f32.mrf.mxu0 }
 0xe80   :  { %v4833_v34 = vadd.f32 %v4832_v36, %v4831_v22 }
 0xe81   :  { %v4834_v5 = vpop.f32.mrf.mxu0 }
 0xe82   :  { %v6853_v59 = vadd.f32 %v4833_v34, %v4677_v40 }
 0xe83   :  { %v4835_v11 = vpop.f32.mrf.mxu0 }
 0xe84   :  { %v4836_v46 = vadd.f32 %v4835_v11, %v4834_v5  ;;  %v4062_v4 = vmul.f32 %v6853_v59, %v6853_v59 }
 0xe85   :  { %v4837_v33 = vpop.f32.mrf.mxu0 }
 0xe86   :  { %v6851_v47 = vadd.f32 %v4836_v46, %v4677_v40 }
 0xe87   :  { %v4838_v42 = vpop.f32.mrf.mxu0 }
 0xe88   :  { %v4839_v53 = vadd.f32 %v4838_v42, %v4837_v33  ;;  %v4063_v57 = vmul.f32 %v6851_v47, %v6851_v47  ;;  %v4048_v58 = vadd.f32 %v6851_v47, %v6853_v59 }
 0xe89   :  { %v4840_v43 = vpop.f32.mrf.mxu0 }
 0xe8a   :  { %v6855_v51 = vadd.f32 %v4839_v53, %v4677_v40  ;;  %v4070_v10 = vadd.f32 %v4063_v57, %v4062_v4 }
 0xe8b   :  { %v4841_v17 = vpop.f32.mrf.mxu0 }
 0xe8c   :  { %v4842_v60 = vadd.f32 %v4841_v17, %v4840_v43  ;;  %v4064_v15 = vmul.f32 %v6855_v51, %v6855_v51  ;;  %v4049_v24 = vadd.f32 %v4048_v58, %v6855_v51 }
 0xe8d   :  { %v4843_v52 = vpop.f32.mrf.mxu0 }
 0xe8e   :  { %v6859_v38 = vadd.f32 %v4842_v60, %v4677_v40  ;;  %v4071_v16 = vadd.f32 %v4070_v10, %v4064_v15 }
 0xe8f   :  { %v4844_v54 = vpop.f32.mrf.mxu0 }
 0xe90   :  { %v4845_v63 = vadd.f32 %v4844_v54, %v4843_v52  ;;  %v4065_v45 = vmul.f32 %v6859_v38, %v6859_v38  ;;  %v4050_v18 = vadd.f32 %v4049_v24, %v6859_v38  ;;  %v4134_v54 = vstv %s4694_s18 }
 0xe91   :  { %v4846_v6 = vpop.f32.mrf.mxu0 }
 0xe92   :  { %v6867_v0 = vadd.f32 %v4845_v63, %v4677_v40  ;;  %v4072_v55 = vadd.f32 %v4071_v16, %v4065_v45 }
 0xe93   :  { %v4847_v61 = vpop.f32.mrf.mxu0 }
 0xe94   :  { %v4848_v23 = vadd.f32 %v4847_v61, %v4846_v6  ;;  %v4066_v48 = vmul.f32 %v6867_v0, %v6867_v0  ;;  %v4051_v37 = vadd.f32 %v4050_v18, %v6867_v0  ;;  %v4695_v61 = vld [vmem:[%s6946_s20] ss:$0 sm:$0xff] }
 0xe95   :  { %v4849_v8 = vpop.f32.mrf.mxu0 }
 0xe96   :  { %v6872_v41 = vadd.f32 %v4848_v23, %v4677_v40  ;;  %v4073_v19 = vadd.f32 %v4072_v55, %v4066_v48 }
 0xe97   :  { %v4850_v9 = vpop.f32.mrf.mxu0 }
 0xe98   :  { %v4851_v2 = vadd.f32 %v4850_v9, %v4849_v8  ;;  %v4067_v44 = vmul.f32 %v6872_v41, %v6872_v41  ;;  %v4052_v49 = vadd.f32 %v4051_v37, %v6872_v41 }
 0xe99   :  { %v4852_v14 = vpop.f32.mrf.mxu0 }
 0xe9a   :  { %v4039_v7 = vadd.f32 %v4851_v2, %v4677_v40  ;;  %v4074_v30 = vadd.f32 %v4073_v19, %v4067_v44 }
 0xe9b   :  { %v4853_v56 = vpop.f32.mrf.mxu0 }
 0xe9c   :  { %v4068_v62 = vmul.f32 %v4039_v7, %v4039_v7  ;;  %v4854_v39 = vadd.f32 %v4853_v56, %v4852_v14  ;;  %v4053_v32 = vadd.f32 %v4052_v49, %v4039_v7 }
 0xe9e   :  { %v4042_v13 = vadd.f32 %v4854_v39, %v4677_v40  ;;  %v4075_v31 = vadd.f32 %v4074_v30, %v4068_v62  ;;  %v4045_v40 = vld [vmem:[%s6945_s19] sm:$0x1] }
 0xea0   :  { %v4054_v28 = vadd.f32 %v4053_v32, %v4042_v13  ;;  %v4069_v12 = vmul.f32 %v4042_v13, %v4042_v13 }
 0xea2   :  { %v4055_v35 = vrot.slane %v4054_v28, 4  ;;  %v4076_v50 = vadd.f32 %v4075_v31, %v4069_v12 }
 0xea4   :  { %v4056_v26 = vadd.f32 %v4055_v35, %v4054_v28  ;;  %v4077_v20 = vrot.slane %v4076_v50, 4 }
 0xea6   :  { %v4057_v1 = vrot.slane %v4056_v26, 2  ;;  %v4078_v25 = vadd.f32 %v4077_v20, %v4076_v50 }
 0xea8   :  { %v4058_v21 = vadd.f32 %v4057_v1, %v4056_v26  ;;  %v4079_v27 = vrot.slane %v4078_v25, 2 }
 0xeaa   :  { %v4059_v29 = vrot.slane %v4058_v21, 1  ;;  %v4080_v22 = vadd.f32 %v4079_v27, %v4078_v25  ;;  %v4696_v25 = vld [vmem:[#allocation2] ss:$0 sm:$0xff] }
 0xeac   :  { %v4060_v36 = vadd.f32 %v4059_v29, %v4058_v21  ;;  %v4081_v5 = vrot.slane %v4080_v22, 1 }
 0xeae   :  { %v4061_v11 = vmul.f32 0.015625, %v4060_v36  ;;  %v4082_v33 = vadd.f32 %v4081_v5, %v4080_v22 }
 0xeb0   :  { %v4083_v42 = vmul.f32 0.015625, %v4082_v33  ;;  %v4084_v43 = vmul.f32 %v4061_v11, %v4061_v11  ;;  %v4097_v60 = vsub.f32 %v4042_v13, %v4061_v11  ;;  %v4090_v6 = vsub.f32 %v6853_v59, %v4061_v11 }
 0xeb1   :  { %v4091_v57 = vsub.f32 %v6851_v47, %v4061_v11  ;;  %v4092_v4 = vsub.f32 %v6855_v51, %v4061_v11  ;;  %v4093_v58 = vsub.f32 %v6859_v38, %v4061_v11  ;;  %v4094_v15 = vsub.f32 %v6867_v0, %v4061_v11 }
 0xeb2   :  { %v4085_v46 = vsub.f32 %v4083_v42, %v4084_v43  ;;  %v4095_v23 = vsub.f32 %v6872_v41, %v4061_v11  ;;  %v4096_v8 = vsub.f32 %v4039_v7, %v4061_v11 }
 0xeb4   :  { %v4086_v34 = vmax.f32 %v4085_v46, 0.0 }
 0xeb6   :  { %v4087_v17 = vadd.f32 1e-05, %v4086_v34 }
 0xeb8   :  { %5427 = vrsqrt.f32 %v4087_v17 }
 0xec5   :  { %v5428_v53 = vpop.eup %5427 }
 0xec6   :  { %v4089_v52 = vmul.f32 %v5428_v53, %v4045_v40 }
 0xec8   :  { %v4102_v63 = vrot.slane %v4089_v52, %v5710_v3 }
 0xeca   :  { %v4111_v10 = vmul.f32 %v4102_v63, %v4097_v60  ;;  %v4104_v24 = vmul.f32 %v4102_v63, %v4090_v6  ;;  %v4105_v3 = vmul.f32 %v4102_v63, %v4091_v57  ;;  %v4106_v45 = vmul.f32 %v4102_v63, %v4092_v4 }
 0xecb   :  { %v4107_v59 = vmul.f32 %v4102_v63, %v4093_v58  ;;  %v4108_v9 = vmul.f32 %v4102_v63, %v4094_v15  ;;  %v4109_v47 = vmul.f32 %v4102_v63, %v4095_v23  ;;  %v4110_v16 = vmul.f32 %v4102_v63, %v4096_v8 }
 0xecc   :  { %v4118_v51 = vadd.f32 %v4695_v61, %v4104_v24  ;;  %v4119_v18 = vadd.f32 %v4695_v61, %v4105_v3  ;;  %v4120_v48 = vadd.f32 %v4695_v61, %v4106_v45  ;;  %v4125_v2 = vadd.f32 %v4695_v61, %v4111_v10 }
 0xecd   :  { %v4121_v14 = vadd.f32 %v4695_v61, %v4107_v59  ;;  %v4122_v55 = vadd.f32 %v4695_v61, %v4108_v9  ;;  %v4123_v38 = vadd.f32 %v4695_v61, %v4109_v47  ;;  %v4124_v37 = vadd.f32 %v4695_v61, %v4110_v16 }
 0xece   :  { %vm4126_vm3 = vcmp.ge.f32.partialorder %v4118_v51, 0.0  ;;  %vm4127_vm4 = vcmp.ge.f32.partialorder %v4119_v18, 0.0  ;;  %v4135_v0 = vmul.f32 %v4134_v54, %v4118_v51  ;;  %v4136_v41 = vmul.f32 %v4134_v54, %v4119_v18 }
 0xecf   :  { %vm4128_vm5 = vcmp.ge.f32.partialorder %v4120_v48, 0.0  ;;  %vm4129_vm6 = vcmp.ge.f32.partialorder %v4121_v14, 0.0  ;;  %v4137_v44 = vmul.f32 %v4134_v54, %v4120_v48  ;;  %v4138_v7 = vmul.f32 %v4134_v54, %v4121_v14 }
 0xed0   :  { %v4143_v56 = vsel %vm4126_vm3, %v4118_v51, %v4135_v0  ;;  %v4144_v19 = vsel %vm4127_vm4, %v4119_v18, %v4136_v41  ;;  %vm4130_vm7 = vcmp.ge.f32.partialorder %v4122_v55, 0.0  ;;  %vm4131_vm8 = vcmp.ge.f32.partialorder %v4123_v38, 0.0 }
 0xed1   :  { %v4151_v49 = vpack.c.bf16 %v4144_v19, %v4143_v56  ;;  %v4145_v62 = vsel %vm4128_vm5, %v4120_v48, %v4137_v44  ;;  %v4146_v39 = vsel %vm4129_vm6, %v4121_v14, %v4138_v7  ;;  %v4139_v30 = vmul.f32 %v4134_v54, %v4122_v55 }
 0xed2   :  { %v4152_v32 = vpack.c.bf16 %v4146_v39, %v4145_v62  ;;  %v4140_v13 = vmul.f32 %v4134_v54, %v4123_v38  ;;  %v4141_v28 = vmul.f32 %v4134_v54, %v4124_v37  ;;  %v4142_v12 = vmul.f32 %v4134_v54, %v4125_v2 }
 0xed3   :  { %5103 = vmatprep.mubr.bf16.mxu1 %v4151_v49  ;;  %v4147_v31 = vsel %vm4130_vm7, %v4122_v55, %v4139_v30  ;;  %vm4132_vm9 = vcmp.ge.f32.partialorder %v4124_v37, 0.0  ;;  %vm4133_vm10 = vcmp.ge.f32.partialorder %v4125_v2, 0.0 }
 0xed4   :  { %5104 = vmatmul.mubr.bf16.vlgmr.msra.gmra.mxu1 %v4152_v32  ;;  %v4148_v35 = vsel %vm4131_vm8, %v4123_v38, %v4140_v13  ;;  %v4149_v26 = vsel %vm4132_vm9, %v4124_v37, %v4141_v28  ;;  %v4150_v20 = vsel %vm4133_vm10, %v4125_v2, %v4142_v12 }
 0xed5   :  { %v4153_v50 = vpack.c.bf16 %v4148_v35, %v4147_v31  ;;  %v4154_v1 = vpack.c.bf16 %v4150_v20, %v4149_v26 }
 0xed7   :  { %5107 = vmatprep.mubr.bf16.mxu1 %v4153_v50 }
 0xedc   :  { %5108 = vmatmul.mubr.bf16.gmra.mxu1 %v4154_v1 }
 0xf94   :  { %v5105_v21 = vpop.f32.mrf.mxu1 }
 0xf95   :  { %v4269_v27 = vadd.f32 %v5105_v21, %v4696_v25 }
 0xf96   :  { %v4260_v29 = vpop.f32.mrf.mxu1 }
 0xf97   :  { %4294 = vst.msk [vmem:[%s6950_s24 + $0x10] sm:$0xff] %vm4291_vm11, %v4269_v27  ;;  %v4261_v22 = vadd.f32 %v4696_v25, %v4260_v29 }
 0xf98   :  { %v5106_v36 = vpop.f32.mrf.mxu1 }
 0xf99   :  { %4292 = vst.msk [vmem:[%s6950_s24] sm:$0xff] %vm4291_vm11, %v4261_v22  ;;  %v4272_v5 = vadd.f32 %v5106_v36, %v4696_v25 }
 0xf9a   :  { %v4263_v11 = vpop.f32.mrf.mxu1 }
 0xf9b   :  { %4295 = vst.msk [vmem:[%s6950_s24 + $0x18] sm:$0xff] %vm4291_vm11, %v4272_v5  ;;  %v4264_v33 = vadd.f32 %v4696_v25, %v4263_v11 }
 0xf9c   :  { %v5109_v42 = vpop.f32.mrf.mxu1 }
 0xf9d   :  { %4293 = vst.msk [vmem:[%s6950_s24 + $0x8] sm:$0xff] %vm4291_vm11, %v4264_v33  ;;  %v4285_v43 = vadd.f32 %v5109_v42, %v4696_v25 }
 0xf9e   :  { %v4276_v46 = vpop.f32.mrf.mxu1 }
 0xf9f   :  { %4298 = vst.msk [vmem:[%s6950_s24 + $0x30] sm:$0xff] %vm4291_vm11, %v4285_v43  ;;  %v4277_v34 = vadd.f32 %v4696_v25, %v4276_v46 }
 0xfa0   :  { %v5110_v17 = vpop.f32.mrf.mxu1 }
 0xfa1   :  { %4296 = vst.msk [vmem:[%s6950_s24 + $0x20] sm:$0xff] %vm4291_vm11, %v4277_v34  ;;  %v4288_v40 = vadd.f32 %v5110_v17, %v4696_v25 }
 0xfa2   :  { %v4279_v53 = vpop.f32.mrf.mxu1 }
 0xfa3   :  { %4299 = vst.msk [vmem:[%s6950_s24 + $0x38] sm:$0xff] %vm4291_vm11, %v4288_v40  ;;  %v4280_v52 = vadd.f32 %v4696_v25, %v4279_v53 }
 0xfa5   :  { %4297 = vst.msk [vmem:[%s6950_s24 + $0x28] sm:$0xff] %vm4291_vm11, %v4280_v52 }
 0xfa6   :  { %4304 = vsyncpa [#allocation4], 1 }

</bundles_post_ra>
